<compile_context>
chip_gen: v7x
topology: tpu7x:2x2x1
jax: 0.10.0
libtpu: 0.0.40
codegen_flags: <defaults>
</compile_context>

<pallas_src>
import functools

import jax
import jax.numpy as jnp
from jax.experimental import pallas as pl
from jax.experimental.pallas import tpu as pltpu


def _round_up(x, m):
    return (x + m - 1) // m * m


def _pick_tile(n, candidates):
    for c in candidates:
        if c <= n and n % c == 0:
            return c
    return n


# ---------------------------------------------------------------------------
# Pallas kernels
# ---------------------------------------------------------------------------
def _matmul_bias_act_kernel(x_ref, w_ref, b_ref, o_ref, acc_ref, *, act):
    """out = act(x @ w + b); bf16 inputs, f32 accumulation, optional tanh."""
    k = pl.program_id(2)

    @pl.when(k == 0)
    def _():
        acc_ref[...] = jnp.broadcast_to(b_ref[...], acc_ref.shape)

    acc_ref[...] += jnp.dot(x_ref[...], w_ref[...],
                            preferred_element_type=jnp.float32)

    @pl.when(k == pl.num_programs(2) - 1)
    def _():
        y = acc_ref[...]
        if act == "tanh":
            y = jnp.tanh(y)
        o_ref[...] = y.astype(o_ref.dtype)


def _matmul_bias_stats_kernel(x_ref, w_ref, b_ref, o_ref, sum_ref, ssq_ref,
                              acc_ref):
    """out = x @ w + b, plus per-(M-tile, channel) sum / sum-of-squares
    partials taken from the f32 accumulator (fused BatchNorm statistics)."""
    k = pl.program_id(2)

    @pl.when(k == 0)
    def _():
        acc_ref[...] = jnp.broadcast_to(b_ref[...], acc_ref.shape)

    acc_ref[...] += jnp.dot(x_ref[...], w_ref[...],
                            preferred_element_type=jnp.float32)

    @pl.when(k == pl.num_programs(2) - 1)
    def _():
        y = acc_ref[...]
        o_ref[...] = y.astype(o_ref.dtype)
        sum_ref[...] = jnp.sum(y, axis=0, keepdims=True)[None]
        ssq_ref[...] = jnp.sum(y * y, axis=0, keepdims=True)[None]


def _scale_shift_relu_kernel(y_ref, s_ref, t_ref, o_ref):
    """Fused folded-BatchNorm affine + ReLU (f32 math, bf16/f32 storage)."""
    y = y_ref[...].astype(jnp.float32)
    o_ref[...] = jnp.maximum(y * s_ref[...] + t_ref[...],
                             0.0).astype(o_ref.dtype)


# ---------------------------------------------------------------------------
# Pallas call wrappers
# ---------------------------------------------------------------------------
def pallas_matmul(x, w, b, *, epilogue="none", out_dtype=jnp.float32):
    """y[M, Cp] = epilogue(x[M, K] @ w[K, C] + b[C]).

    epilogue: "none" | "tanh" | "stats".  "stats" additionally returns
    per-M-tile partial sums and sums-of-squares over rows (f32) so BatchNorm
    batch statistics can be formed without re-reading y from HBM.
    Only the (small) weight/bias get column padding; x tiles divide its exact
    shape, so the large activation/patch matrices are never copied for pad.
    """
    M, K = x.shape
    Kw, C = w.shape
    assert K == Kw
    Cp = _round_up(C, 128)
    if Cp != C:
        w = jnp.pad(w, ((0, 0), (0, Cp - C)))
        b = jnp.pad(b, (0, Cp - C))
    b2 = b.astype(jnp.float32).reshape(1, Cp)

    tm = _pick_tile(M, (512, 256, 128, 64, 32, 16, 8))
    tn = _pick_tile(Cp, (512, 256, 128))
    tk = K if K <= 512 else _pick_tile(K, (512, 256, 128))
    if K % tk:
        tk = K
    nm = M // tm
    grid = (nm, Cp // tn, K // tk)

    x_spec = pl.BlockSpec((tm, tk), lambda i, j, k: (i, k))
    w_spec = pl.BlockSpec((tk, tn), lambda i, j, k: (k, j))
    b_spec = pl.BlockSpec((1, tn), lambda i, j, k: (0, j))
    o_spec = pl.BlockSpec((tm, tn), lambda i, j, k: (i, j))
    cparams = pltpu.CompilerParams(
        dimension_semantics=("parallel", "parallel", "arbitrary"))
    scratch = [pltpu.VMEM((tm, tn), jnp.float32)]

    if epilogue == "stats":
        stat_spec = pl.BlockSpec((1, 1, tn), lambda i, j, k: (i, 0, j))
        return pl.pallas_call(
            _matmul_bias_stats_kernel,
            out_shape=(jax.ShapeDtypeStruct((M, Cp), out_dtype),
                       jax.ShapeDtypeStruct((nm, 1, Cp), jnp.float32),
                       jax.ShapeDtypeStruct((nm, 1, Cp), jnp.float32)),
            grid_spec=pltpu.PrefetchScalarGridSpec(
                num_scalar_prefetch=0, grid=grid,
                in_specs=[x_spec, w_spec, b_spec],
                out_specs=(o_spec, stat_spec, stat_spec),
                scratch_shapes=scratch),
            compiler_params=cparams,
        )(x, w, b2)

    return pl.pallas_call(
        functools.partial(_matmul_bias_act_kernel, act=epilogue),
        out_shape=jax.ShapeDtypeStruct((M, Cp), out_dtype),
        grid_spec=pltpu.PrefetchScalarGridSpec(
            num_scalar_prefetch=0, grid=grid,
            in_specs=[x_spec, w_spec, b_spec],
            out_specs=o_spec,
            scratch_shapes=scratch),
        compiler_params=cparams,
    )(x, w, b2)


def pallas_scale_shift_relu(y, scale, shift, *, out_dtype):
    """relu(y * scale + shift) with per-channel scale/shift (folded BN)."""
    M, Cy = y.shape
    C = scale.shape[0]
    sp = jnp.pad(scale.astype(jnp.float32), (0, Cy - C)).reshape(1, Cy)
    tp = jnp.pad(shift.astype(jnp.float32), (0, Cy - C)).reshape(1, Cy)
    tm = _pick_tile(M, (1024, 512, 256, 128, 64, 32, 16, 8))
    tn = _pick_tile(Cy, (1024, 512, 256, 128))
    grid = (M // tm, Cy // tn)
    return pl.pallas_call(
        _scale_shift_relu_kernel,
        out_shape=jax.ShapeDtypeStruct((M, Cy), out_dtype),
        grid_spec=pltpu.PrefetchScalarGridSpec(
            num_scalar_prefetch=0, grid=grid,
            in_specs=[pl.BlockSpec((tm, tn), lambda i, j: (i, j)),
                      pl.BlockSpec((1, tn), lambda i, j: (0, j)),
                      pl.BlockSpec((1, tn), lambda i, j: (0, j))],
            out_specs=pl.BlockSpec((tm, tn), lambda i, j: (i, j))),
        compiler_params=pltpu.CompilerParams(
            dimension_semantics=("parallel", "parallel")),
    )(y, sp, tp)


# ---------------------------------------------------------------------------
# ConvTranspose2d(k=4, s=2, p=1) sub-pixel decomposition (JAX glue, no zeros)
# ---------------------------------------------------------------------------
# out[2m+r, 2n+c] only touches a 2x2 input window; kernel taps per sub-pixel:
_KH = ((3, 1), (2, 0))  # r (or c) -> (tap for d=0, tap for d=1)


def _subpixel_patches(x, dtype):
    """x: (N, H, W, C) NHWC -> 4 dense patch matrices (N*H*W, 4*C)."""
    N, H, W, C = x.shape
    xp = jnp.pad(x, ((0, 0), (1, 1), (1, 1), (0, 0)))
    pats = []
    for r in (0, 1):
        for c in (0, 1):
            taps = [xp[:, r + dr:r + dr + H, c + dc:c + dc + W, :]
                    for dr in (0, 1) for dc in (0, 1)]
            p = jnp.stack(taps, axis=3)                  # (N, H, W, 4, C)
            pats.append(p.reshape(N * H * W, 4 * C).astype(dtype))
    return pats


def _subpixel_weights(w, dtype):
    """w: (Cin, Cout, 4, 4) PyTorch weight -> 4 matrices (4*Cin, Cout)."""
    mats = []
    for r in (0, 1):
        for c in (0, 1):
            sub = w[:, :, list(_KH[r]), :][:, :, :, list(_KH[c])]
            mats.append(sub.transpose(2, 3, 0, 1)
                        .reshape(-1, w.shape[1]).astype(dtype))
    return mats


def _interleave_subpixels(ys, N, H, W):
    """4 x (N*H*W, Cp) sub-pixel results -> (N, 2H, 2W, Cp)."""
    Cp = ys[0].shape[-1]
    y = jnp.stack(ys, axis=0).reshape(2, 2, N, H, W, Cp)
    y = y.transpose(2, 3, 0, 4, 1, 5)                    # (N, H, 2, W, 2, Cp)
    return y.reshape(N, 2 * H, 2 * W, Cp)


def _bn_fold(csum, cssq, count, gamma, beta, eps):
    mean = csum / count
    var = jnp.maximum(cssq / count - mean * mean, 0.0)
    scale = gamma * jax.lax.rsqrt(var + eps)
    shift = beta - mean * scale
    return scale, shift


# ---------------------------------------------------------------------------
# Generator: params + forward (Pallas) + pure-JAX reference
# ---------------------------------------------------------------------------
def init_generator_params(key, nz=100, nch_g=64, nch=3):
    chans = [nz, nch_g * 8, nch_g * 4, nch_g * 2, nch_g, nch]
    params = []
    for li in range(5):
        key, wk, bk, gk, b2k = jax.random.split(key, 5)
        cin, cout = chans[li], chans[li + 1]
        w = 0.02 * jax.random.normal(wk, (cin, cout, 4, 4), jnp.float32)
        b = 0.1 * jax.random.normal(bk, (cout,), jnp.float32)
        if li < 4:
            gamma = 1.0 + 0.1 * jax.random.normal(gk, (cout,), jnp.float32)
            beta = 0.1 * jax.random.normal(b2k, (cout,), jnp.float32)
        else:
            gamma = beta = None
        params.append(dict(w=w, b=b, gamma=gamma, beta=beta))
    return params


def generator_forward(z, params, eps=1e-5, compute_dtype=jnp.bfloat16):
    N = z.shape[0]

    # -- layer 0: ConvTranspose(nz, c0, 4, 1, 0) on a 1x1 input == matmul ----
    prm = params[0]
    nz, c0 = prm["w"].shape[:2]
    x2 = z.reshape(N, nz).astype(compute_dtype)
    w0 = prm["w"].transpose(0, 2, 3, 1).reshape(nz, 16 * c0)  # (nz, kh*kw*c0)
    y, psum, pssq = pallas_matmul(x2, w0.astype(compute_dtype),
                                  jnp.tile(prm["b"], 16),
                                  epilogue="stats", out_dtype=compute_dtype)
    csum = psum.sum(axis=(0, 1))[:16 * c0].reshape(16, c0).sum(axis=0)
    cssq = pssq.sum(axis=(0, 1))[:16 * c0].reshape(16, c0).sum(axis=0)
    scale, shift = _bn_fold(csum, cssq, N * 16, prm["gamma"], prm["beta"], eps)
    a = pallas_scale_shift_relu(y, jnp.tile(scale, 16), jnp.tile(shift, 16),
                                out_dtype=compute_dtype)
    x = a[:, :16 * c0].reshape(N, 4, 4, c0)                   # NHWC

    # -- layers 1..3: stride-2 ConvTranspose + (training-mode) BN + ReLU -----
    for li in (1, 2, 3):
        prm = params[li]
        cout = prm["w"].shape[1]
        H, W = x.shape[1:3]
        pats = _subpixel_patches(x, compute_dtype)
        wms = _subpixel_weights(prm["w"], compute_dtype)
        ys, sums, ssqs = [], [], []
        for p_, wm in zip(pats, wms):
            yy, s_, q_ = pallas_matmul(p_, wm, prm["b"], epilogue="stats",
                                       out_dtype=compute_dtype)
            ys.append(yy), sums.append(s_), ssqs.append(q_)
        csum = sum(s_.sum(axis=(0, 1)) for s_ in sums)[:cout]
        cssq = sum(q_.sum(axis=(0, 1)) for q_ in ssqs)[:cout]
        scale, shift = _bn_fold(csum, cssq, 4 * N * H * W,
                                prm["gamma"], prm["beta"], eps)
        yfull = _interleave_subpixels(ys, N, H, W)            # (N,2H,2W,Cp)
        Cp = yfull.shape[-1]
        a = pallas_scale_shift_relu(yfull.reshape(-1, Cp), scale, shift,
                                    out_dtype=compute_dtype)
        x = a.reshape(N, 2 * H, 2 * W, Cp)[..., :cout]

    # -- layer 4: stride-2 ConvTranspose + fused Tanh -------------------------
    prm = params[4]
    cout = prm["w"].shape[1]
    H, W = x.shape[1:3]
    pats = _subpixel_patches(x, compute_dtype)
    wms = _subpixel_weights(prm["w"], compute_dtype)
    ys = [pallas_matmul(p_, wm, prm["b"], epilogue="tanh",
                        out_dtype=compute_dtype)
          for p_, wm in zip(pats, wms)]
    out = _interleave_subpixels(ys, N, H, W)[..., :cout]
    return out.astype(jnp.float32).transpose(0, 3, 1, 2)      # NCHW boundary


def _ref_conv_transpose(x, w, b, stride, pad):
    k = w.shape[2]
    rhs = jnp.flip(w, (2, 3)).transpose(1, 0, 2, 3)           # (Cout,Cin,k,k)
    y = jax.lax.conv_general_dilated(
        x, rhs, window_strides=(1, 1),
        padding=[(k - 1 - pad, k - 1 - pad)] * 2,
        lhs_dilation=(stride, stride),
        dimension_numbers=("NCHW", "OIHW", "NCHW"),
        precision=jax.lax.Precision.HIGHEST)
    return y + b.reshape(1, -1, 1, 1)


def reference_forward(z, params, eps=1e-5):
    x = z
    cfgs = [(1, 0), (2, 1), (2, 1), (2, 1), (2, 1)]
    for li, ((s, p), prm) in enumerate(zip(cfgs, params)):
        x = _ref_conv_transpose(x, prm["w"], prm["b"], s, p)
        if li < 4:
            mean = x.mean(axis=(0, 2, 3), keepdims=True)
            var = ((x - mean) ** 2).mean(axis=(0, 2, 3), keepdims=True)
            x = (prm["gamma"].reshape(1, -1, 1, 1) * (x - mean)
                 / jnp.sqrt(var + eps) + prm["beta"].reshape(1, -1, 1, 1))
            x = jnp.maximum(x, 0.0)
        else:
            x = jnp.tanh(x)
    return x


if __name__ == "__main__":
    # Small, shape-consistent config: nz=16, nch_g=8, nch=3, batch=2.
    nz, nch_g, nch, batch = 16, 8, 3, 2
    key = jax.random.PRNGKey(0)
    pkey, zkey = jax.random.split(key)
    params = init_generator_params(pkey, nz=nz, nch_g=nch_g, nch=nch)
    z = jax.random.normal(zkey, (batch, nz, 1, 1), jnp.float32)

    fwd_bf16 = jax.jit(functools.partial(generator_forward,
                                         compute_dtype=jnp.bfloat16))
    fwd_f32 = jax.jit(functools.partial(generator_forward,
                                        compute_dtype=jnp.float32))
    ref_fwd = jax.jit(reference_forward)

    out = jax.block_until_ready(fwd_bf16(z, params))
    assert out.shape == (batch, nch, 64, 64), out.shape
    assert bool(jnp.all(jnp.isfinite(out)))
    assert bool(jnp.all(jnp.abs(out) <= 1.0))  # tanh output range

    # correctness vs a pure-JAX f32 reference of the PyTorch module
    ref = jax.block_until_ready(ref_fwd(z, params))
    out_f32 = jax.block_until_ready(fwd_f32(z, params))

    def rel_err(a, b):
        return float(jnp.linalg.norm(a - b) / (jnp.linalg.norm(b) + 1e-12))

    e32 = rel_err(out_f32, ref)
    e16 = rel_err(out, ref)
    assert e32 < 0.1, f"f32-mode relative error too large: {e32}"
    assert e16 < 0.25, f"bf16-mode relative error too large: {e16}"

    print("KERNEL_OK")
</pallas_src>

<mosaic_0001>
module attributes {stable_mosaic.version = 11 : i64} {
  func.func @_matmul_bias_stats_kernel(%arg0: i32, %arg1: i32, %arg2: i32, %arg3: memref<2x16xbf16, #tpu.memory_space<vmem>>, %arg4: memref<16x512xbf16, #tpu.memory_space<vmem>>, %arg5: memref<1x512xf32, #tpu.memory_space<vmem>>, %arg6: memref<2x512xbf16, #tpu.memory_space<vmem>>, %arg7: memref<1x1x512xf32, #tpu.memory_space<vmem>>, %arg8: memref<1x1x512xf32, #tpu.memory_space<vmem>>, %arg9: memref<2x512xf32, #tpu.memory_space<vmem>>) attributes {dimension_semantics = [#tpu.dimension_semantics<parallel>, #tpu.dimension_semantics<parallel>, #tpu.dimension_semantics<arbitrary>], iteration_bounds = array<i64: 1, 2, 1>, scalar_prefetch = 0 : i64, scratch_operands = 1 : i64, tpu.core_type = #tpu.core_type<tc>, window_params = [{transform_indices = @transform_0, window_bounds = array<i64: 2, 16>}, {transform_indices = @transform_1, window_bounds = array<i64: 16, 512>}, {transform_indices = @transform_2, window_bounds = array<i64: 1, 512>}, {transform_indices = @transform_3, window_bounds = array<i64: 2, 512>}, {transform_indices = @transform_4, window_bounds = array<i64: 1, 1, 512>}, {transform_indices = @transform_5, window_bounds = array<i64: 1, 1, 512>}]} {
    %c0_i32 = arith.constant 0 : i32
    %0 = arith.cmpi eq, %arg2, %c0_i32 : i32
    %1 = arith.extui %0 : i1 to i32
    %c0_i32_0 = arith.constant 0 : i32
    %2 = arith.cmpi ne, %1, %c0_i32_0 : i32
    scf.if %2 {
      %c0_10 = arith.constant 0 : index
      %c0_11 = arith.constant 0 : index
      %12 = vector.load %arg5[%c0_10, %c0_11] : memref<1x512xf32, #tpu.memory_space<vmem>>, vector<1x512xf32>
      %13 = vector.shape_cast %12 : vector<1x512xf32> to vector<1x512xf32>
      %14 = vector.broadcast %13 : vector<1x512xf32> to vector<2x512xf32>
      %c0_12 = arith.constant 0 : index
      %c0_13 = arith.constant 0 : index
      %15 = vector.load %arg9[%c0_12, %c0_13] : memref<2x512xf32, #tpu.memory_space<vmem>>, vector<2x512xf32>
      tpu.vector_store %arg9[%c0_12, %c0_13], %14 {strides = array<i32>} : memref<2x512xf32, #tpu.memory_space<vmem>>, vector<2x512xf32>,
    } else {
    }
    %c0 = arith.constant 0 : index
    %c0_1 = arith.constant 0 : index
    %3 = vector.load %arg9[%c0, %c0_1] : memref<2x512xf32, #tpu.memory_space<vmem>>, vector<2x512xf32>
    %c0_2 = arith.constant 0 : index
    %c0_3 = arith.constant 0 : index
    %4 = vector.load %arg3[%c0_2, %c0_3] : memref<2x16xbf16, #tpu.memory_space<vmem>>, vector<2x16xbf16>
    %c0_4 = arith.constant 0 : index
    %c0_5 = arith.constant 0 : index
    %5 = vector.load %arg4[%c0_4, %c0_5] : memref<16x512xbf16, #tpu.memory_space<vmem>>, vector<16x512xbf16>
    %cst = arith.constant dense<0.000000e+00> : vector<2x512xf32>
    %6 = tpu.matmul %4, %5, %cst {dimension_numbers = #tpu.dot_dimension_numbers<[1], [0], [0], [1], [0, 0, 1, 1], [], []>} : vector<2x16xbf16>, vector<16x512xbf16>, vector<2x512xf32> -> vector<2x512xf32>
    %7 = arith.addf %3, %6 : vector<2x512xf32>
    %c0_6 = arith.constant 0 : index
    %c0_7 = arith.constant 0 : index
    %8 = vector.load %arg9[%c0_6, %c0_7] : memref<2x512xf32, #tpu.memory_space<vmem>>, vector<2x512xf32>
    tpu.vector_store %arg9[%c0_6, %c0_7], %7 {strides = array<i32>} : memref<2x512xf32, #tpu.memory_space<vmem>>, vector<2x512xf32>,
    %c0_i32_8 = arith.constant 0 : i32
    %9 = arith.cmpi eq, %arg2, %c0_i32_8 : i32
    %10 = arith.extui %9 : i1 to i32
    %c0_i32_9 = arith.constant 0 : i32
    %11 = arith.cmpi ne, %10, %c0_i32_9 : i32
    scf.if %11 {
      %c0_10 = arith.constant 0 : index
      %c0_11 = arith.constant 0 : index
      %12 = vector.load %arg9[%c0_10, %c0_11] : memref<2x512xf32, #tpu.memory_space<vmem>>, vector<2x512xf32>
      %13 = arith.truncf %12 : vector<2x512xf32> to vector<2x512xbf16>
      %c0_12 = arith.constant 0 : index
      %c0_13 = arith.constant 0 : index
      %14 = vector.load %arg6[%c0_12, %c0_13] : memref<2x512xbf16, #tpu.memory_space<vmem>>, vector<2x512xbf16>
      tpu.vector_store %arg6[%c0_12, %c0_13], %13 {strides = array<i32>} : memref<2x512xbf16, #tpu.memory_space<vmem>>, vector<2x512xbf16>,
      %cst_14 = arith.constant dense<0.000000e+00> : vector<512xf32>
      %15 = vector.multi_reduction <add>, %12, %cst_14 [0] : vector<2x512xf32> to vector<512xf32>
      %16 = vector.shape_cast %15 : vector<512xf32> to vector<1x512xf32>
      %17 = vector.shape_cast %16 : vector<1x512xf32> to vector<1x1x512xf32>
      %c0_15 = arith.constant 0 : index
      %c0_16 = arith.constant 0 : index
      %c0_17 = arith.constant 0 : index
      %18 = vector.load %arg7[%c0_15, %c0_16, %c0_17] : memref<1x1x512xf32, #tpu.memory_space<vmem>>, vector<1x1x512xf32>
      tpu.vector_store %arg7[%c0_15, %c0_16, %c0_17], %17 {strides = array<i32>} : memref<1x1x512xf32, #tpu.memory_space<vmem>>, vector<1x1x512xf32>,
      %19 = arith.mulf %12, %12 : vector<2x512xf32>
      %cst_18 = arith.constant dense<0.000000e+00> : vector<512xf32>
      %20 = vector.multi_reduction <add>, %19, %cst_18 [0] : vector<2x512xf32> to vector<512xf32>
      %21 = vector.shape_cast %20 : vector<512xf32> to vector<1x512xf32>
      %22 = vector.shape_cast %21 : vector<1x512xf32> to vector<1x1x512xf32>
      %c0_19 = arith.constant 0 : index
      %c0_20 = arith.constant 0 : index
      %c0_21 = arith.constant 0 : index
      %23 = vector.load %arg8[%c0_19, %c0_20, %c0_21] : memref<1x1x512xf32, #tpu.memory_space<vmem>>, vector<1x1x512xf32>
      tpu.vector_store %arg8[%c0_19, %c0_20, %c0_21], %22 {strides = array<i32>} : memref<1x1x512xf32, #tpu.memory_space<vmem>>, vector<1x1x512xf32>,
    } else {
    }
    return
  }
  func.func @transform_0(%arg0: i32, %arg1: i32, %arg2: i32) -> (i32, i32) {
    %c0_i32 = arith.constant 0 : i32
    return %arg0, %arg2 : i32, i32
  }
  func.func @transform_1(%arg0: i32, %arg1: i32, %arg2: i32) -> (i32, i32) {
    %c0_i32 = arith.constant 0 : i32
    return %arg2, %arg1 : i32, i32
  }
  func.func @transform_2(%arg0: i32, %arg1: i32, %arg2: i32) -> (i32, i32) {
    %c0_i32 = arith.constant 0 : i32
    %c0_i32_0 = arith.constant 0 : i32
    return %c0_i32, %arg1 : i32, i32
  }
  func.func @transform_3(%arg0: i32, %arg1: i32, %arg2: i32) -> (i32, i32) {
    %c0_i32 = arith.constant 0 : i32
    return %arg0, %arg1 : i32, i32
  }
  func.func @transform_4(%arg0: i32, %arg1: i32, %arg2: i32) -> (i32, i32, i32) {
    %c0_i32 = arith.constant 0 : i32
    %c0_i32_0 = arith.constant 0 : i32
    return %arg0, %c0_i32, %arg1 : i32, i32, i32
  }
  func.func @transform_5(%arg0: i32, %arg1: i32, %arg2: i32) -> (i32, i32, i32) {
    %c0_i32 = arith.constant 0 : i32
    %c0_i32_0 = arith.constant 0 : i32
    return %arg0, %c0_i32, %arg1 : i32, i32, i32
  }
}

module attributes {stable_mosaic.version = 11 : i64} {
  func.func @_scale_shift_relu_kernel(%arg0: i32, %arg1: i32, %arg2: memref<2x1024xbf16, #tpu.memory_space<vmem>>, %arg3: memref<1x1024xf32, #tpu.memory_space<vmem>>, %arg4: memref<1x1024xf32, #tpu.memory_space<vmem>>, %arg5: memref<2x1024xbf16, #tpu.memory_space<vmem>>) attributes {dimension_semantics = [#tpu.dimension_semantics<parallel>, #tpu.dimension_semantics<parallel>], iteration_bounds = array<i64: 1, 1>, scalar_prefetch = 0 : i64, scratch_operands = 0 : i64, tpu.core_type = #tpu.core_type<tc>, window_params = [{transform_indices = @transform_0, window_bounds = array<i64: 2, 1024>}, {transform_indices = @transform_1, window_bounds = array<i64: 1, 1024>}, {transform_indices = @transform_2, window_bounds = array<i64: 1, 1024>}, {transform_indices = @transform_3, window_bounds = array<i64: 2, 1024>}]} {
    %c0 = arith.constant 0 : index
    %c0_0 = arith.constant 0 : index
    %0 = vector.load %arg2[%c0, %c0_0] : memref<2x1024xbf16, #tpu.memory_space<vmem>>, vector<2x1024xbf16>
    %1 = arith.extf %0 : vector<2x1024xbf16> to vector<2x1024xf32>
    %c0_1 = arith.constant 0 : index
    %c0_2 = arith.constant 0 : index
    %2 = vector.load %arg3[%c0_1, %c0_2] : memref<1x1024xf32, #tpu.memory_space<vmem>>, vector<1x1024xf32>
    %3 = vector.broadcast %2 : vector<1x1024xf32> to vector<2x1024xf32>
    %4 = arith.mulf %1, %3 : vector<2x1024xf32>
    %c0_3 = arith.constant 0 : index
    %c0_4 = arith.constant 0 : index
    %5 = vector.load %arg4[%c0_3, %c0_4] : memref<1x1024xf32, #tpu.memory_space<vmem>>, vector<1x1024xf32>
    %6 = vector.broadcast %5 : vector<1x1024xf32> to vector<2x1024xf32>
    %7 = arith.addf %4, %6 : vector<2x1024xf32>
    %cst = arith.constant 0.000000e+00 : f32
    %8 = vector.broadcast %cst : f32 to vector<2x1024xf32>
    %9 = arith.maximumf %7, %8 : vector<2x1024xf32>
    %10 = arith.truncf %9 : vector<2x1024xf32> to vector<2x1024xbf16>
    %c0_5 = arith.constant 0 : index
    %c0_6 = arith.constant 0 : index
    %11 = vector.load %arg5[%c0_5, %c0_6] : memref<2x1024xbf16, #tpu.memory_space<vmem>>, vector<2x1024xbf16>
    tpu.vector_store %arg5[%c0_5, %c0_6], %10 {strides = array<i32>} : memref<2x1024xbf16, #tpu.memory_space<vmem>>, vector<2x1024xbf16>,
    return
  }
  func.func @transform_0(%arg0: i32, %arg1: i32) -> (i32, i32) {
    %c0_i32 = arith.constant 0 : i32
    return %arg0, %arg1 : i32, i32
  }
  func.func @transform_1(%arg0: i32, %arg1: i32) -> (i32, i32) {
    %c0_i32 = arith.constant 0 : i32
    %c0_i32_0 = arith.constant 0 : i32
    return %c0_i32, %arg1 : i32, i32
  }
  func.func @transform_2(%arg0: i32, %arg1: i32) -> (i32, i32) {
    %c0_i32 = arith.constant 0 : i32
    %c0_i32_0 = arith.constant 0 : i32
    return %c0_i32, %arg1 : i32, i32
  }
  func.func @transform_3(%arg0: i32, %arg1: i32) -> (i32, i32) {
    %c0_i32 = arith.constant 0 : i32
    return %arg0, %arg1 : i32, i32
  }
}

module attributes {stable_mosaic.version = 11 : i64} {
  func.func @_matmul_bias_stats_kernel(%arg0: i32, %arg1: i32, %arg2: i32, %arg3: memref<32x256xbf16, #tpu.memory_space<vmem>>, %arg4: memref<256x128xbf16, #tpu.memory_space<vmem>>, %arg5: memref<1x128xf32, #tpu.memory_space<vmem>>, %arg6: memref<32x128xbf16, #tpu.memory_space<vmem>>, %arg7: memref<1x1x128xf32, #tpu.memory_space<vmem>>, %arg8: memref<1x1x128xf32, #tpu.memory_space<vmem>>, %arg9: memref<32x128xf32, #tpu.memory_space<vmem>>) attributes {dimension_semantics = [#tpu.dimension_semantics<parallel>, #tpu.dimension_semantics<parallel>, #tpu.dimension_semantics<arbitrary>], iteration_bounds = array<i64: 1, 1, 1>, scalar_prefetch = 0 : i64, scratch_operands = 1 : i64, tpu.core_type = #tpu.core_type<tc>, window_params = [{transform_indices = @transform_0, window_bounds = array<i64: 32, 256>}, {transform_indices = @transform_1, window_bounds = array<i64: 256, 128>}, {transform_indices = @transform_2, window_bounds = array<i64: 1, 128>}, {transform_indices = @transform_3, window_bounds = array<i64: 32, 128>}, {transform_indices = @transform_4, window_bounds = array<i64: 1, 1, 128>}, {transform_indices = @transform_5, window_bounds = array<i64: 1, 1, 128>}]} {
    %c0_i32 = arith.constant 0 : i32
    %0 = arith.cmpi eq, %arg2, %c0_i32 : i32
    %1 = arith.extui %0 : i1 to i32
    %c0_i32_0 = arith.constant 0 : i32
    %2 = arith.cmpi ne, %1, %c0_i32_0 : i32
    scf.if %2 {
      %c0_10 = arith.constant 0 : index
      %c0_11 = arith.constant 0 : index
      %12 = vector.load %arg5[%c0_10, %c0_11] : memref<1x128xf32, #tpu.memory_space<vmem>>, vector<1x128xf32>
      %13 = vector.shape_cast %12 : vector<1x128xf32> to vector<1x128xf32>
      %14 = vector.broadcast %13 : vector<1x128xf32> to vector<32x128xf32>
      %c0_12 = arith.constant 0 : index
      %c0_13 = arith.constant 0 : index
      %15 = vector.load %arg9[%c0_12, %c0_13] : memref<32x128xf32, #tpu.memory_space<vmem>>, vector<32x128xf32>
      tpu.vector_store %arg9[%c0_12, %c0_13], %14 {strides = array<i32>} : memref<32x128xf32, #tpu.memory_space<vmem>>, vector<32x128xf32>,
    } else {
    }
    %c0 = arith.constant 0 : index
    %c0_1 = arith.constant 0 : index
    %3 = vector.load %arg9[%c0, %c0_1] : memref<32x128xf32, #tpu.memory_space<vmem>>, vector<32x128xf32>
    %c0_2 = arith.constant 0 : index
    %c0_3 = arith.constant 0 : index
    %4 = vector.load %arg3[%c0_2, %c0_3] : memref<32x256xbf16, #tpu.memory_space<vmem>>, vector<32x256xbf16>
    %c0_4 = arith.constant 0 : index
    %c0_5 = arith.constant 0 : index
    %5 = vector.load %arg4[%c0_4, %c0_5] : memref<256x128xbf16, #tpu.memory_space<vmem>>, vector<256x128xbf16>
    %cst = arith.constant dense<0.000000e+00> : vector<32x128xf32>
    %6 = tpu.matmul %4, %5, %cst {dimension_numbers = #tpu.dot_dimension_numbers<[1], [0], [0], [1], [0, 0, 1, 1], [], []>} : vector<32x256xbf16>, vector<256x128xbf16>, vector<32x128xf32> -> vector<32x128xf32>
    %7 = arith.addf %3, %6 : vector<32x128xf32>
    %c0_6 = arith.constant 0 : index
    %c0_7 = arith.constant 0 : index
    %8 = vector.load %arg9[%c0_6, %c0_7] : memref<32x128xf32, #tpu.memory_space<vmem>>, vector<32x128xf32>
    tpu.vector_store %arg9[%c0_6, %c0_7], %7 {strides = array<i32>} : memref<32x128xf32, #tpu.memory_space<vmem>>, vector<32x128xf32>,
    %c0_i32_8 = arith.constant 0 : i32
    %9 = arith.cmpi eq, %arg2, %c0_i32_8 : i32
    %10 = arith.extui %9 : i1 to i32
    %c0_i32_9 = arith.constant 0 : i32
    %11 = arith.cmpi ne, %10, %c0_i32_9 : i32
    scf.if %11 {
      %c0_10 = arith.constant 0 : index
      %c0_11 = arith.constant 0 : index
      %12 = vector.load %arg9[%c0_10, %c0_11] : memref<32x128xf32, #tpu.memory_space<vmem>>, vector<32x128xf32>
      %13 = arith.truncf %12 : vector<32x128xf32> to vector<32x128xbf16>
      %c0_12 = arith.constant 0 : index
      %c0_13 = arith.constant 0 : index
      %14 = vector.load %arg6[%c0_12, %c0_13] : memref<32x128xbf16, #tpu.memory_space<vmem>>, vector<32x128xbf16>
      tpu.vector_store %arg6[%c0_12, %c0_13], %13 {strides = array<i32>} : memref<32x128xbf16, #tpu.memory_space<vmem>>, vector<32x128xbf16>,
      %cst_14 = arith.constant dense<0.000000e+00> : vector<128xf32>
      %15 = vector.multi_reduction <add>, %12, %cst_14 [0] : vector<32x128xf32> to vector<128xf32>
      %16 = vector.shape_cast %15 : vector<128xf32> to vector<1x128xf32>
      %17 = vector.shape_cast %16 : vector<1x128xf32> to vector<1x1x128xf32>
      %c0_15 = arith.constant 0 : index
      %c0_16 = arith.constant 0 : index
      %c0_17 = arith.constant 0 : index
      %18 = vector.load %arg7[%c0_15, %c0_16, %c0_17] : memref<1x1x128xf32, #tpu.memory_space<vmem>>, vector<1x1x128xf32>
      tpu.vector_store %arg7[%c0_15, %c0_16, %c0_17], %17 {strides = array<i32>} : memref<1x1x128xf32, #tpu.memory_space<vmem>>, vector<1x1x128xf32>,
      %19 = arith.mulf %12, %12 : vector<32x128xf32>
      %cst_18 = arith.constant dense<0.000000e+00> : vector<128xf32>
      %20 = vector.multi_reduction <add>, %19, %cst_18 [0] : vector<32x128xf32> to vector<128xf32>
      %21 = vector.shape_cast %20 : vector<128xf32> to vector<1x128xf32>
      %22 = vector.shape_cast %21 : vector<1x128xf32> to vector<1x1x128xf32>
      %c0_19 = arith.constant 0 : index
      %c0_20 = arith.constant 0 : index
      %c0_21 = arith.constant 0 : index
      %23 = vector.load %arg8[%c0_19, %c0_20, %c0_21] : memref<1x1x128xf32, #tpu.memory_space<vmem>>, vector<1x1x128xf32>
      tpu.vector_store %arg8[%c0_19, %c0_20, %c0_21], %22 {strides = array<i32>} : memref<1x1x128xf32, #tpu.memory_space<vmem>>, vector<1x1x128xf32>,
    } else {
    }
    return
  }
  func.func @transform_0(%arg0: i32, %arg1: i32, %arg2: i32) -> (i32, i32) {
    %c0_i32 = arith.constant 0 : i32
    return %arg0, %arg2 : i32, i32
  }
  func.func @transform_1(%arg0: i32, %arg1: i32, %arg2: i32) -> (i32, i32) {
    %c0_i32 = arith.constant 0 : i32
    return %arg2, %arg1 : i32, i32
  }
  func.func @transform_2(%arg0: i32, %arg1: i32, %arg2: i32) -> (i32, i32) {
    %c0_i32 = arith.constant 0 : i32
    %c0_i32_0 = arith.constant 0 : i32
    return %c0_i32, %arg1 : i32, i32
  }
  func.func @transform_3(%arg0: i32, %arg1: i32, %arg2: i32) -> (i32, i32) {
    %c0_i32 = arith.constant 0 : i32
    return %arg0, %arg1 : i32, i32
  }
  func.func @transform_4(%arg0: i32, %arg1: i32, %arg2: i32) -> (i32, i32, i32) {
    %c0_i32 = arith.constant 0 : i32
    %c0_i32_0 = arith.constant 0 : i32
    return %arg0, %c0_i32, %arg1 : i32, i32, i32
  }
  func.func @transform_5(%arg0: i32, %arg1: i32, %arg2: i32) -> (i32, i32, i32) {
    %c0_i32 = arith.constant 0 : i32
    %c0_i32_0 = arith.constant 0 : i32
    return %arg0, %c0_i32, %arg1 : i32, i32, i32
  }
}

module attributes {stable_mosaic.version = 11 : i64} {
  func.func @_scale_shift_relu_kernel(%arg0: i32, %arg1: i32, %arg2: memref<128x128xbf16, #tpu.memory_space<vmem>>, %arg3: memref<1x128xf32, #tpu.memory_space<vmem>>, %arg4: memref<1x128xf32, #tpu.memory_space<vmem>>, %arg5: memref<128x128xbf16, #tpu.memory_space<vmem>>) attributes {dimension_semantics = [#tpu.dimension_semantics<parallel>, #tpu.dimension_semantics<parallel>], iteration_bounds = array<i64: 1, 1>, scalar_prefetch = 0 : i64, scratch_operands = 0 : i64, tpu.core_type = #tpu.core_type<tc>, window_params = [{transform_indices = @transform_0, window_bounds = array<i64: 128, 128>}, {transform_indices = @transform_1, window_bounds = array<i64: 1, 128>}, {transform_indices = @transform_2, window_bounds = array<i64: 1, 128>}, {transform_indices = @transform_3, window_bounds = array<i64: 128, 128>}]} {
    %c0 = arith.constant 0 : index
    %c0_0 = arith.constant 0 : index
    %0 = vector.load %arg2[%c0, %c0_0] : memref<128x128xbf16, #tpu.memory_space<vmem>>, vector<128x128xbf16>
    %1 = arith.extf %0 : vector<128x128xbf16> to vector<128x128xf32>
    %c0_1 = arith.constant 0 : index
    %c0_2 = arith.constant 0 : index
    %2 = vector.load %arg3[%c0_1, %c0_2] : memref<1x128xf32, #tpu.memory_space<vmem>>, vector<1x128xf32>
    %3 = vector.broadcast %2 : vector<1x128xf32> to vector<128x128xf32>
    %4 = arith.mulf %1, %3 : vector<128x128xf32>
    %c0_3 = arith.constant 0 : index
    %c0_4 = arith.constant 0 : index
    %5 = vector.load %arg4[%c0_3, %c0_4] : memref<1x128xf32, #tpu.memory_space<vmem>>, vector<1x128xf32>
    %6 = vector.broadcast %5 : vector<1x128xf32> to vector<128x128xf32>
    %7 = arith.addf %4, %6 : vector<128x128xf32>
    %cst = arith.constant 0.000000e+00 : f32
    %8 = vector.broadcast %cst : f32 to vector<128x128xf32>
    %9 = arith.maximumf %7, %8 : vector<128x128xf32>
    %10 = arith.truncf %9 : vector<128x128xf32> to vector<128x128xbf16>
    %c0_5 = arith.constant 0 : index
    %c0_6 = arith.constant 0 : index
    %11 = vector.load %arg5[%c0_5, %c0_6] : memref<128x128xbf16, #tpu.memory_space<vmem>>, vector<128x128xbf16>
    tpu.vector_store %arg5[%c0_5, %c0_6], %10 {strides = array<i32>} : memref<128x128xbf16, #tpu.memory_space<vmem>>, vector<128x128xbf16>,
    return
  }
  func.func @transform_0(%arg0: i32, %arg1: i32) -> (i32, i32) {
    %c0_i32 = arith.constant 0 : i32
    return %arg0, %arg1 : i32, i32
  }
  func.func @transform_1(%arg0: i32, %arg1: i32) -> (i32, i32) {
    %c0_i32 = arith.constant 0 : i32
    %c0_i32_0 = arith.constant 0 : i32
    return %c0_i32, %arg1 : i32, i32
  }
  func.func @transform_2(%arg0: i32, %arg1: i32) -> (i32, i32) {
    %c0_i32 = arith.constant 0 : i32
    %c0_i32_0 = arith.constant 0 : i32
    return %c0_i32, %arg1 : i32, i32
  }
  func.func @transform_3(%arg0: i32, %arg1: i32) -> (i32, i32) {
    %c0_i32 = arith.constant 0 : i32
    return %arg0, %arg1 : i32, i32
  }
}

module attributes {stable_mosaic.version = 11 : i64} {
  func.func @_matmul_bias_stats_kernel(%arg0: i32, %arg1: i32, %arg2: i32, %arg3: memref<128x128xbf16, #tpu.memory_space<vmem>>, %arg4: memref<128x128xbf16, #tpu.memory_space<vmem>>, %arg5: memref<1x128xf32, #tpu.memory_space<vmem>>, %arg6: memref<128x128xbf16, #tpu.memory_space<vmem>>, %arg7: memref<1x1x128xf32, #tpu.memory_space<vmem>>, %arg8: memref<1x1x128xf32, #tpu.memory_space<vmem>>, %arg9: memref<128x128xf32, #tpu.memory_space<vmem>>) attributes {dimension_semantics = [#tpu.dimension_semantics<parallel>, #tpu.dimension_semantics<parallel>, #tpu.dimension_semantics<arbitrary>], iteration_bounds = array<i64: 1, 1, 1>, scalar_prefetch = 0 : i64, scratch_operands = 1 : i64, tpu.core_type = #tpu.core_type<tc>, window_params = [{transform_indices = @transform_0, window_bounds = array<i64: 128, 128>}, {transform_indices = @transform_1, window_bounds = array<i64: 128, 128>}, {transform_indices = @transform_2, window_bounds = array<i64: 1, 128>}, {transform_indices = @transform_3, window_bounds = array<i64: 128, 128>}, {transform_indices = @transform_4, window_bounds = array<i64: 1, 1, 128>}, {transform_indices = @transform_5, window_bounds = array<i64: 1, 1, 128>}]} {
    %c0_i32 = arith.constant 0 : i32
    %0 = arith.cmpi eq, %arg2, %c0_i32 : i32
    %1 = arith.extui %0 : i1 to i32
    %c0_i32_0 = arith.constant 0 : i32
    %2 = arith.cmpi ne, %1, %c0_i32_0 : i32
    scf.if %2 {
      %c0_10 = arith.constant 0 : index
      %c0_11 = arith.constant 0 : index
      %12 = vector.load %arg5[%c0_10, %c0_11] : memref<1x128xf32, #tpu.memory_space<vmem>>, vector<1x128xf32>
      %13 = vector.shape_cast %12 : vector<1x128xf32> to vector<1x128xf32>
      %14 = vector.broadcast %13 : vector<1x128xf32> to vector<128x128xf32>
      %c0_12 = arith.constant 0 : index
      %c0_13 = arith.constant 0 : index
      %15 = vector.load %arg9[%c0_12, %c0_13] : memref<128x128xf32, #tpu.memory_space<vmem>>, vector<128x128xf32>
      tpu.vector_store %arg9[%c0_12, %c0_13], %14 {strides = array<i32>} : memref<128x128xf32, #tpu.memory_space<vmem>>, vector<128x128xf32>,
    } else {
    }
    %c0 = arith.constant 0 : index
    %c0_1 = arith.constant 0 : index
    %3 = vector.load %arg9[%c0, %c0_1] : memref<128x128xf32, #tpu.memory_space<vmem>>, vector<128x128xf32>
    %c0_2 = arith.constant 0 : index
    %c0_3 = arith.constant 0 : index
    %4 = vector.load %arg3[%c0_2, %c0_3] : memref<128x128xbf16, #tpu.memory_space<vmem>>, vector<128x128xbf16>
    %c0_4 = arith.constant 0 : index
    %c0_5 = arith.constant 0 : index
    %5 = vector.load %arg4[%c0_4, %c0_5] : memref<128x128xbf16, #tpu.memory_space<vmem>>, vector<128x128xbf16>
    %cst = arith.constant dense<0.000000e+00> : vector<128x128xf32>
    %6 = tpu.matmul %4, %5, %cst {dimension_numbers = #tpu.dot_dimension_numbers<[1], [0], [0], [1], [0, 0, 1, 1], [], []>} : vector<128x128xbf16>, vector<128x128xbf16>, vector<128x128xf32> -> vector<128x128xf32>
    %7 = arith.addf %3, %6 : vector<128x128xf32>
    %c0_6 = arith.constant 0 : index
    %c0_7 = arith.constant 0 : index
    %8 = vector.load %arg9[%c0_6, %c0_7] : memref<128x128xf32, #tpu.memory_space<vmem>>, vector<128x128xf32>
    tpu.vector_store %arg9[%c0_6, %c0_7], %7 {strides = array<i32>} : memref<128x128xf32, #tpu.memory_space<vmem>>, vector<128x128xf32>,
    %c0_i32_8 = arith.constant 0 : i32
    %9 = arith.cmpi eq, %arg2, %c0_i32_8 : i32
    %10 = arith.extui %9 : i1 to i32
    %c0_i32_9 = arith.constant 0 : i32
    %11 = arith.cmpi ne, %10, %c0_i32_9 : i32
    scf.if %11 {
      %c0_10 = arith.constant 0 : index
      %c0_11 = arith.constant 0 : index
      %12 = vector.load %arg9[%c0_10, %c0_11] : memref<128x128xf32, #tpu.memory_space<vmem>>, vector<128x128xf32>
      %13 = arith.truncf %12 : vector<128x128xf32> to vector<128x128xbf16>
      %c0_12 = arith.constant 0 : index
      %c0_13 = arith.constant 0 : index
      %14 = vector.load %arg6[%c0_12, %c0_13] : memref<128x128xbf16, #tpu.memory_space<vmem>>, vector<128x128xbf16>
      tpu.vector_store %arg6[%c0_12, %c0_13], %13 {strides = array<i32>} : memref<128x128xbf16, #tpu.memory_space<vmem>>, vector<128x128xbf16>,
      %cst_14 = arith.constant dense<0.000000e+00> : vector<128xf32>
      %15 = vector.multi_reduction <add>, %12, %cst_14 [0] : vector<128x128xf32> to vector<128xf32>
      %16 = vector.shape_cast %15 : vector<128xf32> to vector<1x128xf32>
      %17 = vector.shape_cast %16 : vector<1x128xf32> to vector<1x1x128xf32>
      %c0_15 = arith.constant 0 : index
      %c0_16 = arith.constant 0 : index
      %c0_17 = arith.constant 0 : index
      %18 = vector.load %arg7[%c0_15, %c0_16, %c0_17] : memref<1x1x128xf32, #tpu.memory_space<vmem>>, vector<1x1x128xf32>
      tpu.vector_store %arg7[%c0_15, %c0_16, %c0_17], %17 {strides = array<i32>} : memref<1x1x128xf32, #tpu.memory_space<vmem>>, vector<1x1x128xf32>,
      %19 = arith.mulf %12, %12 : vector<128x128xf32>
      %cst_18 = arith.constant dense<0.000000e+00> : vector<128xf32>
      %20 = vector.multi_reduction <add>, %19, %cst_18 [0] : vector<128x128xf32> to vector<128xf32>
      %21 = vector.shape_cast %20 : vector<128xf32> to vector<1x128xf32>
      %22 = vector.shape_cast %21 : vector<1x128xf32> to vector<1x1x128xf32>
      %c0_19 = arith.constant 0 : index
      %c0_20 = arith.constant 0 : index
      %c0_21 = arith.constant 0 : index
      %23 = vector.load %arg8[%c0_19, %c0_20, %c0_21] : memref<1x1x128xf32, #tpu.memory_space<vmem>>, vector<1x1x128xf32>
      tpu.vector_store %arg8[%c0_19, %c0_20, %c0_21], %22 {strides = array<i32>} : memref<1x1x128xf32, #tpu.memory_space<vmem>>, vector<1x1x128xf32>,
    } else {
    }
    return
  }
  func.func @transform_0(%arg0: i32, %arg1: i32, %arg2: i32) -> (i32, i32) {
    %c0_i32 = arith.constant 0 : i32
    return %arg0, %arg2 : i32, i32
  }
  func.func @transform_1(%arg0: i32, %arg1: i32, %arg2: i32) -> (i32, i32) {
    %c0_i32 = arith.constant 0 : i32
    return %arg2, %arg1 : i32, i32
  }
  func.func @transform_2(%arg0: i32, %arg1: i32, %arg2: i32) -> (i32, i32) {
    %c0_i32 = arith.constant 0 : i32
    %c0_i32_0 = arith.constant 0 : i32
    return %c0_i32, %arg1 : i32, i32
  }
  func.func @transform_3(%arg0: i32, %arg1: i32, %arg2: i32) -> (i32, i32) {
    %c0_i32 = arith.constant 0 : i32
    return %arg0, %arg1 : i32, i32
  }
  func.func @transform_4(%arg0: i32, %arg1: i32, %arg2: i32) -> (i32, i32, i32) {
    %c0_i32 = arith.constant 0 : i32
    %c0_i32_0 = arith.constant 0 : i32
    return %arg0, %c0_i32, %arg1 : i32, i32, i32
  }
  func.func @transform_5(%arg0: i32, %arg1: i32, %arg2: i32) -> (i32, i32, i32) {
    %c0_i32 = arith.constant 0 : i32
    %c0_i32_0 = arith.constant 0 : i32
    return %arg0, %c0_i32, %arg1 : i32, i32, i32
  }
}

module attributes {stable_mosaic.version = 11 : i64} {
  func.func @_scale_shift_relu_kernel(%arg0: i32, %arg1: i32, %arg2: memref<512x128xbf16, #tpu.memory_space<vmem>>, %arg3: memref<1x128xf32, #tpu.memory_space<vmem>>, %arg4: memref<1x128xf32, #tpu.memory_space<vmem>>, %arg5: memref<512x128xbf16, #tpu.memory_space<vmem>>) attributes {dimension_semantics = [#tpu.dimension_semantics<parallel>, #tpu.dimension_semantics<parallel>], iteration_bounds = array<i64: 1, 1>, scalar_prefetch = 0 : i64, scratch_operands = 0 : i64, tpu.core_type = #tpu.core_type<tc>, window_params = [{transform_indices = @transform_0, window_bounds = array<i64: 512, 128>}, {transform_indices = @transform_1, window_bounds = array<i64: 1, 128>}, {transform_indices = @transform_2, window_bounds = array<i64: 1, 128>}, {transform_indices = @transform_3, window_bounds = array<i64: 512, 128>}]} {
    %c0 = arith.constant 0 : index
    %c0_0 = arith.constant 0 : index
    %0 = vector.load %arg2[%c0, %c0_0] : memref<512x128xbf16, #tpu.memory_space<vmem>>, vector<512x128xbf16>
    %1 = arith.extf %0 : vector<512x128xbf16> to vector<512x128xf32>
    %c0_1 = arith.constant 0 : index
    %c0_2 = arith.constant 0 : index
    %2 = vector.load %arg3[%c0_1, %c0_2] : memref<1x128xf32, #tpu.memory_space<vmem>>, vector<1x128xf32>
    %3 = vector.broadcast %2 : vector<1x128xf32> to vector<512x128xf32>
    %4 = arith.mulf %1, %3 : vector<512x128xf32>
    %c0_3 = arith.constant 0 : index
    %c0_4 = arith.constant 0 : index
    %5 = vector.load %arg4[%c0_3, %c0_4] : memref<1x128xf32, #tpu.memory_space<vmem>>, vector<1x128xf32>
    %6 = vector.broadcast %5 : vector<1x128xf32> to vector<512x128xf32>
    %7 = arith.addf %4, %6 : vector<512x128xf32>
    %cst = arith.constant 0.000000e+00 : f32
    %8 = vector.broadcast %cst : f32 to vector<512x128xf32>
    %9 = arith.maximumf %7, %8 : vector<512x128xf32>
    %10 = arith.truncf %9 : vector<512x128xf32> to vector<512x128xbf16>
    %c0_5 = arith.constant 0 : index
    %c0_6 = arith.constant 0 : index
    %11 = vector.load %arg5[%c0_5, %c0_6] : memref<512x128xbf16, #tpu.memory_space<vmem>>, vector<512x128xbf16>
    tpu.vector_store %arg5[%c0_5, %c0_6], %10 {strides = array<i32>} : memref<512x128xbf16, #tpu.memory_space<vmem>>, vector<512x128xbf16>,
    return
  }
  func.func @transform_0(%arg0: i32, %arg1: i32) -> (i32, i32) {
    %c0_i32 = arith.constant 0 : i32
    return %arg0, %arg1 : i32, i32
  }
  func.func @transform_1(%arg0: i32, %arg1: i32) -> (i32, i32) {
    %c0_i32 = arith.constant 0 : i32
    %c0_i32_0 = arith.constant 0 : i32
    return %c0_i32, %arg1 : i32, i32
  }
  func.func @transform_2(%arg0: i32, %arg1: i32) -> (i32, i32) {
    %c0_i32 = arith.constant 0 : i32
    %c0_i32_0 = arith.constant 0 : i32
    return %c0_i32, %arg1 : i32, i32
  }
  func.func @transform_3(%arg0: i32, %arg1: i32) -> (i32, i32) {
    %c0_i32 = arith.constant 0 : i32
    return %arg0, %arg1 : i32, i32
  }
}

module attributes {stable_mosaic.version = 11 : i64} {
  func.func @_matmul_bias_stats_kernel(%arg0: i32, %arg1: i32, %arg2: i32, %arg3: memref<512x64xbf16, #tpu.memory_space<vmem>>, %arg4: memref<64x128xbf16, #tpu.memory_space<vmem>>, %arg5: memref<1x128xf32, #tpu.memory_space<vmem>>, %arg6: memref<512x128xbf16, #tpu.memory_space<vmem>>, %arg7: memref<1x1x128xf32, #tpu.memory_space<vmem>>, %arg8: memref<1x1x128xf32, #tpu.memory_space<vmem>>, %arg9: memref<512x128xf32, #tpu.memory_space<vmem>>) attributes {dimension_semantics = [#tpu.dimension_semantics<parallel>, #tpu.dimension_semantics<parallel>, #tpu.dimension_semantics<arbitrary>], iteration_bounds = array<i64: 1, 1, 1>, scalar_prefetch = 0 : i64, scratch_operands = 1 : i64, tpu.core_type = #tpu.core_type<tc>, window_params = [{transform_indices = @transform_0, window_bounds = array<i64: 512, 64>}, {transform_indices = @transform_1, window_bounds = array<i64: 64, 128>}, {transform_indices = @transform_2, window_bounds = array<i64: 1, 128>}, {transform_indices = @transform_3, window_bounds = array<i64: 512, 128>}, {transform_indices = @transform_4, window_bounds = array<i64: 1, 1, 128>}, {transform_indices = @transform_5, window_bounds = array<i64: 1, 1, 128>}]} {
    %c0_i32 = arith.constant 0 : i32
    %0 = arith.cmpi eq, %arg2, %c0_i32 : i32
    %1 = arith.extui %0 : i1 to i32
    %c0_i32_0 = arith.constant 0 : i32
    %2 = arith.cmpi ne, %1, %c0_i32_0 : i32
    scf.if %2 {
      %c0_10 = arith.constant 0 : index
      %c0_11 = arith.constant 0 : index
      %12 = vector.load %arg5[%c0_10, %c0_11] : memref<1x128xf32, #tpu.memory_space<vmem>>, vector<1x128xf32>
      %13 = vector.shape_cast %12 : vector<1x128xf32> to vector<1x128xf32>
      %14 = vector.broadcast %13 : vector<1x128xf32> to vector<512x128xf32>
      %c0_12 = arith.constant 0 : index
      %c0_13 = arith.constant 0 : index
      %15 = vector.load %arg9[%c0_12, %c0_13] : memref<512x128xf32, #tpu.memory_space<vmem>>, vector<512x128xf32>
      tpu.vector_store %arg9[%c0_12, %c0_13], %14 {strides = array<i32>} : memref<512x128xf32, #tpu.memory_space<vmem>>, vector<512x128xf32>,
    } else {
    }
    %c0 = arith.constant 0 : index
    %c0_1 = arith.constant 0 : index
    %3 = vector.load %arg9[%c0, %c0_1] : memref<512x128xf32, #tpu.memory_space<vmem>>, vector<512x128xf32>
    %c0_2 = arith.constant 0 : index
    %c0_3 = arith.constant 0 : index
    %4 = vector.load %arg3[%c0_2, %c0_3] : memref<512x64xbf16, #tpu.memory_space<vmem>>, vector<512x64xbf16>
    %c0_4 = arith.constant 0 : index
    %c0_5 = arith.constant 0 : index
    %5 = vector.load %arg4[%c0_4, %c0_5] : memref<64x128xbf16, #tpu.memory_space<vmem>>, vector<64x128xbf16>
    %cst = arith.constant dense<0.000000e+00> : vector<512x128xf32>
    %6 = tpu.matmul %4, %5, %cst {dimension_numbers = #tpu.dot_dimension_numbers<[1], [0], [0], [1], [0, 0, 1, 1], [], []>} : vector<512x64xbf16>, vector<64x128xbf16>, vector<512x128xf32> -> vector<512x128xf32>
    %7 = arith.addf %3, %6 : vector<512x128xf32>
    %c0_6 = arith.constant 0 : index
    %c0_7 = arith.constant 0 : index
    %8 = vector.load %arg9[%c0_6, %c0_7] : memref<512x128xf32, #tpu.memory_space<vmem>>, vector<512x128xf32>
    tpu.vector_store %arg9[%c0_6, %c0_7], %7 {strides = array<i32>} : memref<512x128xf32, #tpu.memory_space<vmem>>, vector<512x128xf32>,
    %c0_i32_8 = arith.constant 0 : i32
    %9 = arith.cmpi eq, %arg2, %c0_i32_8 : i32
    %10 = arith.extui %9 : i1 to i32
    %c0_i32_9 = arith.constant 0 : i32
    %11 = arith.cmpi ne, %10, %c0_i32_9 : i32
    scf.if %11 {
      %c0_10 = arith.constant 0 : index
      %c0_11 = arith.constant 0 : index
      %12 = vector.load %arg9[%c0_10, %c0_11] : memref<512x128xf32, #tpu.memory_space<vmem>>, vector<512x128xf32>
      %13 = arith.truncf %12 : vector<512x128xf32> to vector<512x128xbf16>
      %c0_12 = arith.constant 0 : index
      %c0_13 = arith.constant 0 : index
      %14 = vector.load %arg6[%c0_12, %c0_13] : memref<512x128xbf16, #tpu.memory_space<vmem>>, vector<512x128xbf16>
      tpu.vector_store %arg6[%c0_12, %c0_13], %13 {strides = array<i32>} : memref<512x128xbf16, #tpu.memory_space<vmem>>, vector<512x128xbf16>,
      %cst_14 = arith.constant dense<0.000000e+00> : vector<128xf32>
      %15 = vector.multi_reduction <add>, %12, %cst_14 [0] : vector<512x128xf32> to vector<128xf32>
      %16 = vector.shape_cast %15 : vector<128xf32> to vector<1x128xf32>
      %17 = vector.shape_cast %16 : vector<1x128xf32> to vector<1x1x128xf32>
      %c0_15 = arith.constant 0 : index
      %c0_16 = arith.constant 0 : index
      %c0_17 = arith.constant 0 : index
      %18 = vector.load %arg7[%c0_15, %c0_16, %c0_17] : memref<1x1x128xf32, #tpu.memory_space<vmem>>, vector<1x1x128xf32>
      tpu.vector_store %arg7[%c0_15, %c0_16, %c0_17], %17 {strides = array<i32>} : memref<1x1x128xf32, #tpu.memory_space<vmem>>, vector<1x1x128xf32>,
      %19 = arith.mulf %12, %12 : vector<512x128xf32>
      %cst_18 = arith.constant dense<0.000000e+00> : vector<128xf32>
      %20 = vector.multi_reduction <add>, %19, %cst_18 [0] : vector<512x128xf32> to vector<128xf32>
      %21 = vector.shape_cast %20 : vector<128xf32> to vector<1x128xf32>
      %22 = vector.shape_cast %21 : vector<1x128xf32> to vector<1x1x128xf32>
      %c0_19 = arith.constant 0 : index
      %c0_20 = arith.constant 0 : index
      %c0_21 = arith.constant 0 : index
      %23 = vector.load %arg8[%c0_19, %c0_20, %c0_21] : memref<1x1x128xf32, #tpu.memory_space<vmem>>, vector<1x1x128xf32>
      tpu.vector_store %arg8[%c0_19, %c0_20, %c0_21], %22 {strides = array<i32>} : memref<1x1x128xf32, #tpu.memory_space<vmem>>, vector<1x1x128xf32>,
    } else {
    }
    return
  }
  func.func @transform_0(%arg0: i32, %arg1: i32, %arg2: i32) -> (i32, i32) {
    %c0_i32 = arith.constant 0 : i32
    return %arg0, %arg2 : i32, i32
  }
  func.func @transform_1(%arg0: i32, %arg1: i32, %arg2: i32) -> (i32, i32) {
    %c0_i32 = arith.constant 0 : i32
    return %arg2, %arg1 : i32, i32
  }
  func.func @transform_2(%arg0: i32, %arg1: i32, %arg2: i32) -> (i32, i32) {
    %c0_i32 = arith.constant 0 : i32
    %c0_i32_0 = arith.constant 0 : i32
    return %c0_i32, %arg1 : i32, i32
  }
  func.func @transform_3(%arg0: i32, %arg1: i32, %arg2: i32) -> (i32, i32) {
    %c0_i32 = arith.constant 0 : i32
    return %arg0, %arg1 : i32, i32
  }
  func.func @transform_4(%arg0: i32, %arg1: i32, %arg2: i32) -> (i32, i32, i32) {
    %c0_i32 = arith.constant 0 : i32
    %c0_i32_0 = arith.constant 0 : i32
    return %arg0, %c0_i32, %arg1 : i32, i32, i32
  }
  func.func @transform_5(%arg0: i32, %arg1: i32, %arg2: i32) -> (i32, i32, i32) {
    %c0_i32 = arith.constant 0 : i32
    %c0_i32_0 = arith.constant 0 : i32
    return %arg0, %c0_i32, %arg1 : i32, i32, i32
  }
}

module attributes {stable_mosaic.version = 11 : i64} {
  func.func @_scale_shift_relu_kernel(%arg0: i32, %arg1: i32, %arg2: memref<1024x128xbf16, #tpu.memory_space<vmem>>, %arg3: memref<1x128xf32, #tpu.memory_space<vmem>>, %arg4: memref<1x128xf32, #tpu.memory_space<vmem>>, %arg5: memref<1024x128xbf16, #tpu.memory_space<vmem>>) attributes {dimension_semantics = [#tpu.dimension_semantics<parallel>, #tpu.dimension_semantics<parallel>], iteration_bounds = array<i64: 2, 1>, scalar_prefetch = 0 : i64, scratch_operands = 0 : i64, tpu.core_type = #tpu.core_type<tc>, window_params = [{transform_indices = @transform_0, window_bounds = array<i64: 1024, 128>}, {transform_indices = @transform_1, window_bounds = array<i64: 1, 128>}, {transform_indices = @transform_2, window_bounds = array<i64: 1, 128>}, {transform_indices = @transform_3, window_bounds = array<i64: 1024, 128>}]} {
    %c0 = arith.constant 0 : index
    %c0_0 = arith.constant 0 : index
    %0 = vector.load %arg2[%c0, %c0_0] : memref<1024x128xbf16, #tpu.memory_space<vmem>>, vector<1024x128xbf16>
    %1 = arith.extf %0 : vector<1024x128xbf16> to vector<1024x128xf32>
    %c0_1 = arith.constant 0 : index
    %c0_2 = arith.constant 0 : index
    %2 = vector.load %arg3[%c0_1, %c0_2] : memref<1x128xf32, #tpu.memory_space<vmem>>, vector<1x128xf32>
    %3 = vector.broadcast %2 : vector<1x128xf32> to vector<1024x128xf32>
    %4 = arith.mulf %1, %3 : vector<1024x128xf32>
    %c0_3 = arith.constant 0 : index
    %c0_4 = arith.constant 0 : index
    %5 = vector.load %arg4[%c0_3, %c0_4] : memref<1x128xf32, #tpu.memory_space<vmem>>, vector<1x128xf32>
    %6 = vector.broadcast %5 : vector<1x128xf32> to vector<1024x128xf32>
    %7 = arith.addf %4, %6 : vector<1024x128xf32>
    %cst = arith.constant 0.000000e+00 : f32
    %8 = vector.broadcast %cst : f32 to vector<1024x128xf32>
    %9 = arith.maximumf %7, %8 : vector<1024x128xf32>
    %10 = arith.truncf %9 : vector<1024x128xf32> to vector<1024x128xbf16>
    %c0_5 = arith.constant 0 : index
    %c0_6 = arith.constant 0 : index
    %11 = vector.load %arg5[%c0_5, %c0_6] : memref<1024x128xbf16, #tpu.memory_space<vmem>>, vector<1024x128xbf16>
    tpu.vector_store %arg5[%c0_5, %c0_6], %10 {strides = array<i32>} : memref<1024x128xbf16, #tpu.memory_space<vmem>>, vector<1024x128xbf16>,
    return
  }
  func.func @transform_0(%arg0: i32, %arg1: i32) -> (i32, i32) {
    %c0_i32 = arith.constant 0 : i32
    return %arg0, %arg1 : i32, i32
  }
  func.func @transform_1(%arg0: i32, %arg1: i32) -> (i32, i32) {
    %c0_i32 = arith.constant 0 : i32
    %c0_i32_0 = arith.constant 0 : i32
    return %c0_i32, %arg1 : i32, i32
  }
  func.func @transform_2(%arg0: i32, %arg1: i32) -> (i32, i32) {
    %c0_i32 = arith.constant 0 : i32
    %c0_i32_0 = arith.constant 0 : i32
    return %c0_i32, %arg1 : i32, i32
  }
  func.func @transform_3(%arg0: i32, %arg1: i32) -> (i32, i32) {
    %c0_i32 = arith.constant 0 : i32
    return %arg0, %arg1 : i32, i32
  }
}

module attributes {stable_mosaic.version = 11 : i64} {
  func.func @_matmul_bias_act_kernel(%arg0: i32, %arg1: i32, %arg2: i32, %arg3: memref<512x32xbf16, #tpu.memory_space<vmem>>, %arg4: memref<32x128xbf16, #tpu.memory_space<vmem>>, %arg5: memref<1x128xf32, #tpu.memory_space<vmem>>, %arg6: memref<512x128xbf16, #tpu.memory_space<vmem>>, %arg7: memref<512x128xf32, #tpu.memory_space<vmem>>) attributes {dimension_semantics = [#tpu.dimension_semantics<parallel>, #tpu.dimension_semantics<parallel>, #tpu.dimension_semantics<arbitrary>], iteration_bounds = array<i64: 4, 1, 1>, scalar_prefetch = 0 : i64, scratch_operands = 1 : i64, tpu.core_type = #tpu.core_type<tc>, window_params = [{transform_indices = @transform_0, window_bounds = array<i64: 512, 32>}, {transform_indices = @transform_1, window_bounds = array<i64: 32, 128>}, {transform_indices = @transform_2, window_bounds = array<i64: 1, 128>}, {transform_indices = @transform_3, window_bounds = array<i64: 512, 128>}]} {
    %c0_i32 = arith.constant 0 : i32
    %0 = arith.cmpi eq, %arg2, %c0_i32 : i32
    %1 = arith.extui %0 : i1 to i32
    %c0_i32_0 = arith.constant 0 : i32
    %2 = arith.cmpi ne, %1, %c0_i32_0 : i32
    scf.if %2 {
      %c0_10 = arith.constant 0 : index
      %c0_11 = arith.constant 0 : index
      %12 = vector.load %arg5[%c0_10, %c0_11] : memref<1x128xf32, #tpu.memory_space<vmem>>, vector<1x128xf32>
      %13 = vector.shape_cast %12 : vector<1x128xf32> to vector<1x128xf32>
      %14 = vector.broadcast %13 : vector<1x128xf32> to vector<512x128xf32>
      %c0_12 = arith.constant 0 : index
      %c0_13 = arith.constant 0 : index
      %15 = vector.load %arg7[%c0_12, %c0_13] : memref<512x128xf32, #tpu.memory_space<vmem>>, vector<512x128xf32>
      tpu.vector_store %arg7[%c0_12, %c0_13], %14 {strides = array<i32>} : memref<512x128xf32, #tpu.memory_space<vmem>>, vector<512x128xf32>,
    } else {
    }
    %c0 = arith.constant 0 : index
    %c0_1 = arith.constant 0 : index
    %3 = vector.load %arg7[%c0, %c0_1] : memref<512x128xf32, #tpu.memory_space<vmem>>, vector<512x128xf32>
    %c0_2 = arith.constant 0 : index
    %c0_3 = arith.constant 0 : index
    %4 = vector.load %arg3[%c0_2, %c0_3] : memref<512x32xbf16, #tpu.memory_space<vmem>>, vector<512x32xbf16>
    %c0_4 = arith.constant 0 : index
    %c0_5 = arith.constant 0 : index
    %5 = vector.load %arg4[%c0_4, %c0_5] : memref<32x128xbf16, #tpu.memory_space<vmem>>, vector<32x128xbf16>
    %cst = arith.constant dense<0.000000e+00> : vector<512x128xf32>
    %6 = tpu.matmul %4, %5, %cst {dimension_numbers = #tpu.dot_dimension_numbers<[1], [0], [0], [1], [0, 0, 1, 1], [], []>} : vector<512x32xbf16>, vector<32x128xbf16>, vector<512x128xf32> -> vector<512x128xf32>
    %7 = arith.addf %3, %6 : vector<512x128xf32>
    %c0_6 = arith.constant 0 : index
    %c0_7 = arith.constant 0 : index
    %8 = vector.load %arg7[%c0_6, %c0_7] : memref<512x128xf32, #tpu.memory_space<vmem>>, vector<512x128xf32>
    tpu.vector_store %arg7[%c0_6, %c0_7], %7 {strides = array<i32>} : memref<512x128xf32, #tpu.memory_space<vmem>>, vector<512x128xf32>,
    %c0_i32_8 = arith.constant 0 : i32
    %9 = arith.cmpi eq, %arg2, %c0_i32_8 : i32
    %10 = arith.extui %9 : i1 to i32
    %c0_i32_9 = arith.constant 0 : i32
    %11 = arith.cmpi ne, %10, %c0_i32_9 : i32
    scf.if %11 {
      %c0_10 = arith.constant 0 : index
      %c0_11 = arith.constant 0 : index
      %12 = vector.load %arg7[%c0_10, %c0_11] : memref<512x128xf32, #tpu.memory_space<vmem>>, vector<512x128xf32>
      %13 = math.tanh %12 : vector<512x128xf32>
      %14 = arith.truncf %13 : vector<512x128xf32> to vector<512x128xbf16>
      %c0_12 = arith.constant 0 : index
      %c0_13 = arith.constant 0 : index
      %15 = vector.load %arg6[%c0_12, %c0_13] : memref<512x128xbf16, #tpu.memory_space<vmem>>, vector<512x128xbf16>
      tpu.vector_store %arg6[%c0_12, %c0_13], %14 {strides = array<i32>} : memref<512x128xbf16, #tpu.memory_space<vmem>>, vector<512x128xbf16>,
    } else {
    }
    return
  }
  func.func @transform_0(%arg0: i32, %arg1: i32, %arg2: i32) -> (i32, i32) {
    %c0_i32 = arith.constant 0 : i32
    return %arg0, %arg2 : i32, i32
  }
  func.func @transform_1(%arg0: i32, %arg1: i32, %arg2: i32) -> (i32, i32) {
    %c0_i32 = arith.constant 0 : i32
    return %arg2, %arg1 : i32, i32
  }
  func.func @transform_2(%arg0: i32, %arg1: i32, %arg2: i32) -> (i32, i32) {
    %c0_i32 = arith.constant 0 : i32
    %c0_i32_0 = arith.constant 0 : i32
    return %c0_i32, %arg1 : i32, i32
  }
  func.func @transform_3(%arg0: i32, %arg1: i32, %arg2: i32) -> (i32, i32) {
    %c0_i32 = arith.constant 0 : i32
    return %arg0, %arg1 : i32, i32
  }
}

</mosaic_0001>

<bundles_post_ra>
// kernel: tile.18
= control target key start
LH: loop header
LB: loop body
LE: loop exit
PB: predicated region body
PF: predicated region fallthrough
CT: control target
= control target key end

     0   :  { %2 = vsyncpa [#allocation1], 0  ;;  %s47_s6 = smov [#allocation0]   ;;  %s76_s0 = inlined_call_operand.hbm [shape: f32[64], index: 0, kind: input, shape index: {}]   ;;  %s77_s1 = inlined_call_operand.vmem [shape: f32[16,64], index: 1, kind: output, shape index: {}]  }
   0x1   :  { %s9_s7 = sshll.u32 %s47_s6, 4  ;;  %s23_s10 = scalar_lea.hbm %s76_s0, 16  ;;  %s10_s7 = int_to_ptr.vmem [resolvable:$true] %s9_s7 }
   0x2   :  { %p24_p0 = scmp.ne.s32.totalorder %s76_s0, %s23_s10  ;;  %p27_p1 = scmp.lt.u32.totalorder %s23_s10, %s76_s0 }
   0x4   :  { %p29_p2 = pnand %p27_p1, %p24_p0 }
   0x6   :  { %32 = shalt.err (!%p29_p2)
}
   0x7   :  { %s33_s15 = scalar_lea.vmem %s10_s7, 16  ;;  %s37_s16 = scalar_lea.vmem %s10_s7, 32 }
   0x8   :  { %p34_p3 = scmp.ne.s32.totalorder %s10_s7, %s33_s15  ;;  %p38_p4 = scmp.lt.s32.totalorder %s10_s7, %s10_s7 }
   0x9   :  { %p39_p5 = scmp.lt.s32.totalorder %s37_s16, %s33_s15 }
   0xb   :  { %p40_p6 = por %p39_p5, %p38_p4 }
   0xd   :  { %p41_p7 = pnand %p40_p6, %p34_p3 }
   0xf   :  { %44 = shalt.err (!%p41_p7)
}
  0x10   :  { %12 = dma.hbm_to_vmem [thread:$0]  %s76_s0, 16, %s10_s7, [#allocation1]  }
  0x11   :  { %45 = dma.done.wait [#allocation1], 16  }
  0x12   :  { %46 = vsyncadd [#allocation1], 4294967280  ;;  %v16_v0 = vld [vmem:[#allocation0] ss:$0 sm:$0xff] }
  0x13   :  { %17 = vst [vmem:[%s77_s1] sm:$0xff] %v16_v0  ;;  %21 = vst [vmem:[%s77_s1 + $0x8] sm:$0xff] %v16_v0 }
  0x14   :  { %20 = vsyncpa [#allocation1], 1 }

// kernel: tile.19
= control target key start
LH: loop header
LB: loop body
LE: loop exit
PB: predicated region body
PF: predicated region fallthrough
CT: control target
= control target key end

     0   :  { %vm3_vm0 = vcmask 523264   ;;  %vm10_vm1 = vcmask 1048064   ;;  %s116_s0 = inlined_call_operand.vmem [shape: f32[16,64], index: 0, kind: input, shape index: {}]   ;;  %s117_s1 = inlined_call_operand.vmem [shape: f32[1,1024], index: 1, kind: output, shape index: {}]  }
   0x1   :  { %v66_v0 = vld [vmem:[%s116_s0 + $0x1] ss:$2 sm:$0xff]   ;;  %v2_v1 = vld [vmem:[%s116_s0] ss:$2 sm:$0xff]   ;;  %s75_s0 = smov 64  }
   0x2   :  { %8 = vrot.lane.b32.xlu0 %v66_v0, %s75_s0  ;;  %4 = vst.msk [vmem:[#allocation0] ss:$8 sm:$0xf] %vm3_vm0, %v2_v1   ;;  %5 = vst.msk [vmem:[#allocation0] ss:$8 sm:$0xf0] %vm3_vm0, %v2_v1  }
  0x74   :  { %v9_v2 = vpop.permute.xlu0 %8  }
  0x75   :  { %11 = vst.msk [vmem:[#allocation0] ss:$8 sm:$0xf] %vm10_vm1, %v9_v2   ;;  %12 = vst.msk [vmem:[#allocation0] ss:$8 sm:$0xf0] %vm10_vm1, %v9_v2  }
  0x7c   :  { %v16_v3 = vld [vmem:[#allocation0] sm:$0x1]  ;;  %v20_v4 = vld [vmem:[#allocation0 + $0x8] sm:$0x1]  ;;  %v25_v5 = vld [vmem:[#allocation0 + $0x10] sm:$0x1] }
  0x7d   :  { %18 = vst [vmem:[%s117_s1] sm:$0x1] %v16_v3  ;;  %67 = vst [vmem:[%s117_s1 + $0x1] sm:$0x1] %v20_v4  ;;  %v31_v6 = vld [vmem:[#allocation0 + $0x18] sm:$0x1] }
  0x7e   :  { %68 = vst [vmem:[%s117_s1 + $0x2] sm:$0x1] %v25_v5  ;;  %v37_v7 = vld [vmem:[#allocation0 + $0x20] sm:$0x1]  ;;  %v43_v8 = vld [vmem:[#allocation0 + $0x28] sm:$0x1] }
  0x7f   :  { %69 = vst [vmem:[%s117_s1 + $0x3] sm:$0x1] %v31_v6  ;;  %70 = vst [vmem:[%s117_s1 + $0x4] sm:$0x1] %v37_v7  ;;  %v49_v9 = vld [vmem:[#allocation0 + $0x30] sm:$0x1] }
  0x80   :  { %71 = vst [vmem:[%s117_s1 + $0x5] sm:$0x1] %v43_v8  ;;  %v55_v10 = vld [vmem:[#allocation0 + $0x38] sm:$0x1]  ;;  %72 = vst [vmem:[%s117_s1 + $0x6] sm:$0x1] %v49_v9 }
  0x81   :  { %73 = vst [vmem:[%s117_s1 + $0x7] sm:$0x1] %v55_v10 }

// kernel: tile.28
= control target key start
LH: loop header
LB: loop body
LE: loop exit
PB: predicated region body
PF: predicated region fallthrough
CT: control target
= control target key end

     0   :  { %s28_s0 = inlined_call_operand.vmem [shape: f32[64], index: 0, kind: input, shape index: {}]   ;;  %s29_s1 = inlined_call_operand.vmem [shape: f32[16,64], index: 1, kind: output, shape index: {}]  }
   0x1   :  { %v4_v0 = vld [vmem:[%s28_s0] ss:$0 sm:$0xff] }
   0x2   :  { %5 = vst [vmem:[%s29_s1] sm:$0xff] %v4_v0  ;;  %8 = vst [vmem:[%s29_s1 + $0x8] sm:$0xff] %v4_v0 }

// kernel: generator_forward.22
= control target key start
LH: loop header
LB: loop body
LE: loop exit
PB: predicated region body
PF: predicated region fallthrough
CT: control target
= control target key end

     0   :  { %v19_v0 = vlaneseq  ;;  %v284_v2 = vmov 1983009808   ;;  %v285_v53 = vmov 1966171168   ;;  %s318_s0 = inlined_call_operand.vmem [shape: bf16[2,1024], index: 0, kind: input, shape index: {}]   ;;  %s319_s1 = inlined_call_operand.vmem [shape: f32[1,1024], index: 1, kind: input, shape index: {}]   ;;  %s320_s2 = inlined_call_operand.vmem [shape: f32[1,1024], index: 2, kind: input, shape index: {}]   ;;  %s321_s3 = inlined_call_operand.vmem [shape: bf16[2,1024], index: 3, kind: output, shape index: {}]  }
   0x1   :  { %v14_v1 = vld [vmem:[%s318_s0] sm:$0xff]  ;;  %v54_v3 = vunpack.c.l.s4 %v284_v2  ;;  %v228_v54 = vunpack.c.l.s4 %v285_v53 }
   0x2   :  { %v20_v4 = vshrl.u32 %v19_v0, 7  ;;  %v15_v5 = vunpack.c.l.bf16 %v14_v1  ;;  %v16_v6 = vunpack.c.h.bf16 %v14_v1  ;;  %v17_v7 = vld [vmem:[%s319_s1] sm:$0xff] }
   0x3   :  { %v55_v8 = vunpack.c.0.s8 %v54_v3  ;;  %v89_v17 = vld [vmem:[%s320_s2] sm:$0xff]  ;;  %v229_v60 = vunpack.c.0.s8 %v228_v54 }
   0x4   :  { %v21_v9 = vsub.s32 0, %v20_v4  ;;  %v25_v10 = vsub.s32 1, %v20_v4  ;;  %v29_v11 = vsub.s32 2, %v20_v4  ;;  %v33_v12 = vsub.s32 3, %v20_v4 }
   0x5   :  { %v37_v13 = vsub.s32 4, %v20_v4  ;;  %v41_v14 = vsub.s32 5, %v20_v4  ;;  %v45_v15 = vsub.s32 6, %v20_v4  ;;  %v49_v16 = vsub.s32 7, %v20_v4 }
   0x6   :  { %v22_v18 = vrot.slane %v17_v7, %v21_v9  ;;  %v26_v19 = vrot.slane %v17_v7, %v25_v10  ;;  %v30_v20 = vrot.slane %v17_v7, %v29_v11  ;;  %v34_v21 = vrot.slane %v17_v7, %v33_v12 }
   0x7   :  { %v38_v22 = vrot.slane %v17_v7, %v37_v13  ;;  %v42_v23 = vrot.slane %v17_v7, %v41_v14  ;;  %v46_v24 = vrot.slane %v17_v7, %v45_v15  ;;  %v50_v25 = vrot.slane %v17_v7, %v49_v16 }
   0x8   :  { %v51_v26 = vcombine.low %v22_v18, %v26_v19  ;;  %v52_v27 = vcombine.low %v30_v20, %v34_v21  ;;  %v58_v28 = vsub.s32 %v55_v8, %v20_v4  ;;  %v94_v29 = vrot.slane %v89_v17, %v21_v9 }
   0x9   :  { %v68_v30 = vcombine.low %v38_v22, %v42_v23  ;;  %v69_v31 = vcombine.low %v46_v24, %v50_v25  ;;  %v98_v32 = vrot.slane %v89_v17, %v25_v10  ;;  %v102_v33 = vrot.slane %v89_v17, %v29_v11 }
   0xa   :  { %v59_v34 = vrot.slane %v51_v26, %v58_v28  ;;  %v66_v35 = vrot.slane %v52_v27, %v58_v28  ;;  %v106_v36 = vrot.slane %v89_v17, %v33_v12  ;;  %v110_v37 = vrot.slane %v89_v17, %v37_v13 }
   0xb   :  { %v76_v38 = vrot.slane %v68_v30, %v58_v28  ;;  %v83_v39 = vrot.slane %v69_v31, %v58_v28  ;;  %v114_v40 = vrot.slane %v89_v17, %v41_v14  ;;  %v118_v41 = vrot.slane %v89_v17, %v45_v15 }
   0xc   :  { %v67_v42 = vcombine.low %v59_v34, %v66_v35  ;;  %v122_v43 = vrot.slane %v89_v17, %v49_v16  ;;  %v123_v44 = vcombine.low %v94_v29, %v98_v32  ;;  %v124_v45 = vcombine.low %v102_v33, %v106_v36 }
   0xd   :  { %v84_v46 = vcombine.low %v76_v38, %v83_v39  ;;  %v140_v47 = vcombine.low %v110_v37, %v114_v40  ;;  %v232_v2 = vsub.s32 %v229_v60, %v20_v4 }
   0xe   :  { %v87_v48 = vmul.f32 %v67_v42, %v15_v5  ;;  %v131_v49 = vrot.slane %v123_v44, %v58_v28  ;;  %v138_v50 = vrot.slane %v124_v45, %v58_v28  ;;  %v141_v51 = vcombine.low %v118_v41, %v122_v43 }
   0xf   :  { %v148_v52 = vrot.slane %v140_v47, %v58_v28  ;;  %v88_v55 = vmul.f32 %v84_v46, %v16_v6 }
  0x10   :  { %v139_v56 = vcombine.low %v131_v49, %v138_v50  ;;  %v155_v57 = vrot.slane %v141_v51, %v58_v28 }
  0x12   :  { %v156_v58 = vcombine.low %v148_v52, %v155_v57  ;;  %v159_v59 = vadd.f32 %v139_v56, %v87_v48 }
  0x14   :  { %v160_v61 = vadd.f32 %v156_v58, %v88_v55  ;;  %v161_v62 = vmax.f32 %v159_v59, 0.0 }
  0x16   :  { %v162_v63 = vmax.f32 %v160_v61, 0.0  ;;  %v165_v0 = vcombine.high %v161_v62, %v161_v62  ;;  %v172_v1 = vrot.slane %v161_v62, %v58_v28 }
  0x18   :  { %v179_v3 = vrot.slane %v165_v0, %v58_v28  ;;  %v180_v5 = vcombine.high %v172_v1, %v172_v1  ;;  %v182_v7 = vcombine.high %v162_v63, %v162_v63  ;;  %v189_v8 = vrot.slane %v162_v63, %v58_v28 }
  0x1a   :  { %v181_v9 = vcombine.high %v179_v3, %v179_v3  ;;  %v196_v10 = vrot.slane %v182_v7, %v58_v28  ;;  %v197_v11 = vcombine.high %v189_v8, %v189_v8  ;;  %v278_v12 = vpack.c.bf16 %v180_v5, %v172_v1 }
  0x1c   :  { %v198_v6 = vcombine.high %v196_v10, %v196_v10  ;;  %v279_v13 = vpack.c.bf16 %v181_v9, %v179_v3  ;;  %v280_v14 = vpack.c.bf16 %v197_v11, %v189_v8  ;;  %v233_v15 = vrot.slane %v278_v12, %v232_v2 }
  0x1e   :  { %v281_v16 = vpack.c.bf16 %v198_v6, %v196_v10  ;;  %v240_v17 = vrot.slane %v279_v13, %v232_v2  ;;  %v247_v18 = vrot.slane %v280_v14, %v232_v2 }
  0x20   :  { %v254_v19 = vrot.slane %v281_v16, %v232_v2  ;;  %v255_v20 = vcombine.low %v233_v15, %v240_v17 }
  0x22   :  { %v256_v21 = vcombine.low %v247_v18, %v254_v19  ;;  %v263_v22 = vrot.slane %v255_v20, %v232_v2 }
  0x24   :  { %v270_v4 = vrot.slane %v256_v21, %v232_v2 }
  0x26   :  { %v271_v23 = vcombine.low %v263_v22, %v270_v4 }
  0x28   :  { %273 = vst [vmem:[%s321_s3] sm:$0xff] %v271_v23 }

// kernel: generator_forward.21
= control target key start
LH: loop header
LB: loop body
LE: loop exit
PB: predicated region body
PF: predicated region fallthrough
CT: control target
= control target key end

     0   :  { %s1102_s18 = smov 0   ;;  %s1104_s19 = smov 0   ;;  %s1205_s0 = inlined_call_operand.vmem [shape: bf16[2,16], index: 0, kind: input, shape index: {}]   ;;  %s1206_s1 = inlined_call_operand.vmem [shape: bf16[16,1024], index: 1, kind: input, shape index: {}]   ;;  %s1207_s2 = inlined_call_operand.vmem [shape: f32[1,1024], index: 2, kind: input, shape index: {}]   ;;  %s1208_s3 = inlined_call_operand.vmem [shape: bf16[2,1024], index: 3, kind: output, shape index: {0}]   ;;  %s1209_s4 = inlined_call_operand.vmem [shape: f32[1,1,1024], index: 4, kind: output, shape index: {1}]   ;;  %s1210_s5 = inlined_call_operand.vmem [shape: f32[1,1,1024], index: 5, kind: output, shape index: {2}]  }
   0x1   :  { %s1106_s20 = smov 0   ;;  %s1108_s21 = smov 0  }
   0x2   :  { %s1110_s22 = smov 0  }
   0x3 LB: > { %s31_s23 = sadd.s32 1, %s1063_s21  ;;  %p79_p1 = scmp.ne.s32.totalorder %s1055_s19, %s1051_s18  ;;  %s1067_s22 = sphi %s1110_s22, %s16_s22   ;;  %s1063_s21 = sphi %s1108_s21, %s1214_s21   ;;  %s1059_s20 = sphi %s1106_s20, %s1213_s20   ;;  %s1055_s19 = sphi %s1104_s19, %s1212_s19   ;;  %s1051_s18 = sphi %s1102_s18, %s1211_s18  }
   0x4   : > { %p33_p0 = scmp.ge.s32.totalorder %s31_s23, 2  ;;  %p80_p2 = scmp.eq.s32.totalorder %s1067_s22, 0 }
   0x5   : > { %s72_s25 = sadd.s32 1, %s1055_s19  ;;  %p958_p5 = scmp.ge.s32.totalorder %s1067_s22, 2 }
   0x6   : > { %s1216_s23 = smov (%p33_p0, %s31_s23), 0  ;;  %p81_p3 = por %p80_p2, %p79_p1 }
   0x7   : > { %s68_s24 = ssub.s32 %s1063_s21, %s1216_s23  ;;  %224 = sbr.rel (%p958_p5) target bundleno = 21 (0x15), region = 20 }
   0x8   : > { %p70_p4 = scmp.eq.s32.totalorder %s68_s24, 0 }
   0xa   : > { %s1137_s26 = scalar_select %p70_p4, %s1055_s19, %s72_s25  }
   0xe   : > { %227 = sbr.rel (!%p81_p3) target bundleno = 21 (0x15), region = 24  ;;  %s229_s27 = sand.u32 (%p81_p3), 1, %s1055_s19  }
   0xf   : > { %s979_s28 = sshll.u32 (%p81_p3), %s1063_s21, 4  ;;  %s959_s29 = sshll.u32 (%p81_p3), %s229_s27, 5 }
  0x10   : > { %s237_s7 = scalar_lea.vmem (%p81_p3), %s1206_s1, %s979_s28  ;;  %s231_s8 = scalar_lea.vmem (%p81_p3), [#allocation3], %s959_s29 }
  0x11   : > { %v250_v0 = vld [vmem:[%s237_s7] sm:$0xff] (%p81_p3)  ;;  %v252_v1 = vld [vmem:[%s237_s7 + $0x8] sm:$0xff] (%p81_p3) }
  0x12   : > { %v254_v2 = vld [vmem:[%s237_s7 + $0x20] sm:$0xff] (%p81_p3)  ;;  %251 = vst [vmem:[%s231_s8] sm:$0xff] (%p81_p3), %v250_v0  ;;  %253 = vst [vmem:[%s231_s8 + $0x8] sm:$0xff] (%p81_p3), %v252_v1  ;;  %v256_v3 = vld [vmem:[%s237_s7 + $0x28] sm:$0xff] (%p81_p3) }
  0x13   : > { %255 = vst [vmem:[%s231_s8 + $0x10] sm:$0xff] (%p81_p3), %v254_v2  ;;  %257 = vst [vmem:[%s231_s8 + $0x18] sm:$0xff] (%p81_p3), %v256_v3 }
  0x15 PF: > { %p962_p6 = scmp.ge.s32.totalorder %s1067_s22, 1  ;;  %p270_p7 = scmp.lt.s32.totalorder %s1067_s22, 3 }
  0x17   : > { %p271_p8 = pnand %p962_p6, %p270_p7 }
  0x18   : > { %s277_s9 = sand.u32 (!%p271_p8), 1, %s1051_s18   ;;  %v1069_v4 = vmov (!%p271_p8), 0   ;;  %v416_v9 = vld [vmem:[%s1205_s0] sm:$0x1] (!%p271_p8)  ;;  %vm441_vm0 = vcmask (!%p271_p8), 130048   ;;  %s964_s14 = sshll.u32 (!%p271_p8), %s1059_s20, 2  ;;  %v380_v10 = vlaneseq (!%p271_p8) }
  0x19   : > { %274 = sbr.rel (%p271_p8) target bundleno = 287 (0x11f), region = 51  ;;  %s963_s10 = sshll.u32 (!%p271_p8), %s277_s9, 5  ;;  %477 = vmatprep.mubr.bf16.mxu0 (!%p271_p8), %v1069_v4  ;;  %518 = vmatprep.mubr.bf16.mxu1 (!%p271_p8), %v1069_v4  ;;  %v1070_v12 = vmov (!%p271_p8), 1983009808   ;;  %v1071_v37 = vmov (!%p271_p8), 1966171168  }
  0x1a   : > { %s279_s11 = scalar_lea.vmem (!%p271_p8), [#allocation3], %s963_s10  ;;  %p342_p9 = scmp.lt.s32.totalorder (!%p271_p8), %s964_s14, 7  ;;  %v381_v11 = vshrl.u32 (!%p271_p8), %v380_v10, 7  ;;  %v399_v13 = vunpack.c.l.s4 (!%p271_p8), %v1070_v12  ;;  %v588_v38 = vunpack.c.l.s4 (!%p271_p8), %v1071_v37  ;;  %vm611_vm1 = vcmask (!%p271_p8), 1041408  }
  0x1b   : > { %v1023_v5 = vld [vmem:[%s279_s11 + $0x4] ss:$16 sps:$4 sm:$0xff] (!%p271_p8)   ;;  %v1025_v6 = vld [vmem:[%s279_s11 + $0xc] ss:$16 sps:$4 sm:$0xff] (!%p271_p8)   ;;  %v1027_v7 = vld [vmem:[%s279_s11] ss:$16 sps:$4 sm:$0xff] (!%p271_p8)  }
  0x1c   : > { %445 = vmatprep.subr.bf16.mxu0 (!%p271_p8), %v1023_v5  ;;  %v1028_v8 = vld [vmem:[%s279_s11 + $0x8] ss:$16 sps:$4 sm:$0xff] (!%p271_p8)   ;;  %486 = vmatprep.subr.bf16.mxu1 (!%p271_p8), %v1025_v6  ;;  %v382_v14 = vsub.s32 (!%p271_p8), 0, %v381_v11  ;;  %v386_v15 = vsub.s32 (!%p271_p8), 1, %v381_v11  ;;  %v390_v16 = vsub.s32 (!%p271_p8), 2, %v381_v11  ;;  %v394_v17 = vsub.s32 (!%p271_p8), 3, %v381_v11 }
  0x1d   : > { %446 = vmatpush1.bf16.msra.mxu0 (!%p271_p8), %v1027_v7  ;;  %487 = vmatpush1.bf16.msra.mxu1 (!%p271_p8), %v1028_v8  ;;  %v400_v19 = vunpack.c.0.s8 (!%p271_p8), %v399_v13  ;;  %v589_v45 = vunpack.c.0.s8 (!%p271_p8), %v588_v38  ;;  %vm671_vm2 = vcmp.lt.s32.totalorder (!%p271_p8), %v380_v10, 512 }
  0x1f   : > { %v403_v24 = vsub.s32 (!%p271_p8), %v400_v19, %v381_v11  ;;  %v1159_v50 = vsub.s32 (!%p271_p8), %v589_v45, %v381_v11 }
  0x20   : > { %972 = vmatmul.mubr.msk.bf16.vlgmr.msra.gmra.mrb[0].mxu0 %vm441_vm0, %v416_v9  ;;  %973 = vmatmul.mubr.msk.bf16.vlgmr.msra.gmra.mrb[0].mxu1 %vm441_vm0, %v416_v9  ;;  %s1218_s14 = smov (!%p342_p9, %s964_s14), 7 }
  0x21   : > { %s344_s17 = scalar_lea.vmem %s1207_s2, %s1218_s14  ;;  %s353_s24 = scalar_lea.vmem %s1208_s3, %s1218_s14 }
  0x22   : > { %v378_v18 = vld [vmem:[%s344_s17] sm:$0xf]  ;;  %s362_s28 = scalar_lea.vmem %s1209_s4, %s1218_s14  ;;  %s371_s6 = scalar_lea.vmem %s1210_s5, %s1218_s14 }
  0x23   : > { %v383_v20 = vrot.slane %v378_v18, %v382_v14  ;;  %v387_v21 = vrot.slane %v378_v18, %v386_v15  ;;  %v391_v22 = vrot.slane %v378_v18, %v390_v16  ;;  %v395_v23 = vrot.slane %v378_v18, %v394_v17 }
  0x25   : > { %v396_v25 = vcombine.low %v383_v20, %v387_v21  ;;  %v397_v26 = vcombine.low %v391_v22, %v395_v23 }
  0x27   : > { %v404_v29 = vrot.slane %v396_v25, %v403_v24  ;;  %v411_v30 = vrot.slane %v397_v26, %v403_v24 }
  0x29   : > { %v412_v42 = vcombine.low %v404_v29, %v411_v30 }
  0xf3   : > { %v479_v27 = vpop.f32.mrb[0].mxu0  ;;  %v520_v28 = vpop.f32.mrb[0].mxu1 }
  0xf4   : > { %v481_v31 = vpop.f32.mrb[1].mxu0  ;;  %v522_v32 = vpop.f32.mrb[1].mxu1 }
  0xf5   : > { %v531_v33 = vcombine.low %v479_v27, %v481_v31  ;;  %v532_v34 = vcombine.low %v520_v28, %v522_v32  ;;  %v483_v35 = vpop.f32.mrb[2].mxu0  ;;  %v524_v36 = vpop.f32.mrb[2].mxu1 }
  0xf6   : > { %v484_v39 = vpop.f32.mrb[3].mxu0  ;;  %v525_v40 = vpop.f32.mrb[3].mxu1 }
  0xf7   : > { %v539_v41 = vrot.slane %v531_v33, %v403_v24  ;;  %v546_v43 = vrot.slane %v532_v34, %v403_v24 }
  0xf9   : > { %v547_v44 = vcombine.low %v539_v41, %v546_v43 }
  0xfb   : > { %v549_v46 = vadd.f32 %v547_v44, %v412_v42 }
  0xfd   : > { %v556_v47 = vcombine.high %v549_v46, %v549_v46  ;;  %v563_v48 = vrot.slane %v549_v46, %v403_v24  ;;  %v674_v49 = vmul.f32 %v549_v46, %v549_v46 }
  0xff   : > { %v570_v51 = vrot.slane %v556_v47, %v403_v24  ;;  %v571_v52 = vcombine.high %v563_v48, %v563_v48  ;;  %v612_v53 = vsel %vm611_vm1, %v563_v48, 0.0  ;;  %v676_v54 = vcombine.high %v674_v49, %v674_v49 }
 0x100   : > { %v613_v55 = vrot.slane %v612_v53, 4  ;;  %v683_v56 = vrot.slane %v674_v49, %v403_v24 }
 0x101   : > { %v572_v57 = vcombine.high %v570_v51, %v570_v51  ;;  %v974_v58 = vpack.c.bf16 %v571_v52, %v563_v48  ;;  %v619_v59 = vsel %vm611_vm1, %v571_v52, 0.0  ;;  %v626_v60 = vsel %vm611_vm1, %v570_v51, 0.0 }
 0x102   : > { %v614_v61 = vadd.f32 %v613_v55, %v612_v53  ;;  %v620_v62 = vrot.slane %v619_v59, 4  ;;  %v627_v63 = vrot.slane %v626_v60, 4  ;;  %v690_v0 = vrot.slane %v676_v54, %v403_v24 }
 0x103   : > { %v975_v1 = vpack.c.bf16 %v572_v57, %v570_v51  ;;  %v593_v2 = vrot.slane %v974_v58, %v1159_v50  ;;  %v633_v3 = vsel %vm611_vm1, %v572_v57, 0.0  ;;  %v691_v4 = vcombine.high %v683_v56, %v683_v56 }
 0x104   : > { %v615_v5 = vrot.slane %v614_v61, 2  ;;  %v621_v6 = vadd.f32 %v620_v62, %v619_v59  ;;  %v628_v7 = vadd.f32 %v627_v63, %v626_v60  ;;  %v634_v8 = vrot.slane %v633_v3, 4 }
 0x105   : > { %v600_v9 = vrot.slane %v975_v1, %v1159_v50  ;;  %v692_v11 = vcombine.high %v690_v0, %v690_v0  ;;  %v697_v12 = vsel %vm611_vm1, %v683_v56, 0.0  ;;  %v704_v13 = vsel %vm611_vm1, %v691_v4, 0.0 }
 0x106   : > { %v616_v14 = vadd.f32 %v615_v5, %v614_v61  ;;  %v622_v15 = vrot.slane %v621_v6, 2  ;;  %v629_v16 = vrot.slane %v628_v7, 2  ;;  %v635_v17 = vadd.f32 %v634_v8, %v633_v3 }
 0x107   : > { %v601_v18 = vcombine.low %v593_v2, %v600_v9  ;;  %v698_v19 = vrot.slane %v697_v12, 4  ;;  %v705_v20 = vrot.slane %v704_v13, 4  ;;  %v711_v21 = vsel %vm611_vm1, %v690_v0, 0.0 }
 0x108   : > { %v617_v22 = vrot.slane %v616_v14, 1  ;;  %v623_v23 = vadd.f32 %v622_v15, %v621_v6  ;;  %v630_v24 = vadd.f32 %v629_v16, %v628_v7  ;;  %v636_v25 = vrot.slane %v635_v17, 2 }
 0x109   : > { %976 = vst.sshfl [vmem:[%s353_s24] sm:$0x55 pattern:$0x73625140] %v601_v18  ;;  %v699_v26 = vadd.f32 %v698_v19, %v697_v12  ;;  %v706_v27 = vadd.f32 %v705_v20, %v704_v13  ;;  %v712_v28 = vrot.slane %v711_v21, 4  ;;  %v718_v29 = vsel %vm611_vm1, %v692_v11, 0.0 }
 0x10a   : > { %v624_v30 = vrot.slane %v623_v23, 1  ;;  %v631_v31 = vrot.slane %v630_v24, 1  ;;  %v637_v32 = vadd.f32 %v636_v25, %v635_v17  ;;  %v719_v36 = vrot.slane %v718_v29, 4 }
 0x10b   : > { %v700_v33 = vrot.slane %v699_v26, 2  ;;  %v707_v34 = vrot.slane %v706_v27, 2  ;;  %v713_v35 = vadd.f32 %v712_v28, %v711_v21  ;;  %v618_v37 = vadd.f32 %v617_v22, %v616_v14 }
 0x10c   : > { %v625_v38 = vadd.f32 %v624_v30, %v623_v23  ;;  %v638_v39 = vrot.slane %v637_v32, 1  ;;  %v720_v43 = vadd.f32 %v719_v36, %v718_v29  ;;  %v632_v44 = vadd.f32 %v631_v31, %v630_v24 }
 0x10d   : > { %v701_v40 = vadd.f32 %v700_v33, %v699_v26  ;;  %v708_v41 = vadd.f32 %v707_v34, %v706_v27  ;;  %v714_v42 = vrot.slane %v713_v35, 2 }
 0x10e   : > { %v639_v45 = vadd.f32 %v638_v39, %v637_v32  ;;  %v644_v46 = vcombine.low %v618_v37, %v625_v38  ;;  %v721_v51 = vrot.slane %v720_v43, 2 }
 0x10f   : > { %v702_v47 = vrot.slane %v701_v40, 1  ;;  %v709_v48 = vrot.slane %v708_v41, 1  ;;  %v715_v49 = vadd.f32 %v714_v42, %v713_v35 }
 0x110   : > { %v645_v52 = vcombine.low %v632_v44, %v639_v45  ;;  %v722_v55 = vadd.f32 %v721_v51, %v720_v43  ;;  %v652_v56 = vrot.slane %v644_v46, %v1159_v50 }
 0x111   : > { %v710_v53 = vadd.f32 %v709_v48, %v708_v41  ;;  %v716_v54 = vrot.slane %v715_v49, 1  ;;  %v703_v58 = vadd.f32 %v702_v47, %v701_v40 }
 0x112   : > { %v659_v57 = vrot.slane %v645_v52, %v1159_v50  ;;  %v723_v59 = vrot.slane %v722_v55, 1 }
 0x113   : > { %v717_v61 = vadd.f32 %v716_v54, %v715_v49  ;;  %v729_v63 = vcombine.low %v703_v58, %v710_v53 }
 0x114   : > { %v660_v60 = vcombine.low %v652_v56, %v659_v57  ;;  %v724_v62 = vadd.f32 %v723_v59, %v722_v55 }
 0x115   : > { %v737_v2 = vrot.slane %v729_v63, %v1159_v50 }
 0x116   : > { %v667_v0 = vrot.slane %v660_v60, %v1159_v50  ;;  %v730_v1 = vcombine.low %v717_v61, %v724_v62 }
 0x118   : > { %673 = vst.msk [vmem:[%s362_s28] sm:$0xf] %vm671_vm2, %v667_v0  ;;  %v744_v3 = vrot.slane %v730_v1, %v1159_v50 }
 0x11a   : > { %v745_v4 = vcombine.low %v737_v2, %v744_v3 }
 0x11c   : > { %v752_v5 = vrot.slane %v745_v4, %v1159_v50 }
 0x11e   : > { %754 = vst.msk [vmem:[%s371_s6] sm:$0xf] %vm671_vm2, %v752_v5 }
 0x11f PF: > { %s16_s22 = sadd.s32 1, %s1067_s22   ;;  %s1211_s18 = smov %s1055_s19 }
 0x120   : > { %p13_p10 = scmp.ge.s32.totalorder %s16_s22, 4   ;;  %s1212_s19 = smov %s1137_s26 }
 0x121   : > { %s1213_s20 = smov %s1063_s21  ;;  %s1214_s21 = smov %s1216_s23 }
 0x122   :  { %15 = sbr.rel (!%p13_p10) target bundleno = 3 (0x3), region = 128 }

// kernel: generator_forward.24
= control target key start
LH: loop header
LB: loop body
LE: loop exit
PB: predicated region body
PF: predicated region fallthrough
CT: control target
= control target key end

     0   :  { %s520_s1 = inlined_call_operand.vmem [shape: bf16[256,128], index: 1, kind: input, shape index: {}]   ;;  %s521_s0 = inlined_call_operand.vmem [shape: bf16[32,256], index: 0, kind: input, shape index: {}]   ;;  %s522_s2 = inlined_call_operand.vmem [shape: f32[1,128], index: 2, kind: input, shape index: {}]   ;;  %s523_s3 = inlined_call_operand.vmem [shape: bf16[32,128], index: 3, kind: output, shape index: {0}]   ;;  %s524_s4 = inlined_call_operand.vmem [shape: f32[1,1,128], index: 4, kind: output, shape index: {1}]   ;;  %s525_s5 = inlined_call_operand.vmem [shape: f32[1,1,128], index: 5, kind: output, shape index: {2}]  }
   0x1   :  { %v393_v0 = vld [vmem:[%s520_s1 + $0x40] sm:$0xff]   ;;  %v395_v2 = vld [vmem:[%s520_s1 + $0x48] sm:$0xff]   ;;  %v397_v4 = vld [vmem:[%s520_s1 + $0x50] sm:$0xff]  }
   0x2   :  { %v394_v1 = vld [vmem:[%s520_s1] sm:$0xff]   ;;  %349 = vmatprep.subr.bf16.mxu0 %v393_v0  ;;  %377 = vmatprep.subr.bf16.mxu1 %v393_v0  ;;  %v396_v3 = vld [vmem:[%s520_s1 + $0x8] sm:$0xff]   ;;  %v398_v5 = vld [vmem:[%s520_s1 + $0x10] sm:$0xff]  }
   0x3   :  { %350 = vmatpush3.bf16.msra.mxu0 %v394_v1  ;;  %385 = vmatpush3.bf16.msra.mxu1 %v394_v1  ;;  %v399_v6 = vld [vmem:[%s520_s1 + $0x58] sm:$0xff]   ;;  %v401_v8 = vld [vmem:[%s520_s1 + $0x60] sm:$0xff]   ;;  %v403_v10 = vld [vmem:[%s520_s1 + $0x68] sm:$0xff]  }
   0x4   :  { %351 = vmatprep.subr.bf16.mxu0 %v395_v2  ;;  %378 = vmatprep.subr.bf16.mxu1 %v395_v2  ;;  %v400_v7 = vld [vmem:[%s520_s1 + $0x18] sm:$0xff]   ;;  %v402_v9 = vld [vmem:[%s520_s1 + $0x20] sm:$0xff]   ;;  %v404_v13 = vld [vmem:[%s520_s1 + $0x28] sm:$0xff]  }
   0x5   :  { %v411_v11 = vld [vmem:[%s521_s0 + $0x4] ss:$8 sps:$4 sm:$0xff]   ;;  %v414_v12 = vld [vmem:[%s521_s0 + $0x14] ss:$8 sps:$4 sm:$0xff]   ;;  %v409_v18 = vld [vmem:[%s521_s0] ss:$8 sps:$4 sm:$0xff]  }
   0x6   :  { %v405_v14 = vld [vmem:[%s520_s1 + $0x70] sm:$0xff]   ;;  %221 = vmatprep.mubr.bf16.mxu0 %v411_v11  ;;  %229 = vmatprep.mubr.bf16.mxu1 %v414_v12  ;;  %v407_v16 = vld [vmem:[%s520_s1 + $0x78] sm:$0xff]   ;;  %v309_v22 = vld [vmem:[%s522_s2] ss:$0 sm:$0xff] }
   0x7   :  { %352 = vmatpush3.bf16.msra.mxu0 %v396_v3  ;;  %386 = vmatpush3.bf16.msra.mxu1 %v396_v3  ;;  %v406_v15 = vld [vmem:[%s520_s1 + $0x30] sm:$0xff]   ;;  %v408_v17 = vld [vmem:[%s520_s1 + $0x38] sm:$0xff]  }
   0x8   :  { %353 = vmatprep.subr.bf16.mxu0 %v397_v4  ;;  %379 = vmatprep.subr.bf16.mxu1 %v397_v4  ;;  %v412_v19 = vld [vmem:[%s521_s0 + $0x10] ss:$8 sps:$4 sm:$0xff]  }
   0xb   :  { %354 = vmatpush3.bf16.msra.mxu0 %v398_v5  ;;  %387 = vmatpush3.bf16.msra.mxu1 %v398_v5 }
   0xc   :  { %355 = vmatprep.subr.bf16.mxu0 %v399_v6  ;;  %380 = vmatprep.subr.bf16.mxu1 %v399_v6 }
   0xf   :  { %356 = vmatpush3.bf16.msra.mxu0 %v400_v7  ;;  %388 = vmatpush3.bf16.msra.mxu1 %v400_v7 }
  0x10   :  { %357 = vmatprep.subr.bf16.mxu0 %v401_v8  ;;  %381 = vmatprep.subr.bf16.mxu1 %v401_v8 }
  0x13   :  { %358 = vmatpush3.bf16.msra.mxu0 %v402_v9  ;;  %389 = vmatpush3.bf16.msra.mxu1 %v402_v9 }
  0x14   :  { %359 = vmatprep.subr.bf16.mxu0 %v403_v10  ;;  %382 = vmatprep.subr.bf16.mxu1 %v403_v10 }
  0x17   :  { %360 = vmatpush3.bf16.msra.mxu0 %v404_v13  ;;  %390 = vmatpush3.bf16.msra.mxu1 %v404_v13 }
  0x18   :  { %361 = vmatprep.subr.bf16.mxu0 %v405_v14  ;;  %383 = vmatprep.subr.bf16.mxu1 %v405_v14 }
  0x1b   :  { %362 = vmatpush3.bf16.msra.mxu0 %v406_v15  ;;  %391 = vmatpush3.bf16.msra.mxu1 %v406_v15 }
  0x1c   :  { %363 = vmatprep.subr.bf16.mxu0 %v407_v16  ;;  %384 = vmatprep.subr.bf16.mxu1 %v407_v16 }
  0x1f   :  { %364 = vmatpush3.bf16.msra.mxu0 %v408_v17  ;;  %392 = vmatpush3.bf16.msra.mxu1 %v408_v17 }
  0x22   :  { %222 = vmatmul.mubr.bf16.vlgmr.msra.gmra.mrb[0].mxu0 %v409_v18  ;;  %230 = vmatmul.mubr.bf16.vlgmr.msra.gmra.mrb[0].mxu1 %v412_v19 }
  0xf5   :  { %v365_v20 = vpop.f32.mrb[0].mxu0  ;;  %v371_v21 = vpop.f32.mrb[0].mxu1 }
  0xf6   :  { %v366_v23 = vpop.f32.mrb[1].mxu0  ;;  %v372_v24 = vpop.f32.mrb[1].mxu1 }
  0xf7   :  { %v367_v25 = vadd.f32 %v366_v23, %v365_v20  ;;  %v368_v26 = vpop.f32.mrb[2].mxu0  ;;  %v373_v27 = vadd.f32 %v372_v24, %v371_v21  ;;  %v374_v28 = vpop.f32.mrb[2].mxu1 }
  0xf8   :  { %v369_v29 = vpop.f32.mrb[3].mxu0  ;;  %v375_v30 = vpop.f32.mrb[3].mxu1 }
  0xf9   :  { %v238_v31 = vadd.f32 %v367_v25, %v309_v22  ;;  %v240_v32 = vadd.f32 %v373_v27, %v309_v22  ;;  %v370_v33 = vadd.f32 %v369_v29, %v368_v26  ;;  %v376_v34 = vadd.f32 %v375_v30, %v374_v28 }
  0xfb   :  { %v239_v35 = vadd.f32 %v370_v33, %v309_v22  ;;  %v241_v36 = vadd.f32 %v376_v34, %v309_v22  ;;  %v283_v37 = vmul.f32 %v238_v31, %v238_v31  ;;  %v285_v38 = vmul.f32 %v240_v32, %v240_v32 }
  0xfd   :  { %v341_v39 = vpack.c.bf16 %v239_v35, %v238_v31  ;;  %v273_v40 = vadd.f32 %v239_v35, %v238_v31  ;;  %v284_v41 = vmul.f32 %v239_v35, %v239_v35  ;;  %v346_v42 = vpack.c.bf16 %v241_v36, %v240_v32 }
  0xfe   :  { %v286_v46 = vmul.f32 %v241_v36, %v241_v36 }
  0xff   :  { %342 = vst [vmem:[%s523_s3] sm:$0xff] %v341_v39   ;;  %v287_v43 = vadd.f32 %v284_v41, %v283_v37  ;;  %348 = vst [vmem:[%s523_s3 + $0x8] sm:$0xff] %v346_v42   ;;  %v274_v44 = vadd.f32 %v273_v40, %v240_v32 }
 0x101   :  { %v275_v45 = vadd.f32 %v274_v44, %v241_v36  ;;  %v288_v47 = vadd.f32 %v287_v43, %v285_v38 }
 0x103   :  { %v276_v48 = vrot.slane %v275_v45, 4  ;;  %v289_v49 = vadd.f32 %v288_v47, %v286_v46 }
 0x105   :  { %v277_v50 = vadd.f32 %v276_v48, %v275_v45  ;;  %v290_v51 = vrot.slane %v289_v49, 4 }
 0x107   :  { %v278_v52 = vrot.slane %v277_v50, 2  ;;  %v291_v53 = vadd.f32 %v290_v51, %v289_v49 }
 0x109   :  { %v279_v54 = vadd.f32 %v278_v52, %v277_v50  ;;  %v292_v55 = vrot.slane %v291_v53, 2 }
 0x10b   :  { %v280_v56 = vrot.slane %v279_v54, 1  ;;  %v293_v57 = vadd.f32 %v292_v55, %v291_v53 }
 0x10d   :  { %v281_v58 = vadd.f32 %v280_v56, %v279_v54  ;;  %v294_v59 = vrot.slane %v293_v57, 1 }
 0x10f   :  { %282 = vst [vmem:[%s524_s4] sm:$0x1] %v281_v58  ;;  %v295_v60 = vadd.f32 %v294_v59, %v293_v57 }
 0x111   :  { %296 = vst [vmem:[%s525_s5] sm:$0x1] %v295_v60 }

// kernel: generator_forward.27
= control target key start
LH: loop header
LB: loop body
LE: loop exit
PB: predicated region body
PF: predicated region fallthrough
CT: control target
= control target key end

     0   :  { %s422_s0 = inlined_call_operand.vmem [shape: bf16[128,128], index: 0, kind: input, shape index: {}]   ;;  %s423_s1 = inlined_call_operand.vmem [shape: f32[1,128], index: 1, kind: input, shape index: {}]   ;;  %s424_s2 = inlined_call_operand.vmem [shape: f32[1,128], index: 2, kind: input, shape index: {}]   ;;  %s425_s3 = inlined_call_operand.vmem [shape: bf16[128,128], index: 3, kind: output, shape index: {}]  }
   0x1   :  { %v227_v0 = vld [vmem:[%s422_s0] sm:$0xff]   ;;  %v298_v4 = vld [vmem:[%s422_s0 + $0x8] sm:$0xff]   ;;  %v299_v5 = vld [vmem:[%s422_s0 + $0x10] sm:$0xff]  }
   0x2   :  { %v338_v1 = vld [vmem:[%s423_s1] ss:$0 sm:$0xff]  ;;  %v228_v2 = vunpack.c.l.bf16 %v227_v0  ;;  %v229_v3 = vunpack.c.h.bf16 %v227_v0  ;;  %v300_v6 = vld [vmem:[%s422_s0 + $0x18] sm:$0xff]   ;;  %v232_v8 = vunpack.c.l.bf16 %v298_v4  ;;  %v233_v9 = vunpack.c.h.bf16 %v298_v4  ;;  %v302_v33 = vld [vmem:[%s422_s0 + $0x28] sm:$0xff]  }
   0x3   :  { %v352_v7 = vld [vmem:[%s424_s2] ss:$0 sm:$0xff]  ;;  %v236_v10 = vunpack.c.l.bf16 %v299_v5  ;;  %v237_v11 = vunpack.c.h.bf16 %v299_v5  ;;  %v240_v14 = vunpack.c.l.bf16 %v300_v6  ;;  %v241_v15 = vunpack.c.h.bf16 %v300_v6  ;;  %v303_v38 = vld [vmem:[%s422_s0 + $0x30] sm:$0xff]   ;;  %v304_v43 = vld [vmem:[%s422_s0 + $0x38] sm:$0xff]  }
   0x4   :  { %v53_v12 = vmul.f32 %v228_v2, %v338_v1  ;;  %v54_v13 = vmul.f32 %v229_v3, %v338_v1  ;;  %v55_v16 = vmul.f32 %v232_v8, %v338_v1  ;;  %v56_v17 = vmul.f32 %v233_v9, %v338_v1  ;;  %v301_v28 = vld [vmem:[%s422_s0 + $0x20] sm:$0xff]  }
   0x5   :  { %v57_v18 = vmul.f32 %v236_v10, %v338_v1  ;;  %v58_v19 = vmul.f32 %v237_v11, %v338_v1  ;;  %v59_v22 = vmul.f32 %v240_v14, %v338_v1  ;;  %v60_v23 = vmul.f32 %v241_v15, %v338_v1 }
   0x6   :  { %v76_v20 = vadd.f32 %v352_v7, %v53_v12  ;;  %v77_v21 = vadd.f32 %v352_v7, %v54_v13  ;;  %v78_v24 = vadd.f32 %v352_v7, %v55_v16  ;;  %v79_v25 = vadd.f32 %v352_v7, %v56_v17 }
   0x7   :  { %v80_v26 = vadd.f32 %v352_v7, %v57_v18  ;;  %v81_v27 = vadd.f32 %v352_v7, %v58_v19  ;;  %v82_v31 = vadd.f32 %v352_v7, %v59_v22  ;;  %v83_v32 = vadd.f32 %v352_v7, %v60_v23 }
   0x8   :  { %v92_v29 = vmax.f32 %v76_v20, 0.0  ;;  %v93_v30 = vmax.f32 %v77_v21, 0.0  ;;  %v94_v34 = vmax.f32 %v78_v24, 0.0  ;;  %v95_v35 = vmax.f32 %v79_v25, 0.0 }
   0x9   :  { %v96_v36 = vmax.f32 %v80_v26, 0.0  ;;  %v97_v37 = vmax.f32 %v81_v27, 0.0  ;;  %v98_v40 = vmax.f32 %v82_v31, 0.0  ;;  %v99_v41 = vmax.f32 %v83_v32, 0.0 }
   0xa   :  { %v261_v39 = vpack.c.bf16 %v93_v30, %v92_v29  ;;  %v244_v42 = vunpack.c.l.bf16 %v301_v28  ;;  %v266_v44 = vpack.c.bf16 %v95_v35, %v94_v34  ;;  %v245_v46 = vunpack.c.h.bf16 %v301_v28 }
   0xb   :  { %v271_v45 = vpack.c.bf16 %v97_v37, %v96_v36  ;;  %v248_v47 = vunpack.c.l.bf16 %v302_v33  ;;  %v276_v48 = vpack.c.bf16 %v99_v41, %v98_v40  ;;  %v249_v50 = vunpack.c.h.bf16 %v302_v33 }
   0xc   :  { %262 = vst [vmem:[%s425_s3] sm:$0xff] %v261_v39   ;;  %v61_v49 = vmul.f32 %v244_v42, %v338_v1  ;;  %v252_v51 = vunpack.c.l.bf16 %v303_v38  ;;  %305 = vst [vmem:[%s425_s3 + $0x8] sm:$0xff] %v266_v44   ;;  %v62_v52 = vmul.f32 %v245_v46, %v338_v1  ;;  %v253_v54 = vunpack.c.h.bf16 %v303_v38 }
   0xd   :  { %306 = vst [vmem:[%s425_s3 + $0x10] sm:$0xff] %v271_v45   ;;  %v63_v53 = vmul.f32 %v248_v47, %v338_v1  ;;  %v256_v55 = vunpack.c.l.bf16 %v304_v43  ;;  %307 = vst [vmem:[%s425_s3 + $0x18] sm:$0xff] %v276_v48   ;;  %v64_v57 = vmul.f32 %v249_v50, %v338_v1  ;;  %v257_v59 = vunpack.c.h.bf16 %v304_v43 }
   0xe   :  { %v84_v56 = vadd.f32 %v352_v7, %v61_v49  ;;  %v65_v58 = vmul.f32 %v252_v51, %v338_v1  ;;  %v85_v60 = vadd.f32 %v352_v7, %v62_v52  ;;  %v66_v62 = vmul.f32 %v253_v54, %v338_v1 }
   0xf   :  { %v86_v61 = vadd.f32 %v352_v7, %v63_v53  ;;  %v67_v63 = vmul.f32 %v256_v55, %v338_v1  ;;  %v87_v2 = vadd.f32 %v352_v7, %v64_v57  ;;  %v68_v4 = vmul.f32 %v257_v59, %v338_v1 }
  0x10   :  { %v100_v0 = vmax.f32 %v84_v56, 0.0  ;;  %v88_v3 = vadd.f32 %v352_v7, %v65_v58  ;;  %v101_v5 = vmax.f32 %v85_v60, 0.0  ;;  %v89_v8 = vadd.f32 %v352_v7, %v66_v62 }
  0x11   :  { %v102_v6 = vmax.f32 %v86_v61, 0.0  ;;  %v90_v9 = vadd.f32 %v352_v7, %v67_v63  ;;  %v103_v10 = vmax.f32 %v87_v2, 0.0  ;;  %v91_v12 = vadd.f32 %v352_v7, %v68_v4 }
  0x12   :  { %v104_v11 = vmax.f32 %v88_v3, 0.0  ;;  %v281_v13 = vpack.c.bf16 %v101_v5, %v100_v0  ;;  %v105_v14 = vmax.f32 %v89_v8, 0.0 }
  0x13   :  { %v106_v15 = vmax.f32 %v90_v9, 0.0  ;;  %v286_v16 = vpack.c.bf16 %v103_v10, %v102_v6  ;;  %v107_v17 = vmax.f32 %v91_v12, 0.0 }
  0x14   :  { %308 = vst [vmem:[%s425_s3 + $0x20] sm:$0xff] %v281_v13   ;;  %v291_v1 = vpack.c.bf16 %v105_v14, %v104_v11 }
  0x15   :  { %309 = vst [vmem:[%s425_s3 + $0x28] sm:$0xff] %v286_v16   ;;  %v296_v18 = vpack.c.bf16 %v107_v17, %v106_v15 }
  0x16   :  { %310 = vst [vmem:[%s425_s3 + $0x30] sm:$0xff] %v291_v1  }
  0x17   :  { %311 = vst [vmem:[%s425_s3 + $0x38] sm:$0xff] %v296_v18  }

// kernel: generator_forward.28
= control target key start
LH: loop header
LB: loop body
LE: loop exit
PB: predicated region body
PF: predicated region fallthrough
CT: control target
= control target key end

     0   :  { %s794_s1 = inlined_call_operand.vmem [shape: bf16[128,128], index: 1, kind: input, shape index: {}]   ;;  %s795_s0 = inlined_call_operand.vmem [shape: bf16[128,128], index: 0, kind: input, shape index: {}]   ;;  %s796_s2 = inlined_call_operand.vmem [shape: f32[1,128], index: 2, kind: input, shape index: {}]   ;;  %s797_s3 = inlined_call_operand.vmem [shape: bf16[128,128], index: 3, kind: output, shape index: {0}]   ;;  %s798_s4 = inlined_call_operand.vmem [shape: f32[1,1,128], index: 4, kind: output, shape index: {1}]   ;;  %s799_s5 = inlined_call_operand.vmem [shape: f32[1,1,128], index: 5, kind: output, shape index: {2}]  }
   0x1   :  { %v649_v0 = vld [vmem:[%s794_s1] sm:$0xff]   ;;  %v650_v1 = vld [vmem:[%s794_s1 + $0x8] sm:$0xff]   ;;  %v651_v2 = vld [vmem:[%s794_s1 + $0x10] sm:$0xff]  }
   0x2   :  { %601 = vmatprep.subr.bf16.mxu0 %v649_v0  ;;  %633 = vmatprep.subr.bf16.mxu1 %v649_v0  ;;  %v652_v3 = vld [vmem:[%s794_s1 + $0x18] sm:$0xff]   ;;  %v657_v4 = vld [vmem:[%s795_s0] sm:$0xff]   ;;  %v654_v7 = vld [vmem:[%s794_s1 + $0x28] sm:$0xff]  }
   0x3   :  { %602 = vmatpush3.bf16.msra.mxu0 %v649_v0  ;;  %641 = vmatpush3.bf16.msra.mxu1 %v649_v0  ;;  %v653_v5 = vld [vmem:[%s794_s1 + $0x20] sm:$0xff]   ;;  %v655_v8 = vld [vmem:[%s794_s1 + $0x30] sm:$0xff]   ;;  %v656_v9 = vld [vmem:[%s794_s1 + $0x38] sm:$0xff]  }
   0x4   :  { %603 = vmatprep.subr.bf16.mxu0 %v650_v1  ;;  %634 = vmatprep.subr.bf16.mxu1 %v650_v1  ;;  %v661_v6 = vld [vmem:[%s795_s0 + $0x20] sm:$0xff]   ;;  %v658_v10 = vld [vmem:[%s795_s0 + $0x8] sm:$0xff]   ;;  %v659_v12 = vld [vmem:[%s795_s0 + $0x10] sm:$0xff]  }
   0x5   :  { %617 = vmatprep.mubr.bf16.mxu0 %v657_v4  ;;  %625 = vmatprep.mubr.bf16.mxu1 %v661_v6  ;;  %v662_v11 = vld [vmem:[%s795_s0 + $0x28] sm:$0xff]   ;;  %v663_v13 = vld [vmem:[%s795_s0 + $0x30] sm:$0xff]   ;;  %v660_v14 = vld [vmem:[%s795_s0 + $0x18] sm:$0xff]  }
   0x6   :  { %v664_v15 = vld [vmem:[%s795_s0 + $0x38] sm:$0xff]   ;;  %v489_v16 = vld [vmem:[%s796_s2] ss:$0 sm:$0xff] }
   0x7   :  { %604 = vmatpush3.bf16.msra.mxu0 %v650_v1  ;;  %642 = vmatpush3.bf16.msra.mxu1 %v650_v1 }
   0x8   :  { %605 = vmatprep.subr.bf16.mxu0 %v651_v2  ;;  %635 = vmatprep.subr.bf16.mxu1 %v651_v2 }
   0xb   :  { %606 = vmatpush3.bf16.msra.mxu0 %v651_v2  ;;  %643 = vmatpush3.bf16.msra.mxu1 %v651_v2 }
   0xc   :  { %607 = vmatprep.subr.bf16.mxu0 %v652_v3  ;;  %636 = vmatprep.subr.bf16.mxu1 %v652_v3 }
   0xf   :  { %608 = vmatpush3.bf16.msra.mxu0 %v652_v3  ;;  %644 = vmatpush3.bf16.msra.mxu1 %v652_v3 }
  0x10   :  { %609 = vmatprep.subr.bf16.mxu0 %v653_v5  ;;  %637 = vmatprep.subr.bf16.mxu1 %v653_v5 }
  0x13   :  { %610 = vmatpush3.bf16.msra.mxu0 %v653_v5  ;;  %645 = vmatpush3.bf16.msra.mxu1 %v653_v5 }
  0x14   :  { %611 = vmatprep.subr.bf16.mxu0 %v654_v7  ;;  %638 = vmatprep.subr.bf16.mxu1 %v654_v7 }
  0x17   :  { %612 = vmatpush3.bf16.msra.mxu0 %v654_v7  ;;  %646 = vmatpush3.bf16.msra.mxu1 %v654_v7 }
  0x18   :  { %613 = vmatprep.subr.bf16.mxu0 %v655_v8  ;;  %639 = vmatprep.subr.bf16.mxu1 %v655_v8 }
  0x1b   :  { %614 = vmatpush3.bf16.msra.mxu0 %v655_v8  ;;  %647 = vmatpush3.bf16.msra.mxu1 %v655_v8 }
  0x1c   :  { %615 = vmatprep.subr.bf16.mxu0 %v656_v9  ;;  %640 = vmatprep.subr.bf16.mxu1 %v656_v9 }
  0x1f   :  { %616 = vmatpush3.bf16.msra.mxu0 %v656_v9  ;;  %648 = vmatpush3.bf16.msra.mxu1 %v656_v9 }
  0x22   :  { %618 = vmatmul.mubr.bf16.vlgmr.msra.gmra.mrb[0].mxu0 %v658_v10  ;;  %626 = vmatmul.mubr.bf16.vlgmr.msra.gmra.mrb[0].mxu1 %v662_v11 }
  0x23   :  { %621 = vmatprep.mubr.bf16.mxu0 %v659_v12  ;;  %629 = vmatprep.mubr.bf16.mxu1 %v663_v13 }
  0x2a   :  { %622 = vmatmul.mubr.bf16.gmra.mrb[4].mxu0 %v660_v14  ;;  %630 = vmatmul.mubr.bf16.gmra.mrb[4].mxu1 %v664_v15 }
  0xf5   :  { %v619_v17 = vpop.f32.mrb[0].mxu0  ;;  %v627_v18 = vpop.f32.mrb[0].mxu1 }
  0xf6   :  { %v223_v19 = vpop.f32.mrb[1].mxu0  ;;  %v746_v20 = vadd.f32 %v627_v18, %v489_v16  ;;  %v255_v21 = vpop.f32.mrb[1].mxu1  ;;  %v288_v26 = vadd.f32 %v619_v17, %v489_v16 }
  0xf7   :  { %v286_v22 = vadd.f32 %v489_v16, %v223_v19  ;;  %v620_v23 = vpop.f32.mrb[2].mxu0  ;;  %v748_v24 = vadd.f32 %v489_v16, %v255_v21  ;;  %v628_v25 = vpop.f32.mrb[2].mxu1 }
  0xf8   :  { %v289_v27 = vadd.f32 %v620_v23, %v489_v16  ;;  %v226_v28 = vpop.f32.mrb[3].mxu0  ;;  %v750_v29 = vadd.f32 %v628_v25, %v489_v16  ;;  %v258_v30 = vpop.f32.mrb[3].mxu1  ;;  %v441_v40 = vmul.f32 %v288_v26, %v288_v26  ;;  %v449_v21 = vmul.f32 %v746_v20, %v746_v20 }
  0xf9   :  { %v287_v31 = vadd.f32 %v489_v16, %v226_v28  ;;  %v295_v32 = vadd.f32 %v489_v16, %v258_v30  ;;  %v439_v33 = vmul.f32 %v286_v22, %v286_v22  ;;  %v447_v14 = vmul.f32 %v748_v24, %v748_v24 }
  0xfa   :  { %v546_v34 = vpack.c.bf16 %v289_v27, %v288_v26  ;;  %v566_v35 = vpack.c.bf16 %v750_v29, %v746_v20  ;;  %v442_v48 = vmul.f32 %v289_v27, %v289_v27  ;;  %v450_v25 = vmul.f32 %v750_v29, %v750_v29 }
  0xfb   :  { %v541_v36 = vpack.c.bf16 %v287_v31, %v286_v22  ;;  %v417_v37 = vadd.f32 %v287_v31, %v286_v22  ;;  %v440_v38 = vmul.f32 %v287_v31, %v287_v31  ;;  %v561_v39 = vpack.c.bf16 %v295_v32, %v748_v24 }
  0xfc   :  { %578 = vst [vmem:[%s797_s3 + $0x8] sm:$0xff] %v546_v34   ;;  %582 = vst [vmem:[%s797_s3 + $0x28] sm:$0xff] %v566_v35   ;;  %v448_v19 = vmul.f32 %v295_v32, %v295_v32 }
  0xfd   :  { %542 = vst [vmem:[%s797_s3] sm:$0xff] %v541_v36   ;;  %v418_v41 = vadd.f32 %v417_v37, %v288_v26  ;;  %v455_v42 = vadd.f32 %v440_v38, %v439_v33  ;;  %v623_v43 = vpop.f32.mrb[4].mxu0  ;;  %581 = vst [vmem:[%s797_s3 + $0x20] sm:$0xff] %v561_v39   ;;  %v631_v44 = vpop.f32.mrb[4].mxu1 }
  0xfe   :  { %v239_v45 = vpop.f32.mrb[5].mxu0  ;;  %v300_v46 = vadd.f32 %v631_v44, %v489_v16  ;;  %v271_v47 = vpop.f32.mrb[5].mxu1  ;;  %v292_v54 = vadd.f32 %v623_v43, %v489_v16 }
  0xff   :  { %v456_v49 = vadd.f32 %v455_v42, %v441_v40  ;;  %v290_v50 = vadd.f32 %v489_v16, %v239_v45  ;;  %v419_v51 = vadd.f32 %v418_v41, %v289_v27  ;;  %v624_v52 = vpop.f32.mrb[6].mxu0  ;;  %v632_v53 = vpop.f32.mrb[6].mxu1  ;;  %v298_v0 = vadd.f32 %v489_v16, %v271_v47 }
 0x100   :  { %v293_v55 = vadd.f32 %v624_v52, %v489_v16  ;;  %v242_v56 = vpop.f32.mrb[7].mxu0  ;;  %v301_v57 = vadd.f32 %v632_v53, %v489_v16  ;;  %v274_v58 = vpop.f32.mrb[7].mxu1  ;;  %v445_v7 = vmul.f32 %v292_v54, %v292_v54  ;;  %v453_v35 = vmul.f32 %v300_v46, %v300_v46 }
 0x101   :  { %v420_v59 = vadd.f32 %v419_v51, %v290_v50  ;;  %v443_v60 = vmul.f32 %v290_v50, %v290_v50  ;;  %v457_v61 = vadd.f32 %v456_v49, %v442_v48  ;;  %v291_v62 = vadd.f32 %v489_v16, %v242_v56 }
 0x102   :  { %v556_v63 = vpack.c.bf16 %v293_v55, %v292_v54  ;;  %v576_v1 = vpack.c.bf16 %v301_v57, %v300_v46  ;;  %v299_v6 = vadd.f32 %v489_v16, %v274_v58  ;;  %v446_v11 = vmul.f32 %v293_v55, %v293_v55 }
 0x103   :  { %v458_v2 = vadd.f32 %v457_v61, %v443_v60  ;;  %v551_v3 = vpack.c.bf16 %v291_v62, %v290_v50  ;;  %v421_v4 = vadd.f32 %v420_v59, %v291_v62  ;;  %v444_v5 = vmul.f32 %v291_v62, %v291_v62 }
 0x104   :  { %580 = vst [vmem:[%s797_s3 + $0x18] sm:$0xff] %v556_v63   ;;  %584 = vst [vmem:[%s797_s3 + $0x38] sm:$0xff] %v576_v1   ;;  %v571_v10 = vpack.c.bf16 %v299_v6, %v298_v0  ;;  %v451_v28 = vmul.f32 %v298_v0, %v298_v0  ;;  %v452_v34 = vmul.f32 %v299_v6, %v299_v6 }
 0x105   :  { %579 = vst [vmem:[%s797_s3 + $0x10] sm:$0xff] %v551_v3   ;;  %v422_v8 = vadd.f32 %v421_v4, %v292_v54  ;;  %v459_v9 = vadd.f32 %v458_v2, %v444_v5  ;;  %v454_v37 = vmul.f32 %v301_v57, %v301_v57 }
 0x106   :  { %583 = vst [vmem:[%s797_s3 + $0x30] sm:$0xff] %v571_v10  }
 0x107   :  { %v460_v12 = vadd.f32 %v459_v9, %v445_v7  ;;  %v423_v13 = vadd.f32 %v422_v8, %v293_v55 }
 0x109   :  { %v424_v15 = vadd.f32 %v423_v13, %v748_v24  ;;  %v461_v16 = vadd.f32 %v460_v12, %v446_v11 }
 0x10b   :  { %v462_v17 = vadd.f32 %v461_v16, %v447_v14  ;;  %v425_v18 = vadd.f32 %v424_v15, %v295_v32 }
 0x10d   :  { %v426_v22 = vadd.f32 %v425_v18, %v746_v20  ;;  %v463_v23 = vadd.f32 %v462_v17, %v448_v19 }
 0x10f   :  { %v464_v26 = vadd.f32 %v463_v23, %v449_v21  ;;  %v427_v27 = vadd.f32 %v426_v22, %v750_v29 }
 0x111   :  { %v428_v30 = vadd.f32 %v427_v27, %v298_v0  ;;  %v465_v31 = vadd.f32 %v464_v26, %v450_v25 }
 0x113   :  { %v466_v24 = vadd.f32 %v465_v31, %v451_v28  ;;  %v429_v33 = vadd.f32 %v428_v30, %v299_v6 }
 0x115   :  { %v430_v32 = vadd.f32 %v429_v33, %v300_v46  ;;  %v467_v36 = vadd.f32 %v466_v24, %v452_v34 }
 0x117   :  { %v431_v38 = vadd.f32 %v430_v32, %v301_v57  ;;  %v468_v39 = vadd.f32 %v467_v36, %v453_v35 }
 0x119   :  { %v432_v20 = vrot.slane %v431_v38, 4  ;;  %v469_v40 = vadd.f32 %v468_v39, %v454_v37 }
 0x11b   :  { %v433_v41 = vadd.f32 %v432_v20, %v431_v38  ;;  %v470_v42 = vrot.slane %v469_v40, 4 }
 0x11d   :  { %v434_v43 = vrot.slane %v433_v41, 2  ;;  %v471_v44 = vadd.f32 %v470_v42, %v469_v40 }
 0x11f   :  { %v435_v45 = vadd.f32 %v434_v43, %v433_v41  ;;  %v472_v29 = vrot.slane %v471_v44, 2 }
 0x121   :  { %v436_v47 = vrot.slane %v435_v45, 1  ;;  %v473_v48 = vadd.f32 %v472_v29, %v471_v44 }
 0x123   :  { %v437_v49 = vadd.f32 %v436_v47, %v435_v45  ;;  %v474_v50 = vrot.slane %v473_v48, 1 }
 0x125   :  { %438 = vst [vmem:[%s798_s4] sm:$0x1] %v437_v49  ;;  %v475_v46 = vadd.f32 %v474_v50, %v473_v48 }
 0x127   :  { %476 = vst [vmem:[%s799_s5] sm:$0x1] %v475_v46 }

// kernel: generator_forward.32
= control target key start
LH: loop header
LB: loop body
LE: loop exit
PB: predicated region body
PF: predicated region fallthrough
CT: control target
= control target key end

     0   :  { %s1502_s0 = inlined_call_operand.vmem [shape: bf16[512,128], index: 0, kind: input, shape index: {}]   ;;  %s1503_s1 = inlined_call_operand.vmem [shape: f32[1,128], index: 1, kind: input, shape index: {}]   ;;  %s1504_s2 = inlined_call_operand.vmem [shape: f32[1,128], index: 2, kind: input, shape index: {}]   ;;  %s1505_s3 = inlined_call_operand.vmem [shape: bf16[512,128], index: 3, kind: output, shape index: {}]  }
   0x1   :  { %v803_v0 = vld [vmem:[%s1502_s0] sm:$0xff]   ;;  %v1090_v4 = vld [vmem:[%s1502_s0 + $0x8] sm:$0xff]   ;;  %v1091_v5 = vld [vmem:[%s1502_s0 + $0x10] sm:$0xff]  }
   0x2   :  { %v1178_v1 = vld [vmem:[%s1503_s1] ss:$0 sm:$0xff]  ;;  %v804_v2 = vunpack.c.l.bf16 %v803_v0  ;;  %v805_v3 = vunpack.c.h.bf16 %v803_v0  ;;  %v1092_v6 = vld [vmem:[%s1502_s0 + $0x18] sm:$0xff]   ;;  %v808_v8 = vunpack.c.l.bf16 %v1090_v4  ;;  %v809_v9 = vunpack.c.h.bf16 %v1090_v4  ;;  %v1094_v33 = vld [vmem:[%s1502_s0 + $0x28] sm:$0xff]  }
   0x3   :  { %v1192_v7 = vld [vmem:[%s1504_s2] ss:$0 sm:$0xff]  ;;  %v812_v10 = vunpack.c.l.bf16 %v1091_v5  ;;  %v813_v11 = vunpack.c.h.bf16 %v1091_v5  ;;  %v816_v14 = vunpack.c.l.bf16 %v1092_v6  ;;  %v817_v15 = vunpack.c.h.bf16 %v1092_v6  ;;  %v1095_v38 = vld [vmem:[%s1502_s0 + $0x30] sm:$0xff]   ;;  %v1096_v43 = vld [vmem:[%s1502_s0 + $0x38] sm:$0xff]  }
   0x4   :  { %v149_v12 = vmul.f32 %v804_v2, %v1178_v1  ;;  %v150_v13 = vmul.f32 %v805_v3, %v1178_v1  ;;  %v151_v16 = vmul.f32 %v808_v8, %v1178_v1  ;;  %v152_v17 = vmul.f32 %v809_v9, %v1178_v1  ;;  %v1093_v28 = vld [vmem:[%s1502_s0 + $0x20] sm:$0xff]  }
   0x5   :  { %v153_v18 = vmul.f32 %v812_v10, %v1178_v1  ;;  %v154_v19 = vmul.f32 %v813_v11, %v1178_v1  ;;  %v155_v22 = vmul.f32 %v816_v14, %v1178_v1  ;;  %v156_v23 = vmul.f32 %v817_v15, %v1178_v1  ;;  %v1097_v0 = vld [vmem:[%s1502_s0 + $0x40] sm:$0xff]   ;;  %v1098_v11 = vld [vmem:[%s1502_s0 + $0x48] sm:$0xff]  }
   0x6   :  { %v220_v20 = vadd.f32 %v1192_v7, %v149_v12  ;;  %v221_v21 = vadd.f32 %v1192_v7, %v150_v13  ;;  %v222_v24 = vadd.f32 %v1192_v7, %v151_v16  ;;  %v223_v25 = vadd.f32 %v1192_v7, %v152_v17  ;;  %v1099_v16 = vld [vmem:[%s1502_s0 + $0x50] sm:$0xff]  }
   0x7   :  { %v224_v26 = vadd.f32 %v1192_v7, %v153_v18  ;;  %v225_v27 = vadd.f32 %v1192_v7, %v154_v19  ;;  %v226_v31 = vadd.f32 %v1192_v7, %v155_v22  ;;  %v227_v32 = vadd.f32 %v1192_v7, %v156_v23 }
   0x8   :  { %v284_v29 = vmax.f32 %v220_v20, 0.0  ;;  %v285_v30 = vmax.f32 %v221_v21, 0.0  ;;  %v286_v34 = vmax.f32 %v222_v24, 0.0  ;;  %v287_v35 = vmax.f32 %v223_v25, 0.0  ;;  %v1100_v25 = vld [vmem:[%s1502_s0 + $0x58] sm:$0xff]  }
   0x9   :  { %v288_v36 = vmax.f32 %v224_v26, 0.0  ;;  %v289_v37 = vmax.f32 %v225_v27, 0.0  ;;  %v290_v40 = vmax.f32 %v226_v31, 0.0  ;;  %v291_v41 = vmax.f32 %v227_v32, 0.0 }
   0xa   :  { %v933_v39 = vpack.c.bf16 %v285_v30, %v284_v29  ;;  %v820_v42 = vunpack.c.l.bf16 %v1093_v28  ;;  %v938_v44 = vpack.c.bf16 %v287_v35, %v286_v34  ;;  %v821_v46 = vunpack.c.h.bf16 %v1093_v28 }
   0xb   :  { %v943_v45 = vpack.c.bf16 %v289_v37, %v288_v36  ;;  %v824_v47 = vunpack.c.l.bf16 %v1094_v33  ;;  %v948_v48 = vpack.c.bf16 %v291_v41, %v290_v40  ;;  %v825_v50 = vunpack.c.h.bf16 %v1094_v33 }
   0xc   :  { %934 = vst [vmem:[%s1505_s3] sm:$0xff] %v933_v39   ;;  %v157_v49 = vmul.f32 %v820_v42, %v1178_v1  ;;  %v828_v51 = vunpack.c.l.bf16 %v1095_v38  ;;  %1121 = vst [vmem:[%s1505_s3 + $0x8] sm:$0xff] %v938_v44   ;;  %v158_v52 = vmul.f32 %v821_v46, %v1178_v1  ;;  %v829_v54 = vunpack.c.h.bf16 %v1095_v38  ;;  %v1101_v38 = vld [vmem:[%s1502_s0 + $0x60] sm:$0xff]  }
   0xd   :  { %1122 = vst [vmem:[%s1505_s3 + $0x10] sm:$0xff] %v943_v45   ;;  %v159_v53 = vmul.f32 %v824_v47, %v1178_v1  ;;  %v832_v55 = vunpack.c.l.bf16 %v1096_v43  ;;  %1123 = vst [vmem:[%s1505_s3 + $0x18] sm:$0xff] %v948_v48   ;;  %v160_v57 = vmul.f32 %v825_v50, %v1178_v1  ;;  %v833_v59 = vunpack.c.h.bf16 %v1096_v43 }
   0xe   :  { %v228_v56 = vadd.f32 %v1192_v7, %v157_v49  ;;  %v161_v58 = vmul.f32 %v828_v51, %v1178_v1  ;;  %v229_v60 = vadd.f32 %v1192_v7, %v158_v52  ;;  %v162_v62 = vmul.f32 %v829_v54, %v1178_v1  ;;  %v1102_v51 = vld [vmem:[%s1502_s0 + $0x68] sm:$0xff]  }
   0xf   :  { %v230_v61 = vadd.f32 %v1192_v7, %v159_v53  ;;  %v163_v63 = vmul.f32 %v832_v55, %v1178_v1  ;;  %v231_v3 = vadd.f32 %v1192_v7, %v160_v57  ;;  %v164_v5 = vmul.f32 %v833_v59, %v1178_v1 }
  0x10   :  { %v292_v2 = vmax.f32 %v228_v56, 0.0  ;;  %v232_v4 = vadd.f32 %v1192_v7, %v161_v58  ;;  %v293_v6 = vmax.f32 %v229_v60, 0.0  ;;  %v233_v9 = vadd.f32 %v1192_v7, %v162_v62  ;;  %v1103_v60 = vld [vmem:[%s1502_s0 + $0x70] sm:$0xff]  }
  0x11   :  { %v294_v8 = vmax.f32 %v230_v61, 0.0  ;;  %v234_v10 = vadd.f32 %v1192_v7, %v163_v63  ;;  %v295_v12 = vmax.f32 %v231_v3, 0.0  ;;  %v235_v14 = vadd.f32 %v1192_v7, %v164_v5 }
  0x12   :  { %v296_v13 = vmax.f32 %v232_v4, 0.0  ;;  %v836_v15 = vunpack.c.l.bf16 %v1097_v0  ;;  %v953_v17 = vpack.c.bf16 %v293_v6, %v292_v2  ;;  %v297_v18 = vmax.f32 %v233_v9, 0.0  ;;  %v1104_v2 = vld [vmem:[%s1502_s0 + $0x78] sm:$0xff]  }
  0x13   :  { %v298_v19 = vmax.f32 %v234_v10, 0.0  ;;  %v837_v20 = vunpack.c.h.bf16 %v1097_v0  ;;  %v958_v21 = vpack.c.bf16 %v295_v12, %v294_v8  ;;  %v299_v22 = vmax.f32 %v235_v14, 0.0  ;;  %v1105_v12 = vld [vmem:[%s1502_s0 + $0x80] sm:$0xff]  }
  0x14   :  { %v165_v23 = vmul.f32 %v836_v15, %v1178_v1  ;;  %v840_v24 = vunpack.c.l.bf16 %v1098_v11  ;;  %1124 = vst [vmem:[%s1505_s3 + $0x20] sm:$0xff] %v953_v17   ;;  %v963_v26 = vpack.c.bf16 %v297_v18, %v296_v13  ;;  %v841_v28 = vunpack.c.h.bf16 %v1098_v11 }
  0x15   :  { %v166_v27 = vmul.f32 %v837_v20, %v1178_v1  ;;  %v844_v29 = vunpack.c.l.bf16 %v1099_v16  ;;  %1125 = vst [vmem:[%s1505_s3 + $0x28] sm:$0xff] %v958_v21   ;;  %v968_v30 = vpack.c.bf16 %v299_v22, %v298_v19  ;;  %v845_v33 = vunpack.c.h.bf16 %v1099_v16 }
  0x16   :  { %v236_v31 = vadd.f32 %v1192_v7, %v165_v23  ;;  %v167_v32 = vmul.f32 %v840_v24, %v1178_v1  ;;  %1126 = vst [vmem:[%s1505_s3 + $0x30] sm:$0xff] %v963_v26   ;;  %v168_v35 = vmul.f32 %v841_v28, %v1178_v1  ;;  %v848_v37 = vunpack.c.l.bf16 %v1100_v25 }
  0x17   :  { %v237_v34 = vadd.f32 %v1192_v7, %v166_v27  ;;  %v169_v36 = vmul.f32 %v844_v29, %v1178_v1  ;;  %1127 = vst [vmem:[%s1505_s3 + $0x38] sm:$0xff] %v968_v30   ;;  %v170_v41 = vmul.f32 %v845_v33, %v1178_v1  ;;  %v849_v42 = vunpack.c.h.bf16 %v1100_v25  ;;  %v1106_v29 = vld [vmem:[%s1502_s0 + $0x88] sm:$0xff]  }
  0x18   :  { %v300_v39 = vmax.f32 %v236_v31, 0.0  ;;  %v238_v40 = vadd.f32 %v1192_v7, %v167_v32  ;;  %v239_v44 = vadd.f32 %v1192_v7, %v168_v35  ;;  %v171_v46 = vmul.f32 %v848_v37, %v1178_v1 }
  0x19   :  { %v301_v43 = vmax.f32 %v237_v34, 0.0  ;;  %v240_v45 = vadd.f32 %v1192_v7, %v169_v36  ;;  %v241_v48 = vadd.f32 %v1192_v7, %v170_v41  ;;  %v172_v49 = vmul.f32 %v849_v42, %v1178_v1  ;;  %v1107_v34 = vld [vmem:[%s1502_s0 + $0x90] sm:$0xff]  }
  0x1a   :  { %v302_v47 = vmax.f32 %v238_v40, 0.0  ;;  %v852_v50 = vunpack.c.l.bf16 %v1101_v38  ;;  %v303_v53 = vmax.f32 %v239_v44, 0.0  ;;  %v242_v55 = vadd.f32 %v1192_v7, %v171_v46 }
  0x1b   :  { %v973_v52 = vpack.c.bf16 %v301_v43, %v300_v39  ;;  %v304_v54 = vmax.f32 %v240_v45, 0.0  ;;  %v305_v56 = vmax.f32 %v241_v48, 0.0  ;;  %v243_v57 = vadd.f32 %v1192_v7, %v172_v49  ;;  %v1108_v43 = vld [vmem:[%s1502_s0 + $0x98] sm:$0xff]  }
  0x1c   :  { %v853_v58 = vunpack.c.h.bf16 %v1101_v38  ;;  %v173_v59 = vmul.f32 %v852_v50, %v1178_v1  ;;  %v978_v61 = vpack.c.bf16 %v303_v53, %v302_v47  ;;  %v306_v62 = vmax.f32 %v242_v55, 0.0 }
  0x1d   :  { %1128 = vst [vmem:[%s1505_s3 + $0x40] sm:$0xff] %v973_v52   ;;  %v856_v63 = vunpack.c.l.bf16 %v1102_v51  ;;  %v857_v0 = vunpack.c.h.bf16 %v1102_v51  ;;  %v983_v3 = vpack.c.bf16 %v305_v56, %v304_v54  ;;  %v307_v4 = vmax.f32 %v243_v57, 0.0  ;;  %v1109_v56 = vld [vmem:[%s1502_s0 + $0xa0] sm:$0xff]  }
  0x1e   :  { %v174_v5 = vmul.f32 %v853_v58, %v1178_v1  ;;  %v244_v6 = vadd.f32 %v1192_v7, %v173_v59  ;;  %1129 = vst [vmem:[%s1505_s3 + $0x48] sm:$0xff] %v978_v61   ;;  %v860_v10 = vunpack.c.l.bf16 %v1103_v60  ;;  %v861_v11 = vunpack.c.h.bf16 %v1103_v60 }
  0x1f   :  { %v175_v8 = vmul.f32 %v856_v63, %v1178_v1  ;;  %v176_v9 = vmul.f32 %v857_v0, %v1178_v1  ;;  %1130 = vst [vmem:[%s1505_s3 + $0x50] sm:$0xff] %v983_v3   ;;  %v988_v13 = vpack.c.bf16 %v307_v4, %v306_v62  ;;  %v864_v16 = vunpack.c.l.bf16 %v1104_v2 }
  0x20   :  { %v245_v14 = vadd.f32 %v1192_v7, %v174_v5  ;;  %v308_v15 = vmax.f32 %v244_v6, 0.0  ;;  %v177_v19 = vmul.f32 %v860_v10, %v1178_v1  ;;  %v178_v20 = vmul.f32 %v861_v11, %v1178_v1 }
  0x21   :  { %v246_v17 = vadd.f32 %v1192_v7, %v175_v8  ;;  %v247_v18 = vadd.f32 %v1192_v7, %v176_v9  ;;  %1131 = vst [vmem:[%s1505_s3 + $0x58] sm:$0xff] %v988_v13   ;;  %v865_v22 = vunpack.c.h.bf16 %v1104_v2  ;;  %v179_v23 = vmul.f32 %v864_v16, %v1178_v1  ;;  %v1110_v2 = vld [vmem:[%s1502_s0 + $0xa8] sm:$0xff]   ;;  %v1111_v16 = vld [vmem:[%s1502_s0 + $0xb0] sm:$0xff]  }
  0x22   :  { %v309_v21 = vmax.f32 %v245_v14, 0.0  ;;  %v868_v24 = vunpack.c.l.bf16 %v1105_v12  ;;  %v248_v27 = vadd.f32 %v1192_v7, %v177_v19  ;;  %v249_v28 = vadd.f32 %v1192_v7, %v178_v20 }
  0x23   :  { %v310_v25 = vmax.f32 %v246_v17, 0.0  ;;  %v311_v26 = vmax.f32 %v247_v18, 0.0  ;;  %v180_v31 = vmul.f32 %v865_v22, %v1178_v1  ;;  %v250_v32 = vadd.f32 %v1192_v7, %v179_v23 }
  0x24   :  { %v993_v30 = vpack.c.bf16 %v309_v21, %v308_v15  ;;  %v869_v33 = vunpack.c.h.bf16 %v1105_v12  ;;  %v312_v36 = vmax.f32 %v248_v27, 0.0  ;;  %v313_v37 = vmax.f32 %v249_v28, 0.0  ;;  %v1112_v21 = vld [vmem:[%s1502_s0 + $0xb8] sm:$0xff]  }
  0x25   :  { %v998_v35 = vpack.c.bf16 %v311_v26, %v310_v25  ;;  %v181_v38 = vmul.f32 %v868_v24, %v1178_v1  ;;  %v251_v39 = vadd.f32 %v1192_v7, %v180_v31  ;;  %v314_v40 = vmax.f32 %v250_v32, 0.0 }
  0x26   :  { %1132 = vst [vmem:[%s1505_s3 + $0x60] sm:$0xff] %v993_v30   ;;  %v182_v41 = vmul.f32 %v869_v33, %v1178_v1  ;;  %v872_v42 = vunpack.c.l.bf16 %v1106_v29  ;;  %v1003_v44 = vpack.c.bf16 %v313_v37, %v312_v36  ;;  %v873_v46 = vunpack.c.h.bf16 %v1106_v29 }
  0x27   :  { %1133 = vst [vmem:[%s1505_s3 + $0x68] sm:$0xff] %v998_v35   ;;  %v252_v45 = vadd.f32 %v1192_v7, %v181_v38  ;;  %v876_v47 = vunpack.c.l.bf16 %v1107_v34  ;;  %v315_v48 = vmax.f32 %v251_v39, 0.0  ;;  %v877_v51 = vunpack.c.h.bf16 %v1107_v34  ;;  %v1113_v34 = vld [vmem:[%s1502_s0 + $0xc0] sm:$0xff]  }
  0x28   :  { %v253_v49 = vadd.f32 %v1192_v7, %v182_v41  ;;  %v183_v50 = vmul.f32 %v872_v42, %v1178_v1  ;;  %1134 = vst [vmem:[%s1505_s3 + $0x70] sm:$0xff] %v1003_v44   ;;  %v184_v53 = vmul.f32 %v873_v46, %v1178_v1  ;;  %v880_v55 = vunpack.c.l.bf16 %v1108_v43 }
  0x29   :  { %v316_v52 = vmax.f32 %v252_v45, 0.0  ;;  %v185_v54 = vmul.f32 %v876_v47, %v1178_v1  ;;  %v1008_v57 = vpack.c.bf16 %v315_v48, %v314_v40  ;;  %v186_v60 = vmul.f32 %v877_v51, %v1178_v1  ;;  %v1114_v47 = vld [vmem:[%s1502_s0 + $0xc8] sm:$0xff]  }
  0x2a   :  { %v317_v58 = vmax.f32 %v253_v49, 0.0  ;;  %v254_v59 = vadd.f32 %v1192_v7, %v183_v50  ;;  %v255_v61 = vadd.f32 %v1192_v7, %v184_v53  ;;  %v881_v63 = vunpack.c.h.bf16 %v1108_v43 }
  0x2b   :  { %v256_v62 = vadd.f32 %v1192_v7, %v185_v54  ;;  %v187_v0 = vmul.f32 %v880_v55, %v1178_v1  ;;  %1135 = vst [vmem:[%s1505_s3 + $0x78] sm:$0xff] %v1008_v57   ;;  %v257_v5 = vadd.f32 %v1192_v7, %v186_v60  ;;  %v884_v6 = vunpack.c.l.bf16 %v1109_v56 }
  0x2c   :  { %v1013_v3 = vpack.c.bf16 %v317_v58, %v316_v52  ;;  %v318_v4 = vmax.f32 %v254_v59, 0.0  ;;  %v319_v8 = vmax.f32 %v255_v61, 0.0  ;;  %v188_v10 = vmul.f32 %v881_v63, %v1178_v1  ;;  %v1115_v52 = vld [vmem:[%s1502_s0 + $0xd0] sm:$0xff]   ;;  %v1116_v61 = vld [vmem:[%s1502_s0 + $0xd8] sm:$0xff]  }
  0x2d   :  { %v320_v9 = vmax.f32 %v256_v62, 0.0  ;;  %v258_v11 = vadd.f32 %v1192_v7, %v187_v0  ;;  %v321_v12 = vmax.f32 %v257_v5, 0.0  ;;  %v885_v13 = vunpack.c.h.bf16 %v1109_v56 }
  0x2e   :  { %1136 = vst [vmem:[%s1505_s3 + $0x80] sm:$0xff] %v1013_v3   ;;  %v189_v14 = vmul.f32 %v884_v6, %v1178_v1  ;;  %v888_v15 = vunpack.c.l.bf16 %v1110_v2  ;;  %v1018_v17 = vpack.c.bf16 %v319_v8, %v318_v4  ;;  %v259_v18 = vadd.f32 %v1192_v7, %v188_v10 }
  0x2f   :  { %v322_v19 = vmax.f32 %v258_v11, 0.0  ;;  %v889_v20 = vunpack.c.h.bf16 %v1110_v2  ;;  %v1023_v22 = vpack.c.bf16 %v321_v12, %v320_v9  ;;  %v190_v23 = vmul.f32 %v885_v13, %v1178_v1  ;;  %v1117_v12 = vld [vmem:[%s1502_s0 + $0xe0] sm:$0xff]  }
  0x30   :  { %v260_v24 = vadd.f32 %v1192_v7, %v189_v14  ;;  %v191_v25 = vmul.f32 %v888_v15, %v1178_v1  ;;  %1137 = vst [vmem:[%s1505_s3 + $0x88] sm:$0xff] %v1018_v17   ;;  %v323_v26 = vmax.f32 %v259_v18, 0.0  ;;  %v892_v28 = vunpack.c.l.bf16 %v1111_v16 }
  0x31   :  { %v192_v27 = vmul.f32 %v889_v20, %v1178_v1  ;;  %v893_v29 = vunpack.c.h.bf16 %v1111_v16  ;;  %1138 = vst [vmem:[%s1505_s3 + $0x90] sm:$0xff] %v1023_v22   ;;  %v261_v30 = vadd.f32 %v1192_v7, %v190_v23  ;;  %v896_v33 = vunpack.c.l.bf16 %v1112_v21 }
  0x32   :  { %v324_v31 = vmax.f32 %v260_v24, 0.0  ;;  %v262_v32 = vadd.f32 %v1192_v7, %v191_v25  ;;  %v1028_v35 = vpack.c.bf16 %v323_v26, %v322_v19  ;;  %v193_v37 = vmul.f32 %v892_v28, %v1178_v1 }
  0x33   :  { %v263_v36 = vadd.f32 %v1192_v7, %v192_v27  ;;  %v194_v38 = vmul.f32 %v893_v29, %v1178_v1  ;;  %v325_v39 = vmax.f32 %v261_v30, 0.0  ;;  %v897_v41 = vunpack.c.h.bf16 %v1112_v21  ;;  %v1118_v21 = vld [vmem:[%s1502_s0 + $0xe8] sm:$0xff]  }
  0x34   :  { %v326_v40 = vmax.f32 %v262_v32, 0.0  ;;  %v195_v42 = vmul.f32 %v896_v33, %v1178_v1  ;;  %1139 = vst [vmem:[%s1505_s3 + $0x98] sm:$0xff] %v1028_v35   ;;  %v264_v44 = vadd.f32 %v1192_v7, %v193_v37  ;;  %v900_v46 = vunpack.c.l.bf16 %v1113_v34 }
  0x35   :  { %v327_v43 = vmax.f32 %v263_v36, 0.0  ;;  %v265_v45 = vadd.f32 %v1192_v7, %v194_v38  ;;  %v1033_v48 = vpack.c.bf16 %v325_v39, %v324_v31  ;;  %v196_v49 = vmul.f32 %v897_v41, %v1178_v1  ;;  %v1120_v39 = vld [vmem:[%s1502_s0 + $0xf8] sm:$0xff]  }
  0x36   :  { %v266_v50 = vadd.f32 %v1192_v7, %v195_v42  ;;  %v901_v51 = vunpack.c.h.bf16 %v1113_v34  ;;  %v328_v54 = vmax.f32 %v264_v44, 0.0  ;;  %v197_v56 = vmul.f32 %v900_v46, %v1178_v1  ;;  %v1119_v34 = vld [vmem:[%s1502_s0 + $0xf0] sm:$0xff]  }
  0x37   :  { %v1038_v53 = vpack.c.bf16 %v327_v43, %v326_v40  ;;  %v329_v55 = vmax.f32 %v265_v45, 0.0  ;;  %1140 = vst [vmem:[%s1505_s3 + $0xa0] sm:$0xff] %v1033_v48   ;;  %v267_v57 = vadd.f32 %v1192_v7, %v196_v49  ;;  %v904_v60 = vunpack.c.l.bf16 %v1114_v47 }
  0x38   :  { %v330_v58 = vmax.f32 %v266_v50, 0.0  ;;  %v198_v59 = vmul.f32 %v901_v51, %v1178_v1  ;;  %v268_v63 = vadd.f32 %v1192_v7, %v197_v56  ;;  %v905_v0 = vunpack.c.h.bf16 %v1114_v47 }
  0x39   :  { %1141 = vst [vmem:[%s1505_s3 + $0xa8] sm:$0xff] %v1038_v53   ;;  %v1043_v62 = vpack.c.bf16 %v329_v55, %v328_v54  ;;  %v908_v2 = vunpack.c.l.bf16 %v1115_v52  ;;  %v331_v3 = vmax.f32 %v267_v57, 0.0  ;;  %v199_v5 = vmul.f32 %v904_v60, %v1178_v1 }
  0x3a   :  { %v269_v4 = vadd.f32 %v1192_v7, %v198_v59  ;;  %v909_v6 = vunpack.c.h.bf16 %v1115_v52  ;;  %v332_v8 = vmax.f32 %v268_v63, 0.0  ;;  %v200_v9 = vmul.f32 %v905_v0, %v1178_v1 }
  0x3b   :  { %1142 = vst [vmem:[%s1505_s3 + $0xb0] sm:$0xff] %v1043_v62   ;;  %v201_v10 = vmul.f32 %v908_v2, %v1178_v1  ;;  %v912_v11 = vunpack.c.l.bf16 %v1116_v61  ;;  %v1048_v13 = vpack.c.bf16 %v331_v3, %v330_v58  ;;  %v270_v15 = vadd.f32 %v1192_v7, %v199_v5 }
  0x3c   :  { %v333_v14 = vmax.f32 %v269_v4, 0.0  ;;  %v202_v16 = vmul.f32 %v909_v6, %v1178_v1  ;;  %v271_v17 = vadd.f32 %v1192_v7, %v200_v9  ;;  %v913_v19 = vunpack.c.h.bf16 %v1116_v61 }
  0x3d   :  { %v272_v18 = vadd.f32 %v1192_v7, %v201_v10  ;;  %v203_v20 = vmul.f32 %v912_v11, %v1178_v1  ;;  %1143 = vst [vmem:[%s1505_s3 + $0xb8] sm:$0xff] %v1048_v13   ;;  %v334_v23 = vmax.f32 %v270_v15, 0.0  ;;  %v916_v25 = vunpack.c.l.bf16 %v1117_v12 }
  0x3e   :  { %v1053_v22 = vpack.c.bf16 %v333_v14, %v332_v8  ;;  %v273_v24 = vadd.f32 %v1192_v7, %v202_v16  ;;  %v335_v26 = vmax.f32 %v271_v17, 0.0  ;;  %v204_v28 = vmul.f32 %v913_v19, %v1178_v1 }
  0x3f   :  { %v336_v27 = vmax.f32 %v272_v18, 0.0  ;;  %v274_v29 = vadd.f32 %v1192_v7, %v203_v20  ;;  %v917_v31 = vunpack.c.h.bf16 %v1117_v12  ;;  %v205_v32 = vmul.f32 %v916_v25, %v1178_v1 }
  0x40   :  { %1144 = vst [vmem:[%s1505_s3 + $0xc0] sm:$0xff] %v1053_v22   ;;  %v337_v30 = vmax.f32 %v273_v24, 0.0  ;;  %v920_v33 = vunpack.c.l.bf16 %v1118_v21  ;;  %v1058_v35 = vpack.c.bf16 %v335_v26, %v334_v23  ;;  %v275_v36 = vadd.f32 %v1192_v7, %v204_v28 }
  0x41   :  { %v338_v37 = vmax.f32 %v274_v29, 0.0  ;;  %v921_v38 = vunpack.c.h.bf16 %v1118_v21  ;;  %v206_v41 = vmul.f32 %v917_v31, %v1178_v1  ;;  %v276_v42 = vadd.f32 %v1192_v7, %v205_v32 }
  0x42   :  { %v1063_v40 = vpack.c.bf16 %v337_v30, %v336_v27  ;;  %v207_v43 = vmul.f32 %v920_v33, %v1178_v1  ;;  %1145 = vst [vmem:[%s1505_s3 + $0xc8] sm:$0xff] %v1058_v35   ;;  %v339_v44 = vmax.f32 %v275_v36, 0.0  ;;  %v924_v46 = vunpack.c.l.bf16 %v1119_v34 }
  0x43   :  { %v208_v45 = vmul.f32 %v921_v38, %v1178_v1  ;;  %v925_v47 = vunpack.c.h.bf16 %v1119_v34  ;;  %v277_v48 = vadd.f32 %v1192_v7, %v206_v41  ;;  %v340_v49 = vmax.f32 %v276_v42, 0.0 }
  0x44   :  { %1146 = vst [vmem:[%s1505_s3 + $0xd0] sm:$0xff] %v1063_v40   ;;  %v278_v50 = vadd.f32 %v1192_v7, %v207_v43  ;;  %v928_v51 = vunpack.c.l.bf16 %v1120_v39  ;;  %v1068_v52 = vpack.c.bf16 %v339_v44, %v338_v37  ;;  %v209_v54 = vmul.f32 %v924_v46, %v1178_v1 }
  0x45   :  { %v279_v53 = vadd.f32 %v1192_v7, %v208_v45  ;;  %v210_v55 = vmul.f32 %v925_v47, %v1178_v1  ;;  %v341_v56 = vmax.f32 %v277_v48, 0.0  ;;  %v929_v58 = vunpack.c.h.bf16 %v1120_v39 }
  0x46   :  { %v342_v57 = vmax.f32 %v278_v50, 0.0  ;;  %v211_v59 = vmul.f32 %v928_v51, %v1178_v1  ;;  %1147 = vst [vmem:[%s1505_s3 + $0xd8] sm:$0xff] %v1068_v52   ;;  %v280_v61 = vadd.f32 %v1192_v7, %v209_v54 }
  0x47   :  { %v343_v60 = vmax.f32 %v279_v53, 0.0  ;;  %v281_v62 = vadd.f32 %v1192_v7, %v210_v55  ;;  %v1073_v63 = vpack.c.bf16 %v341_v56, %v340_v49  ;;  %v212_v0 = vmul.f32 %v929_v58, %v1178_v1 }
  0x48   :  { %v282_v2 = vadd.f32 %v1192_v7, %v211_v59  ;;  %v344_v4 = vmax.f32 %v280_v61, 0.0 }
  0x49   :  { %v1078_v3 = vpack.c.bf16 %v343_v60, %v342_v57  ;;  %v345_v5 = vmax.f32 %v281_v62, 0.0  ;;  %1148 = vst [vmem:[%s1505_s3 + $0xe0] sm:$0xff] %v1073_v63   ;;  %v283_v6 = vadd.f32 %v1192_v7, %v212_v0 }
  0x4a   :  { %v346_v8 = vmax.f32 %v282_v2, 0.0 }
  0x4b   :  { %1149 = vst [vmem:[%s1505_s3 + $0xe8] sm:$0xff] %v1078_v3   ;;  %v1083_v9 = vpack.c.bf16 %v345_v5, %v344_v4  ;;  %v347_v10 = vmax.f32 %v283_v6, 0.0 }
  0x4d   :  { %1150 = vst [vmem:[%s1505_s3 + $0xf0] sm:$0xff] %v1083_v9   ;;  %v1088_v1 = vpack.c.bf16 %v347_v10, %v346_v8 }
  0x4f   :  { %1151 = vst [vmem:[%s1505_s3 + $0xf8] sm:$0xff] %v1088_v1  }

// kernel: generator_forward.33
= control target key start
LH: loop header
LB: loop body
LE: loop exit
PB: predicated region body
PF: predicated region fallthrough
CT: control target
= control target key end

     0   :  { %vm413_vm0 = vcmask 523264   ;;  %s2603_s1 = inlined_call_operand.vmem [shape: bf16[64,128], index: 1, kind: input, shape index: {}]   ;;  %s2604_s0 = inlined_call_operand.vmem [shape: bf16[512,64], index: 0, kind: input, shape index: {}]   ;;  %s2605_s2 = inlined_call_operand.vmem [shape: f32[1,128], index: 2, kind: input, shape index: {}]   ;;  %s2606_s3 = inlined_call_operand.vmem [shape: bf16[512,128], index: 3, kind: output, shape index: {0}]   ;;  %s2607_s4 = inlined_call_operand.vmem [shape: f32[1,1,128], index: 4, kind: output, shape index: {1}]   ;;  %s2608_s5 = inlined_call_operand.vmem [shape: f32[1,1,128], index: 5, kind: output, shape index: {2}]  }
   0x1   :  { %v2034_v0 = vld [vmem:[%s2603_s1] sm:$0xff]   ;;  %v2035_v1 = vld [vmem:[%s2603_s1 + $0x8] sm:$0xff]   ;;  %v2036_v2 = vld [vmem:[%s2603_s1 + $0x10] sm:$0xff]  }
   0x2   :  { %1954 = vmatprep.subr.bf16.mxu0 %v2034_v0  ;;  %2026 = vmatprep.subr.bf16.mxu1 %v2034_v0  ;;  %v2038_v3 = vld [vmem:[%s2604_s0] sm:$0xff]   ;;  %v2037_v4 = vld [vmem:[%s2603_s1 + $0x18] sm:$0xff]   ;;  %v2039_v5 = vld [vmem:[%s2604_s0 + $0x8] sm:$0xff]  }
   0x3   :  { %1955 = vmatpush3.bf16.msra.mxu0 %v2034_v0  ;;  %2030 = vmatpush3.bf16.msra.mxu1 %v2034_v0  ;;  %v2040_v6 = vld [vmem:[%s2604_s0 + $0x10] sm:$0xff]   ;;  %v2041_v7 = vld [vmem:[%s2604_s0 + $0x18] sm:$0xff]   ;;  %v2054_v8 = vld [vmem:[%s2604_s0 + $0x80] sm:$0xff]  }
   0x4   :  { %1956 = vmatprep.subr.bf16.mxu0 %v2035_v1  ;;  %2027 = vmatprep.subr.bf16.mxu1 %v2035_v1  ;;  %v2055_v9 = vld [vmem:[%s2604_s0 + $0x88] sm:$0xff]   ;;  %v2056_v10 = vld [vmem:[%s2604_s0 + $0x90] sm:$0xff]   ;;  %v2042_v11 = vld [vmem:[%s2604_s0 + $0x20] sm:$0xff]  }
   0x5   :  { %1962 = vmatprep.mubr.msk.bf16.mxu0 %vm413_vm0, %v2038_v3  ;;  %1994 = vmatprep.mubr.msk.bf16.mxu1 %vm413_vm0, %v2054_v8  ;;  %v2057_v12 = vld [vmem:[%s2604_s0 + $0x98] sm:$0xff]   ;;  %v2058_v13 = vld [vmem:[%s2604_s0 + $0xa0] sm:$0xff]   ;;  %v2043_v14 = vld [vmem:[%s2604_s0 + $0x28] sm:$0xff]  }
   0x6   :  { %v2044_v15 = vld [vmem:[%s2604_s0 + $0x30] sm:$0xff]   ;;  %v2059_v16 = vld [vmem:[%s2604_s0 + $0xa8] sm:$0xff]   ;;  %v2045_v18 = vld [vmem:[%s2604_s0 + $0x38] sm:$0xff]  }
   0x7   :  { %1957 = vmatpush3.bf16.msra.mxu0 %v2035_v1  ;;  %2031 = vmatpush3.bf16.msra.mxu1 %v2035_v1  ;;  %v2060_v17 = vld [vmem:[%s2604_s0 + $0xb0] sm:$0xff]   ;;  %v2046_v19 = vld [vmem:[%s2604_s0 + $0x40] sm:$0xff]   ;;  %v2061_v20 = vld [vmem:[%s2604_s0 + $0xb8] sm:$0xff]  }
   0x8   :  { %1958 = vmatprep.subr.bf16.mxu0 %v2036_v2  ;;  %2028 = vmatprep.subr.bf16.mxu1 %v2036_v2  ;;  %v2062_v21 = vld [vmem:[%s2604_s0 + $0xc0] sm:$0xff]   ;;  %v2047_v22 = vld [vmem:[%s2604_s0 + $0x48] sm:$0xff]   ;;  %v2048_v23 = vld [vmem:[%s2604_s0 + $0x50] sm:$0xff]  }
   0x9   :  { %v2063_v24 = vld [vmem:[%s2604_s0 + $0xc8] sm:$0xff]   ;;  %v2064_v25 = vld [vmem:[%s2604_s0 + $0xd0] sm:$0xff]   ;;  %v2049_v26 = vld [vmem:[%s2604_s0 + $0x58] sm:$0xff]  }
   0xa   :  { %v2050_v27 = vld [vmem:[%s2604_s0 + $0x60] sm:$0xff]   ;;  %v2065_v28 = vld [vmem:[%s2604_s0 + $0xd8] sm:$0xff]   ;;  %v2051_v30 = vld [vmem:[%s2604_s0 + $0x68] sm:$0xff]  }
   0xb   :  { %1959 = vmatpush3.bf16.msra.mxu0 %v2036_v2  ;;  %2032 = vmatpush3.bf16.msra.mxu1 %v2036_v2  ;;  %v2066_v29 = vld [vmem:[%s2604_s0 + $0xe0] sm:$0xff]   ;;  %v2052_v31 = vld [vmem:[%s2604_s0 + $0x70] sm:$0xff]   ;;  %v2067_v32 = vld [vmem:[%s2604_s0 + $0xe8] sm:$0xff]  }
   0xc   :  { %1960 = vmatprep.subr.bf16.mxu0 %v2037_v4  ;;  %2029 = vmatprep.subr.bf16.mxu1 %v2037_v4  ;;  %v2068_v33 = vld [vmem:[%s2604_s0 + $0xf0] sm:$0xff]   ;;  %v2053_v34 = vld [vmem:[%s2604_s0 + $0x78] sm:$0xff]   ;;  %v2243_v36 = vld [vmem:[%s2605_s2] ss:$0 sm:$0xff] }
   0xd   :  { %v2069_v35 = vld [vmem:[%s2604_s0 + $0xf8] sm:$0xff]  }
   0xf   :  { %1961 = vmatpush3.bf16.msra.mxu0 %v2037_v4  ;;  %2033 = vmatpush3.bf16.msra.mxu1 %v2037_v4 }
  0x12   :  { %1963 = vmatmul.mubr.msk.bf16.vlgmr.msra.gmra.mrb[0].mxu0 %vm413_vm0, %v2039_v5  ;;  %1995 = vmatmul.mubr.msk.bf16.vlgmr.msra.gmra.mrb[0].mxu1 %vm413_vm0, %v2055_v9 }
  0x13   :  { %1966 = vmatprep.mubr.msk.bf16.mxu0 %vm413_vm0, %v2040_v6  ;;  %1998 = vmatprep.mubr.msk.bf16.mxu1 %vm413_vm0, %v2056_v10 }
  0x1a   :  { %1967 = vmatmul.mubr.msk.bf16.gmra.mrb[4].mxu0 %vm413_vm0, %v2041_v7  ;;  %1999 = vmatmul.mubr.msk.bf16.gmra.mrb[4].mxu1 %vm413_vm0, %v2057_v12 }
  0x1b   :  { %1970 = vmatprep.mubr.msk.bf16.mxu0 %vm413_vm0, %v2042_v11  ;;  %2002 = vmatprep.mubr.msk.bf16.mxu1 %vm413_vm0, %v2058_v13 }
  0x22   :  { %1971 = vmatmul.mubr.msk.bf16.gmra.mrb[8].mxu0 %vm413_vm0, %v2043_v14  ;;  %2003 = vmatmul.mubr.msk.bf16.gmra.mrb[8].mxu1 %vm413_vm0, %v2059_v16 }
  0x23   :  { %1974 = vmatprep.mubr.msk.bf16.mxu0 %vm413_vm0, %v2044_v15  ;;  %2006 = vmatprep.mubr.msk.bf16.mxu1 %vm413_vm0, %v2060_v17 }
  0x2a   :  { %1975 = vmatmul.mubr.msk.bf16.gmra.mrb[12].mxu0 %vm413_vm0, %v2045_v18  ;;  %2007 = vmatmul.mubr.msk.bf16.gmra.mrb[12].mxu1 %vm413_vm0, %v2061_v20 }
  0x2b   :  { %1978 = vmatprep.mubr.msk.bf16.mxu0 %vm413_vm0, %v2046_v19  ;;  %2010 = vmatprep.mubr.msk.bf16.mxu1 %vm413_vm0, %v2062_v21 }
  0x32   :  { %1979 = vmatmul.mubr.msk.bf16.gmra.mrb[16].mxu0 %vm413_vm0, %v2047_v22  ;;  %2011 = vmatmul.mubr.msk.bf16.gmra.mrb[16].mxu1 %vm413_vm0, %v2063_v24 }
  0x33   :  { %1982 = vmatprep.mubr.msk.bf16.mxu0 %vm413_vm0, %v2048_v23  ;;  %2014 = vmatprep.mubr.msk.bf16.mxu1 %vm413_vm0, %v2064_v25 }
  0x3a   :  { %1983 = vmatmul.mubr.msk.bf16.gmra.mrb[20].mxu0 %vm413_vm0, %v2049_v26  ;;  %2015 = vmatmul.mubr.msk.bf16.gmra.mrb[20].mxu1 %vm413_vm0, %v2065_v28 }
  0x3b   :  { %1986 = vmatprep.mubr.msk.bf16.mxu0 %vm413_vm0, %v2050_v27  ;;  %2018 = vmatprep.mubr.msk.bf16.mxu1 %vm413_vm0, %v2066_v29 }
  0x42   :  { %1987 = vmatmul.mubr.msk.bf16.gmra.mrb[24].mxu0 %vm413_vm0, %v2051_v30  ;;  %2019 = vmatmul.mubr.msk.bf16.gmra.mrb[24].mxu1 %vm413_vm0, %v2067_v32 }
  0x43   :  { %1990 = vmatprep.mubr.msk.bf16.mxu0 %vm413_vm0, %v2052_v31  ;;  %2022 = vmatprep.mubr.msk.bf16.mxu1 %vm413_vm0, %v2068_v33 }
  0x4a   :  { %1991 = vmatmul.mubr.msk.bf16.gmra.mrb[28].mxu0 %vm413_vm0, %v2053_v34  ;;  %2023 = vmatmul.mubr.msk.bf16.gmra.mrb[28].mxu1 %vm413_vm0, %v2069_v35 }
  0xe5   :  { %v1964_v37 = vpop.f32.mrb[0].mxu0  ;;  %v1996_v47 = vpop.f32.mrb[0].mxu1 }
  0xe6   :  { %v544_v38 = vpop.f32.mrb[1].mxu0  ;;  %v801_v41 = vadd.f32 %v1964_v37, %v2243_v36  ;;  %v2250_v51 = vadd.f32 %v1996_v47, %v2243_v36  ;;  %v672_v52 = vpop.f32.mrb[1].mxu1 }
  0xe7   :  { %v799_v39 = vadd.f32 %v2243_v36, %v544_v38  ;;  %v1965_v40 = vpop.f32.mrb[2].mxu0  ;;  %v2256_v53 = vadd.f32 %v2243_v36, %v672_v52  ;;  %v1997_v54 = vpop.f32.mrb[2].mxu1 }
  0xe8   :  { %v802_v42 = vadd.f32 %v1965_v40, %v2243_v36  ;;  %v547_v43 = vpop.f32.mrb[3].mxu0  ;;  %v1386_v55 = vmul.f32 %v801_v41, %v801_v41  ;;  %v2262_v59 = vadd.f32 %v1997_v54, %v2243_v36  ;;  %v675_v60 = vpop.f32.mrb[3].mxu1 }
  0xe9   :  { %v800_v44 = vadd.f32 %v2243_v36, %v547_v43  ;;  %v1384_v45 = vmul.f32 %v799_v39, %v799_v39  ;;  %v2265_v63 = vadd.f32 %v2243_v36, %v675_v60 }
  0xea   :  { %v1735_v46 = vpack.c.bf16 %v802_v42, %v801_v41  ;;  %v1387_v61 = vmul.f32 %v802_v42, %v802_v42  ;;  %v1815_v4 = vpack.c.bf16 %v2262_v59, %v2250_v51 }
  0xeb   :  { %v1730_v48 = vpack.c.bf16 %v800_v44, %v799_v39  ;;  %v1314_v49 = vadd.f32 %v800_v44, %v799_v39  ;;  %v1385_v50 = vmul.f32 %v800_v44, %v800_v44  ;;  %v1810_v8 = vpack.c.bf16 %v2265_v63, %v2256_v53 }
  0xec   :  { %1887 = vst [vmem:[%s2606_s3 + $0x8] sm:$0xff] %v1735_v46   ;;  %1903 = vst [vmem:[%s2606_s3 + $0x88] sm:$0xff] %v1815_v4  }
  0xed   :  { %1731 = vst [vmem:[%s2606_s3] sm:$0xff] %v1730_v48   ;;  %v1315_v56 = vadd.f32 %v1314_v49, %v801_v41  ;;  %v1448_v57 = vadd.f32 %v1385_v50, %v1384_v45  ;;  %v1968_v58 = vpop.f32.mrb[4].mxu0  ;;  %1902 = vst [vmem:[%s2606_s3 + $0x80] sm:$0xff] %v1810_v8   ;;  %v2000_v14 = vpop.f32.mrb[4].mxu1 }
  0xee   :  { %v560_v62 = vpop.f32.mrb[5].mxu0  ;;  %v805_v5 = vadd.f32 %v1968_v58, %v2243_v36  ;;  %v688_v19 = vpop.f32.mrb[5].mxu1  ;;  %v2285_v20 = vadd.f32 %v2000_v14, %v2243_v36 }
  0xef   :  { %v1449_v0 = vadd.f32 %v1448_v57, %v1386_v55  ;;  %v803_v1 = vadd.f32 %v2243_v36, %v560_v62  ;;  %v1316_v2 = vadd.f32 %v1315_v56, %v802_v42  ;;  %v1969_v3 = vpop.f32.mrb[6].mxu0  ;;  %v2288_v21 = vadd.f32 %v2243_v36, %v688_v19  ;;  %v2001_v22 = vpop.f32.mrb[6].mxu1 }
  0xf0   :  { %v806_v6 = vadd.f32 %v1969_v3, %v2243_v36  ;;  %v563_v7 = vpop.f32.mrb[7].mxu0  ;;  %v1390_v23 = vmul.f32 %v805_v5, %v805_v5  ;;  %v2294_v27 = vadd.f32 %v2001_v22, %v2243_v36  ;;  %v691_v28 = vpop.f32.mrb[7].mxu1 }
  0xf1   :  { %v1317_v9 = vadd.f32 %v1316_v2, %v803_v1  ;;  %v1388_v10 = vmul.f32 %v803_v1, %v803_v1  ;;  %v1450_v11 = vadd.f32 %v1449_v0, %v1387_v61  ;;  %v804_v12 = vadd.f32 %v2243_v36, %v563_v7 }
  0xf2   :  { %v1745_v13 = vpack.c.bf16 %v806_v6, %v805_v5  ;;  %v1391_v29 = vmul.f32 %v806_v6, %v806_v6  ;;  %v2297_v31 = vadd.f32 %v2243_v36, %v691_v28  ;;  %v1825_v37 = vpack.c.bf16 %v2294_v27, %v2285_v20 }
  0xf3   :  { %v1451_v15 = vadd.f32 %v1450_v11, %v1388_v10  ;;  %v1740_v16 = vpack.c.bf16 %v804_v12, %v803_v1  ;;  %v1318_v17 = vadd.f32 %v1317_v9, %v804_v12  ;;  %v1389_v18 = vmul.f32 %v804_v12, %v804_v12 }
  0xf4   :  { %1889 = vst [vmem:[%s2606_s3 + $0x18] sm:$0xff] %v1745_v13   ;;  %v1820_v41 = vpack.c.bf16 %v2297_v31, %v2288_v21  ;;  %1905 = vst [vmem:[%s2606_s3 + $0x98] sm:$0xff] %v1825_v37  }
  0xf5   :  { %1888 = vst [vmem:[%s2606_s3 + $0x10] sm:$0xff] %v1740_v16   ;;  %v1319_v24 = vadd.f32 %v1318_v17, %v805_v5  ;;  %v1452_v25 = vadd.f32 %v1451_v15, %v1389_v18  ;;  %v1972_v26 = vpop.f32.mrb[8].mxu0  ;;  %v2004_v47 = vpop.f32.mrb[8].mxu1 }
  0xf6   :  { %v576_v30 = vpop.f32.mrb[9].mxu0  ;;  %v809_v38 = vadd.f32 %v1972_v26, %v2243_v36  ;;  %1904 = vst [vmem:[%s2606_s3 + $0x90] sm:$0xff] %v1820_v41   ;;  %v704_v54 = vpop.f32.mrb[9].mxu1  ;;  %v2317_v55 = vadd.f32 %v2004_v47, %v2243_v36 }
  0xf7   :  { %v1453_v32 = vadd.f32 %v1452_v25, %v1390_v23  ;;  %v807_v33 = vadd.f32 %v2243_v36, %v576_v30  ;;  %v1320_v34 = vadd.f32 %v1319_v24, %v806_v6  ;;  %v1973_v35 = vpop.f32.mrb[10].mxu0  ;;  %v2320_v56 = vadd.f32 %v2243_v36, %v704_v54  ;;  %v2005_v57 = vpop.f32.mrb[10].mxu1 }
  0xf8   :  { %v810_v39 = vadd.f32 %v1973_v35, %v2243_v36  ;;  %v579_v40 = vpop.f32.mrb[11].mxu0  ;;  %v1394_v58 = vmul.f32 %v809_v38, %v809_v38  ;;  %v2326_v0 = vadd.f32 %v2005_v57, %v2243_v36  ;;  %v707_v1 = vpop.f32.mrb[11].mxu1 }
  0xf9   :  { %v1321_v42 = vadd.f32 %v1320_v34, %v807_v33  ;;  %v1392_v43 = vmul.f32 %v807_v33, %v807_v33  ;;  %v1454_v44 = vadd.f32 %v1453_v32, %v1391_v29  ;;  %v808_v45 = vadd.f32 %v2243_v36, %v579_v40 }
  0xfa   :  { %v1755_v46 = vpack.c.bf16 %v810_v39, %v809_v38  ;;  %v1395_v2 = vmul.f32 %v810_v39, %v810_v39  ;;  %v2329_v4 = vadd.f32 %v2243_v36, %v707_v1  ;;  %v1835_v9 = vpack.c.bf16 %v2326_v0, %v2317_v55 }
  0xfb   :  { %v1455_v48 = vadd.f32 %v1454_v44, %v1392_v43  ;;  %v1750_v49 = vpack.c.bf16 %v808_v45, %v807_v33  ;;  %v1322_v50 = vadd.f32 %v1321_v42, %v808_v45  ;;  %v1393_v52 = vmul.f32 %v808_v45, %v808_v45 }
  0xfc   :  { %1891 = vst [vmem:[%s2606_s3 + $0x28] sm:$0xff] %v1755_v46   ;;  %v1830_v13 = vpack.c.bf16 %v2329_v4, %v2320_v56  ;;  %1907 = vst [vmem:[%s2606_s3 + $0xa8] sm:$0xff] %v1835_v9  }
  0xfd   :  { %1890 = vst [vmem:[%s2606_s3 + $0x20] sm:$0xff] %v1750_v49   ;;  %v1323_v60 = vadd.f32 %v1322_v50, %v809_v38  ;;  %v1456_v61 = vadd.f32 %v1455_v48, %v1393_v52  ;;  %v1976_v62 = vpop.f32.mrb[12].mxu0  ;;  %v2008_v19 = vpop.f32.mrb[12].mxu1 }
  0xfe   :  { %v592_v3 = vpop.f32.mrb[13].mxu0  ;;  %v813_v10 = vadd.f32 %v1976_v62, %v2243_v36  ;;  %1906 = vst [vmem:[%s2606_s3 + $0xa0] sm:$0xff] %v1830_v13   ;;  %v720_v26 = vpop.f32.mrb[13].mxu1  ;;  %v2349_v28 = vadd.f32 %v2008_v19, %v2243_v36 }
  0xff   :  { %v1457_v5 = vadd.f32 %v1456_v61, %v1394_v58  ;;  %v811_v6 = vadd.f32 %v2243_v36, %v592_v3  ;;  %v1324_v7 = vadd.f32 %v1323_v60, %v810_v39  ;;  %v1977_v8 = vpop.f32.mrb[14].mxu0  ;;  %v2352_v29 = vadd.f32 %v2243_v36, %v720_v26  ;;  %v2009_v30 = vpop.f32.mrb[14].mxu1 }
 0x100   :  { %v814_v11 = vadd.f32 %v1977_v8, %v2243_v36  ;;  %v595_v12 = vpop.f32.mrb[15].mxu0  ;;  %v1398_v32 = vmul.f32 %v813_v10, %v813_v10  ;;  %v2358_v37 = vadd.f32 %v2009_v30, %v2243_v36  ;;  %v723_v38 = vpop.f32.mrb[15].mxu1 }
 0x101   :  { %v1325_v14 = vadd.f32 %v1324_v7, %v811_v6  ;;  %v1396_v15 = vmul.f32 %v811_v6, %v811_v6  ;;  %v1458_v16 = vadd.f32 %v1457_v5, %v1395_v2  ;;  %v812_v17 = vadd.f32 %v2243_v36, %v595_v12 }
 0x102   :  { %v1765_v18 = vpack.c.bf16 %v814_v11, %v813_v10  ;;  %v1399_v39 = vmul.f32 %v814_v11, %v814_v11  ;;  %v2361_v41 = vadd.f32 %v2243_v36, %v723_v38  ;;  %v1845_v46 = vpack.c.bf16 %v2358_v37, %v2349_v28 }
 0x103   :  { %v1459_v22 = vadd.f32 %v1458_v16, %v1396_v15  ;;  %v1760_v23 = vpack.c.bf16 %v812_v17, %v811_v6  ;;  %v1326_v24 = vadd.f32 %v1325_v14, %v812_v17  ;;  %v1397_v25 = vmul.f32 %v812_v17, %v812_v17 }
 0x104   :  { %1893 = vst [vmem:[%s2606_s3 + $0x38] sm:$0xff] %v1765_v18   ;;  %v1840_v50 = vpack.c.bf16 %v2361_v41, %v2352_v29  ;;  %1909 = vst [vmem:[%s2606_s3 + $0xb8] sm:$0xff] %v1845_v46  }
 0x105   :  { %1892 = vst [vmem:[%s2606_s3 + $0x30] sm:$0xff] %v1760_v23   ;;  %v1327_v33 = vadd.f32 %v1326_v24, %v813_v10  ;;  %v1460_v34 = vadd.f32 %v1459_v22, %v1397_v25  ;;  %v1980_v35 = vpop.f32.mrb[16].mxu0  ;;  %v2012_v61 = vpop.f32.mrb[16].mxu1 }
 0x106   :  { %v608_v40 = vpop.f32.mrb[17].mxu0  ;;  %v817_v47 = vadd.f32 %v1980_v35, %v2243_v36  ;;  %1908 = vst [vmem:[%s2606_s3 + $0xb0] sm:$0xff] %v1840_v50   ;;  %v736_v5 = vpop.f32.mrb[17].mxu1  ;;  %v2381_v6 = vadd.f32 %v2012_v61, %v2243_v36 }
 0x107   :  { %v1461_v42 = vadd.f32 %v1460_v34, %v1398_v32  ;;  %v815_v43 = vadd.f32 %v2243_v36, %v608_v40  ;;  %v1328_v44 = vadd.f32 %v1327_v33, %v814_v11  ;;  %v1981_v45 = vpop.f32.mrb[18].mxu0  ;;  %v2384_v7 = vadd.f32 %v2243_v36, %v736_v5  ;;  %v2013_v8 = vpop.f32.mrb[18].mxu1 }
 0x108   :  { %v818_v48 = vadd.f32 %v1981_v45, %v2243_v36  ;;  %v611_v49 = vpop.f32.mrb[19].mxu0  ;;  %v1402_v9 = vmul.f32 %v817_v47, %v817_v47  ;;  %v2390_v13 = vadd.f32 %v2013_v8, %v2243_v36  ;;  %v739_v14 = vpop.f32.mrb[19].mxu1 }
 0x109   :  { %v1329_v52 = vadd.f32 %v1328_v44, %v815_v43  ;;  %v1400_v54 = vmul.f32 %v815_v43, %v815_v43  ;;  %v1462_v57 = vadd.f32 %v1461_v42, %v1399_v39  ;;  %v816_v58 = vadd.f32 %v2243_v36, %v611_v49 }
 0x10a   :  { %v1775_v60 = vpack.c.bf16 %v818_v48, %v817_v47  ;;  %v1403_v15 = vmul.f32 %v818_v48, %v818_v48  ;;  %v2393_v17 = vadd.f32 %v2243_v36, %v739_v14  ;;  %v1855_v24 = vpack.c.bf16 %v2390_v13, %v2381_v6 }
 0x10b   :  { %v1463_v62 = vadd.f32 %v1462_v57, %v1400_v54  ;;  %v1770_v1 = vpack.c.bf16 %v816_v58, %v815_v43  ;;  %v1330_v2 = vadd.f32 %v1329_v52, %v816_v58  ;;  %v1401_v3 = vmul.f32 %v816_v58, %v816_v58 }
 0x10c   :  { %1895 = vst [vmem:[%s2606_s3 + $0x48] sm:$0xff] %v1775_v60   ;;  %v1850_v32 = vpack.c.bf16 %v2393_v17, %v2384_v7  ;;  %1911 = vst [vmem:[%s2606_s3 + $0xc8] sm:$0xff] %v1855_v24  }
 0x10d   :  { %1894 = vst [vmem:[%s2606_s3 + $0x40] sm:$0xff] %v1770_v1   ;;  %v1331_v10 = vadd.f32 %v1330_v2, %v817_v47  ;;  %v1464_v11 = vadd.f32 %v1463_v62, %v1401_v3  ;;  %v1984_v12 = vpop.f32.mrb[20].mxu0  ;;  %v2016_v40 = vpop.f32.mrb[20].mxu1 }
 0x10e   :  { %v624_v16 = vpop.f32.mrb[21].mxu0  ;;  %v821_v25 = vadd.f32 %v1984_v12, %v2243_v36  ;;  %1910 = vst [vmem:[%s2606_s3 + $0xc0] sm:$0xff] %v1850_v32   ;;  %v752_v46 = vpop.f32.mrb[21].mxu1  ;;  %v2413_v47 = vadd.f32 %v2016_v40, %v2243_v36 }
 0x10f   :  { %v1465_v18 = vadd.f32 %v1464_v11, %v1402_v9  ;;  %v819_v19 = vadd.f32 %v2243_v36, %v624_v16  ;;  %v1332_v22 = vadd.f32 %v1331_v10, %v818_v48  ;;  %v1985_v23 = vpop.f32.mrb[22].mxu0  ;;  %v2416_v48 = vadd.f32 %v2243_v36, %v752_v46  ;;  %v2017_v49 = vpop.f32.mrb[22].mxu1 }
 0x110   :  { %v822_v26 = vadd.f32 %v1985_v23, %v2243_v36  ;;  %v627_v30 = vpop.f32.mrb[23].mxu0  ;;  %v1406_v50 = vmul.f32 %v821_v25, %v821_v25  ;;  %v2422_v58 = vadd.f32 %v2017_v49, %v2243_v36  ;;  %v755_v60 = vpop.f32.mrb[23].mxu1 }
 0x111   :  { %v1333_v33 = vadd.f32 %v1332_v22, %v819_v19  ;;  %v1404_v34 = vmul.f32 %v819_v19, %v819_v19  ;;  %v1466_v35 = vadd.f32 %v1465_v18, %v1403_v15  ;;  %v820_v38 = vadd.f32 %v2243_v36, %v627_v30 }
 0x112   :  { %v1785_v39 = vpack.c.bf16 %v822_v26, %v821_v25  ;;  %v1407_v61 = vmul.f32 %v822_v26, %v822_v26  ;;  %v2425_v1 = vadd.f32 %v2243_v36, %v755_v60  ;;  %v1865_v9 = vpack.c.bf16 %v2422_v58, %v2413_v47 }
 0x113   :  { %v1467_v42 = vadd.f32 %v1466_v35, %v1404_v34  ;;  %v1780_v43 = vpack.c.bf16 %v820_v38, %v819_v19  ;;  %v1334_v44 = vadd.f32 %v1333_v33, %v820_v38  ;;  %v1405_v45 = vmul.f32 %v820_v38, %v820_v38 }
 0x114   :  { %1897 = vst [vmem:[%s2606_s3 + $0x58] sm:$0xff] %v1785_v39   ;;  %v1860_v14 = vpack.c.bf16 %v2425_v1, %v2416_v48  ;;  %1913 = vst [vmem:[%s2606_s3 + $0xd8] sm:$0xff] %v1865_v9  }
 0x115   :  { %1896 = vst [vmem:[%s2606_s3 + $0x50] sm:$0xff] %v1780_v43   ;;  %v1335_v52 = vadd.f32 %v1334_v44, %v821_v25  ;;  %v1468_v54 = vadd.f32 %v1467_v42, %v1405_v45  ;;  %v1988_v57 = vpop.f32.mrb[24].mxu0  ;;  %v2020_v23 = vpop.f32.mrb[24].mxu1 }
 0x116   :  { %v640_v62 = vpop.f32.mrb[25].mxu0  ;;  %v825_v10 = vadd.f32 %v1988_v57, %v2243_v36  ;;  %1912 = vst [vmem:[%s2606_s3 + $0xd0] sm:$0xff] %v1860_v14   ;;  %v768_v32 = vpop.f32.mrb[25].mxu1  ;;  %v2445_v33 = vadd.f32 %v2020_v23, %v2243_v36 }
 0x117   :  { %v1469_v2 = vadd.f32 %v1468_v54, %v1406_v50  ;;  %v823_v3 = vadd.f32 %v2243_v36, %v640_v62  ;;  %v1336_v5 = vadd.f32 %v1335_v52, %v822_v26  ;;  %v1989_v8 = vpop.f32.mrb[26].mxu0  ;;  %v2448_v34 = vadd.f32 %v2243_v36, %v768_v32  ;;  %v2021_v35 = vpop.f32.mrb[26].mxu1 }
 0x118   :  { %v826_v11 = vadd.f32 %v1989_v8, %v2243_v36  ;;  %v643_v12 = vpop.f32.mrb[27].mxu0  ;;  %v1410_v38 = vmul.f32 %v825_v10, %v825_v10  ;;  %v2454_v43 = vadd.f32 %v2021_v35, %v2243_v36  ;;  %v771_v44 = vpop.f32.mrb[27].mxu1 }
 0x119   :  { %v1337_v15 = vadd.f32 %v1336_v5, %v823_v3  ;;  %v1408_v16 = vmul.f32 %v823_v3, %v823_v3  ;;  %v1470_v18 = vadd.f32 %v1469_v2, %v1407_v61  ;;  %v824_v19 = vadd.f32 %v2243_v36, %v643_v12 }
 0x11a   :  { %v1795_v22 = vpack.c.bf16 %v826_v11, %v825_v10  ;;  %v1411_v45 = vmul.f32 %v826_v11, %v826_v11  ;;  %v2457_v49 = vadd.f32 %v2243_v36, %v771_v44  ;;  %v1875_v60 = vpack.c.bf16 %v2454_v43, %v2445_v33 }
 0x11b   :  { %v1471_v24 = vadd.f32 %v1470_v18, %v1408_v16  ;;  %v1790_v25 = vpack.c.bf16 %v824_v19, %v823_v3  ;;  %v1338_v26 = vadd.f32 %v1337_v15, %v824_v19  ;;  %v1409_v30 = vmul.f32 %v824_v19, %v824_v19 }
 0x11c   :  { %1899 = vst [vmem:[%s2606_s3 + $0x68] sm:$0xff] %v1795_v22   ;;  %v1870_v3 = vpack.c.bf16 %v2457_v49, %v2448_v34  ;;  %1915 = vst [vmem:[%s2606_s3 + $0xe8] sm:$0xff] %v1875_v60   ;;  %v1418_v60 = vmul.f32 %v2250_v51, %v2250_v51 }
 0x11d   :  { %1898 = vst [vmem:[%s2606_s3 + $0x60] sm:$0xff] %v1790_v25   ;;  %v1339_v39 = vadd.f32 %v1338_v26, %v825_v10  ;;  %v1472_v40 = vadd.f32 %v1471_v24, %v1409_v30  ;;  %v1992_v42 = vpop.f32.mrb[28].mxu0  ;;  %v2024_v12 = vpop.f32.mrb[28].mxu1 }
 0x11e   :  { %v656_v46 = vpop.f32.mrb[29].mxu0  ;;  %v829_v61 = vadd.f32 %v1992_v42, %v2243_v36  ;;  %1914 = vst [vmem:[%s2606_s3 + $0xe0] sm:$0xff] %v1870_v3   ;;  %v784_v19 = vpop.f32.mrb[29].mxu1  ;;  %v2477_v22 = vadd.f32 %v2024_v12, %v2243_v36 }
 0x11f   :  { %v1473_v50 = vadd.f32 %v1472_v40, %v1410_v38  ;;  %v827_v52 = vadd.f32 %v2243_v36, %v656_v46  ;;  %v1340_v54 = vadd.f32 %v1339_v39, %v826_v11  ;;  %v1993_v57 = vpop.f32.mrb[30].mxu0  ;;  %v2480_v23 = vadd.f32 %v2243_v36, %v784_v19  ;;  %v2025_v24 = vpop.f32.mrb[30].mxu1 }
 0x120   :  { %v830_v62 = vadd.f32 %v1993_v57, %v2243_v36  ;;  %v659_v2 = vpop.f32.mrb[31].mxu0  ;;  %v1414_v25 = vmul.f32 %v829_v61, %v829_v61  ;;  %v2486_v32 = vadd.f32 %v2025_v24, %v2243_v36  ;;  %v787_v35 = vpop.f32.mrb[31].mxu1  ;;  %v1416_v38 = vmul.f32 %v2256_v53, %v2256_v53 }
 0x121   :  { %v1341_v5 = vadd.f32 %v1340_v54, %v827_v52  ;;  %v1412_v8 = vmul.f32 %v827_v52, %v827_v52  ;;  %v1474_v9 = vadd.f32 %v1473_v50, %v1411_v45  ;;  %v828_v10 = vadd.f32 %v2243_v36, %v659_v2 }
 0x122   :  { %v1805_v11 = vpack.c.bf16 %v830_v62, %v829_v61  ;;  %v2491_v39 = vadd.f32 %v2243_v36, %v787_v35  ;;  %v1415_v40 = vmul.f32 %v830_v62, %v830_v62  ;;  %v1885_v45 = vpack.c.bf16 %v2486_v32, %v2477_v22 }
 0x123   :  { %v1475_v14 = vadd.f32 %v1474_v9, %v1412_v8  ;;  %v1800_v15 = vpack.c.bf16 %v828_v10, %v827_v52  ;;  %v1342_v16 = vadd.f32 %v1341_v5, %v828_v10  ;;  %v1413_v18 = vmul.f32 %v828_v10, %v828_v10 }
 0x124   :  { %1901 = vst [vmem:[%s2606_s3 + $0x78] sm:$0xff] %v1805_v11   ;;  %v1880_v46 = vpack.c.bf16 %v2491_v39, %v2480_v23  ;;  %1917 = vst [vmem:[%s2606_s3 + $0xf8] sm:$0xff] %v1885_v45   ;;  %v1417_v57 = vmul.f32 %v2265_v63, %v2265_v63  ;;  %v1420_v5 = vmul.f32 %v2288_v21, %v2288_v21 }
 0x125   :  { %1900 = vst [vmem:[%s2606_s3 + $0x70] sm:$0xff] %v1800_v15   ;;  %v1343_v26 = vadd.f32 %v1342_v16, %v829_v61  ;;  %v1476_v30 = vadd.f32 %v1475_v14, %v1413_v18  ;;  %v1421_v11 = vmul.f32 %v2297_v31, %v2297_v31  ;;  %v1429_v45 = vmul.f32 %v2361_v41, %v2361_v41 }
 0x126   :  { %1916 = vst [vmem:[%s2606_s3 + $0xf0] sm:$0xff] %v1880_v46  }
 0x127   :  { %v1477_v42 = vadd.f32 %v1476_v30, %v1414_v25  ;;  %v1344_v44 = vadd.f32 %v1343_v26, %v830_v62  ;;  %v1419_v62 = vmul.f32 %v2262_v59, %v2262_v59  ;;  %v1425_v25 = vmul.f32 %v2329_v4, %v2329_v4 }
 0x129   :  { %v1345_v50 = vadd.f32 %v1344_v44, %v2256_v53  ;;  %v1478_v52 = vadd.f32 %v1477_v42, %v1415_v40 }
 0x12b   :  { %v1479_v36 = vadd.f32 %v1478_v52, %v1416_v38  ;;  %v1346_v54 = vadd.f32 %v1345_v50, %v2265_v63 }
 0x12d   :  { %v1347_v53 = vadd.f32 %v1346_v54, %v2250_v51  ;;  %v1480_v61 = vadd.f32 %v1479_v36, %v1417_v57  ;;  %v1422_v51 = vmul.f32 %v2285_v20, %v2285_v20 }
 0x12f   :  { %v1481_v2 = vadd.f32 %v1480_v61, %v1418_v60  ;;  %v1348_v3 = vadd.f32 %v1347_v53, %v2262_v59  ;;  %v1423_v59 = vmul.f32 %v2294_v27, %v2294_v27  ;;  %v1433_v53 = vmul.f32 %v2393_v17, %v2393_v17 }
 0x131   :  { %v1349_v8 = vadd.f32 %v1348_v3, %v2288_v21  ;;  %v1482_v9 = vadd.f32 %v1481_v2, %v1419_v62  ;;  %v1424_v21 = vmul.f32 %v2320_v56, %v2320_v56 }
 0x133   :  { %v1483_v10 = vadd.f32 %v1482_v9, %v1420_v5  ;;  %v1350_v63 = vadd.f32 %v1349_v8, %v2297_v31 }
 0x135   :  { %v1351_v12 = vadd.f32 %v1350_v63, %v2285_v20  ;;  %v1484_v14 = vadd.f32 %v1483_v10, %v1421_v11  ;;  %v1426_v20 = vmul.f32 %v2317_v55, %v2317_v55  ;;  %v1437_v10 = vmul.f32 %v2425_v1, %v2425_v1 }
 0x137   :  { %v1485_v15 = vadd.f32 %v1484_v14, %v1422_v51  ;;  %v1352_v16 = vadd.f32 %v1351_v12, %v2294_v27  ;;  %v1427_v27 = vmul.f32 %v2326_v0, %v2326_v0 }
 0x139   :  { %v1353_v18 = vadd.f32 %v1352_v16, %v2320_v56  ;;  %v1486_v19 = vadd.f32 %v1485_v15, %v1423_v59  ;;  %v1428_v56 = vmul.f32 %v2352_v29, %v2352_v29  ;;  %v1441_v16 = vmul.f32 %v2457_v49, %v2457_v49 }
 0x13b   :  { %v1487_v24 = vadd.f32 %v1486_v19, %v1424_v21  ;;  %v1354_v31 = vadd.f32 %v1353_v18, %v2329_v4 }
 0x13d   :  { %v1355_v26 = vadd.f32 %v1354_v31, %v2317_v55  ;;  %v1488_v30 = vadd.f32 %v1487_v24, %v1425_v25  ;;  %v1430_v55 = vmul.f32 %v2349_v28, %v2349_v28 }
 0x13f   :  { %v1489_v35 = vadd.f32 %v1488_v30, %v1426_v20  ;;  %v1356_v38 = vadd.f32 %v1355_v26, %v2326_v0  ;;  %v1431_v0 = vmul.f32 %v2358_v37, %v2358_v37  ;;  %v1445_v26 = vmul.f32 %v2491_v39, %v2491_v39 }
 0x141   :  { %v1357_v40 = vadd.f32 %v1356_v38, %v2352_v29  ;;  %v1490_v42 = vadd.f32 %v1489_v35, %v1427_v27  ;;  %v1432_v29 = vmul.f32 %v2384_v7, %v2384_v7 }
 0x143   :  { %v1491_v44 = vadd.f32 %v1490_v42, %v1428_v56  ;;  %v1358_v4 = vadd.f32 %v1357_v40, %v2361_v41 }
 0x145   :  { %v1359_v46 = vadd.f32 %v1358_v4, %v2349_v28  ;;  %v1492_v50 = vadd.f32 %v1491_v44, %v1429_v45  ;;  %v1434_v28 = vmul.f32 %v2381_v6, %v2381_v6 }
 0x147   :  { %v1493_v52 = vadd.f32 %v1492_v50, %v1430_v55  ;;  %v1360_v36 = vadd.f32 %v1359_v46, %v2358_v37  ;;  %v1435_v37 = vmul.f32 %v2390_v13, %v2390_v13 }
 0x149   :  { %v1361_v54 = vadd.f32 %v1360_v36, %v2384_v7  ;;  %v1494_v57 = vadd.f32 %v1493_v52, %v1431_v0  ;;  %v1436_v7 = vmul.f32 %v2416_v48, %v2416_v48 }
 0x14b   :  { %v1495_v60 = vadd.f32 %v1494_v57, %v1432_v29  ;;  %v1362_v41 = vadd.f32 %v1361_v54, %v2393_v17 }
 0x14d   :  { %v1363_v61 = vadd.f32 %v1362_v41, %v2381_v6  ;;  %v1496_v62 = vadd.f32 %v1495_v60, %v1433_v53  ;;  %v1438_v6 = vmul.f32 %v2413_v47, %v2413_v47 }
 0x14f   :  { %v1497_v2 = vadd.f32 %v1496_v62, %v1434_v28  ;;  %v1364_v3 = vadd.f32 %v1363_v61, %v2390_v13  ;;  %v1439_v13 = vmul.f32 %v2422_v58, %v2422_v58 }
 0x151   :  { %v1365_v5 = vadd.f32 %v1364_v3, %v2416_v48  ;;  %v1498_v8 = vadd.f32 %v1497_v2, %v1435_v37  ;;  %v1440_v48 = vmul.f32 %v2448_v34, %v2448_v34 }
 0x153   :  { %v1499_v9 = vadd.f32 %v1498_v8, %v1436_v7  ;;  %v1366_v17 = vadd.f32 %v1365_v5, %v2425_v1 }
 0x155   :  { %v1367_v63 = vadd.f32 %v1366_v17, %v2413_v47  ;;  %v1500_v11 = vadd.f32 %v1499_v9, %v1437_v10  ;;  %v1442_v47 = vmul.f32 %v2445_v33, %v2445_v33 }
 0x157   :  { %v1501_v51 = vadd.f32 %v1500_v11, %v1438_v6  ;;  %v1368_v12 = vadd.f32 %v1367_v63, %v2422_v58  ;;  %v1443_v58 = vmul.f32 %v2454_v43, %v2454_v43 }
 0x159   :  { %v1369_v14 = vadd.f32 %v1368_v12, %v2448_v34  ;;  %v1502_v59 = vadd.f32 %v1501_v51, %v1439_v13  ;;  %v1444_v34 = vmul.f32 %v2480_v23, %v2480_v23 }
 0x15b   :  { %v1503_v15 = vadd.f32 %v1502_v59, %v1440_v48  ;;  %v1370_v1 = vadd.f32 %v1369_v14, %v2457_v49 }
 0x15d   :  { %v1371_v21 = vadd.f32 %v1370_v1, %v2445_v33  ;;  %v1504_v18 = vadd.f32 %v1503_v15, %v1441_v16  ;;  %v1446_v33 = vmul.f32 %v2477_v22, %v2477_v22 }
 0x15f   :  { %v1505_v19 = vadd.f32 %v1504_v18, %v1442_v47  ;;  %v1372_v24 = vadd.f32 %v1371_v21, %v2454_v43  ;;  %v1447_v43 = vmul.f32 %v2486_v32, %v2486_v32 }
 0x161   :  { %v1373_v31 = vadd.f32 %v1372_v24, %v2480_v23  ;;  %v1506_v25 = vadd.f32 %v1505_v19, %v1443_v58 }
 0x163   :  { %v1507_v20 = vadd.f32 %v1506_v25, %v1444_v34  ;;  %v1374_v49 = vadd.f32 %v1373_v31, %v2491_v39 }
 0x165   :  { %v1375_v30 = vadd.f32 %v1374_v49, %v2477_v22  ;;  %v1508_v27 = vadd.f32 %v1507_v20, %v1445_v26 }
 0x167   :  { %v1376_v35 = vadd.f32 %v1375_v30, %v2486_v32  ;;  %v1509_v38 = vadd.f32 %v1508_v27, %v1446_v33 }
 0x169   :  { %v1377_v23 = vrot.slane %v1376_v35, 4  ;;  %v1510_v56 = vadd.f32 %v1509_v38, %v1447_v43 }
 0x16b   :  { %v1378_v40 = vadd.f32 %v1377_v23, %v1376_v35  ;;  %v1511_v42 = vrot.slane %v1510_v56, 4 }
 0x16d   :  { %v1379_v44 = vrot.slane %v1378_v40, 2  ;;  %v1512_v4 = vadd.f32 %v1511_v42, %v1510_v56 }
 0x16f   :  { %v1380_v45 = vadd.f32 %v1379_v44, %v1378_v40  ;;  %v1513_v39 = vrot.slane %v1512_v4, 2 }
 0x171   :  { %v1381_v55 = vrot.slane %v1380_v45, 1  ;;  %v1514_v46 = vadd.f32 %v1513_v39, %v1512_v4 }
 0x173   :  { %v1382_v50 = vadd.f32 %v1381_v55, %v1380_v45  ;;  %v1515_v0 = vrot.slane %v1514_v46, 1 }
 0x175   :  { %1383 = vst [vmem:[%s2607_s4] sm:$0x1] %v1382_v50  ;;  %v1516_v22 = vadd.f32 %v1515_v0, %v1514_v46 }
 0x177   :  { %1517 = vst [vmem:[%s2608_s5] sm:$0x1] %v1516_v22 }

// kernel: generator_forward.37
= control target key start
LH: loop header
LB: loop body
LE: loop exit
PB: predicated region body
PF: predicated region fallthrough
CT: control target
= control target key end

     0   :  { %s2672_s12 = smov 0   ;;  %s2674_s13 = smov 0   ;;  %s3120_s0 = inlined_call_operand.vmem [shape: bf16[2048,128], index: 0, kind: input, shape index: {}]   ;;  %s3121_s1 = inlined_call_operand.vmem [shape: f32[1,128], index: 1, kind: input, shape index: {}]   ;;  %s3122_s2 = inlined_call_operand.vmem [shape: f32[1,128], index: 2, kind: input, shape index: {}]   ;;  %s3123_s3 = inlined_call_operand.vmem [shape: bf16[2048,128], index: 3, kind: output, shape index: {}]  }
   0x1   :  { %s2676_s14 = smov 0  }
   0x2 LB: > { %s25_s15 = sadd.s32 1, %s2646_s13  ;;  %p1635_p0 = scmp.ge.s32.totalorder %s2650_s14, 1  ;;  %s2650_s14 = sphi %s2676_s14, %s13_s14   ;;  %s2646_s13 = sphi %s2674_s13, %s3125_s13   ;;  %s2642_s12 = sphi %s2672_s12, %s3124_s12  }
   0x3   : > { %p27_p1 = scmp.ge.s32.totalorder %s25_s15, 2  ;;  %p173_p2 = scmp.lt.s32.totalorder %s2650_s14, 3 }
   0x5   : > { %s3127_s15 = smov (%p27_p1, %s25_s15), 0  ;;  %p174_p3 = pnand %p1635_p0, %p173_p2 }
   0x6   : > { %s1636_s16 = sshll.u32 (!%p174_p3), %s2642_s12, 7  ;;  %v2703_v0 = vld [vmem:[%s3121_s1] ss:$0 sm:$0xff] (!%p174_p3) }
   0x7   : > { %177 = sbr.rel (%p174_p3) target bundleno = 168 (0xa8), region = 32  ;;  %p210_p4 = scmp.lt.s32.totalorder (!%p174_p3), %s1636_s16, 255  ;;  %v2712_v9 = vld [vmem:[%s3122_s2] ss:$0 sm:$0xff] (!%p174_p3) }
   0xe   : > { %s3129_s16 = smov (!%p210_p4, %s1636_s16), 255 }
   0xf   : > { %s1637_s17 = sshll.u32 %s3129_s16, 2 }
  0x10   : > { %s2698_s20 = scalar_lea.vmem %s3120_s0, %s1637_s17  ;;  %s2737_s27 = scalar_lea.vmem %s3123_s3, %s1637_s17 }
  0x11   : > { %v1901_v1 = vld [vmem:[%s2698_s20] sm:$0xff]   ;;  %v2476_v2 = vld [vmem:[%s2698_s20 + $0x8] sm:$0xff]   ;;  %v2477_v3 = vld [vmem:[%s2698_s20 + $0x10] sm:$0xff]  }
  0x12   : > { %v1902_v4 = vunpack.c.l.bf16 %v1901_v1  ;;  %v1903_v5 = vunpack.c.h.bf16 %v1901_v1  ;;  %v1906_v6 = vunpack.c.l.bf16 %v2476_v2  ;;  %v1907_v7 = vunpack.c.h.bf16 %v2476_v2  ;;  %v2478_v8 = vld [vmem:[%s2698_s20 + $0x18] sm:$0xff]   ;;  %v2479_v30 = vld [vmem:[%s2698_s20 + $0x20] sm:$0xff]   ;;  %v2480_v35 = vld [vmem:[%s2698_s20 + $0x28] sm:$0xff]  }
  0x13   : > { %v1910_v10 = vunpack.c.l.bf16 %v2477_v3  ;;  %v1911_v11 = vunpack.c.h.bf16 %v2477_v3  ;;  %v1914_v12 = vunpack.c.l.bf16 %v2478_v8  ;;  %v1915_v13 = vunpack.c.h.bf16 %v2478_v8  ;;  %v2481_v40 = vld [vmem:[%s2698_s20 + $0x30] sm:$0xff]   ;;  %v2482_v45 = vld [vmem:[%s2698_s20 + $0x38] sm:$0xff]   ;;  %v2483_v3 = vld [vmem:[%s2698_s20 + $0x40] sm:$0xff]  }
  0x14   : > { %v496_v14 = vmul.f32 %v1902_v4, %v2703_v0  ;;  %v497_v15 = vmul.f32 %v1903_v5, %v2703_v0  ;;  %v498_v16 = vmul.f32 %v1906_v6, %v2703_v0  ;;  %v499_v17 = vmul.f32 %v1907_v7, %v2703_v0 }
  0x15   : > { %v500_v18 = vmul.f32 %v1910_v10, %v2703_v0  ;;  %v501_v19 = vmul.f32 %v1911_v11, %v2703_v0  ;;  %v502_v20 = vmul.f32 %v1914_v12, %v2703_v0  ;;  %v503_v21 = vmul.f32 %v1915_v13, %v2703_v0  ;;  %v2484_v13 = vld [vmem:[%s2698_s20 + $0x48] sm:$0xff]  }
  0x16   : > { %v631_v22 = vadd.f32 %v2712_v9, %v496_v14  ;;  %v632_v23 = vadd.f32 %v2712_v9, %v497_v15  ;;  %v633_v24 = vadd.f32 %v2712_v9, %v498_v16  ;;  %v634_v25 = vadd.f32 %v2712_v9, %v499_v17 }
  0x17   : > { %v635_v26 = vadd.f32 %v2712_v9, %v500_v18  ;;  %v636_v27 = vadd.f32 %v2712_v9, %v501_v19  ;;  %v637_v28 = vadd.f32 %v2712_v9, %v502_v20  ;;  %v638_v29 = vadd.f32 %v2712_v9, %v503_v21  ;;  %v2485_v18 = vld [vmem:[%s2698_s20 + $0x50] sm:$0xff]  }
  0x18   : > { %v759_v31 = vmax.f32 %v631_v22, 0.0  ;;  %v760_v32 = vmax.f32 %v632_v23, 0.0  ;;  %v761_v33 = vmax.f32 %v633_v24, 0.0  ;;  %v762_v34 = vmax.f32 %v634_v25, 0.0  ;;  %v2486_v23 = vld [vmem:[%s2698_s20 + $0x58] sm:$0xff]  }
  0x19   : > { %v763_v36 = vmax.f32 %v635_v26, 0.0  ;;  %v764_v37 = vmax.f32 %v636_v27, 0.0  ;;  %v765_v38 = vmax.f32 %v637_v28, 0.0  ;;  %v766_v39 = vmax.f32 %v638_v29, 0.0 }
  0x1a   : > { %v2159_v41 = vpack.c.bf16 %v760_v32, %v759_v31  ;;  %v2164_v42 = vpack.c.bf16 %v762_v34, %v761_v33  ;;  %v1918_v43 = vunpack.c.l.bf16 %v2479_v30  ;;  %v1919_v44 = vunpack.c.h.bf16 %v2479_v30 }
  0x1b   : > { %v2169_v46 = vpack.c.bf16 %v764_v37, %v763_v36  ;;  %v2174_v47 = vpack.c.bf16 %v766_v39, %v765_v38  ;;  %v1922_v48 = vunpack.c.l.bf16 %v2480_v35  ;;  %v1923_v49 = vunpack.c.h.bf16 %v2480_v35 }
  0x1c   : > { %2160 = vst [vmem:[%s2737_s27] sm:$0xff] %v2159_v41   ;;  %2539 = vst [vmem:[%s2737_s27 + $0x8] sm:$0xff] %v2164_v42   ;;  %v504_v50 = vmul.f32 %v1918_v43, %v2703_v0  ;;  %v505_v51 = vmul.f32 %v1919_v44, %v2703_v0  ;;  %v1926_v52 = vunpack.c.l.bf16 %v2481_v40  ;;  %v1927_v53 = vunpack.c.h.bf16 %v2481_v40  ;;  %v2487_v40 = vld [vmem:[%s2698_s20 + $0x60] sm:$0xff]  }
  0x1d   : > { %2540 = vst [vmem:[%s2737_s27 + $0x10] sm:$0xff] %v2169_v46   ;;  %2541 = vst [vmem:[%s2737_s27 + $0x18] sm:$0xff] %v2174_v47   ;;  %v506_v54 = vmul.f32 %v1922_v48, %v2703_v0  ;;  %v507_v55 = vmul.f32 %v1923_v49, %v2703_v0  ;;  %v1930_v56 = vunpack.c.l.bf16 %v2482_v45  ;;  %v1931_v57 = vunpack.c.h.bf16 %v2482_v45 }
  0x1e   : > { %v639_v58 = vadd.f32 %v2712_v9, %v504_v50  ;;  %v640_v59 = vadd.f32 %v2712_v9, %v505_v51  ;;  %v508_v60 = vmul.f32 %v1926_v52, %v2703_v0  ;;  %v509_v61 = vmul.f32 %v1927_v53, %v2703_v0  ;;  %v2488_v53 = vld [vmem:[%s2698_s20 + $0x68] sm:$0xff]  }
  0x1f   : > { %v641_v62 = vadd.f32 %v2712_v9, %v506_v54  ;;  %v642_v63 = vadd.f32 %v2712_v9, %v507_v55  ;;  %v510_v1 = vmul.f32 %v1930_v56, %v2703_v0  ;;  %v511_v2 = vmul.f32 %v1931_v57, %v2703_v0 }
  0x20   : > { %v767_v4 = vmax.f32 %v639_v58, 0.0  ;;  %v768_v5 = vmax.f32 %v640_v59, 0.0  ;;  %v643_v6 = vadd.f32 %v2712_v9, %v508_v60  ;;  %v644_v7 = vadd.f32 %v2712_v9, %v509_v61  ;;  %v2489_v58 = vld [vmem:[%s2698_s20 + $0x70] sm:$0xff]  }
  0x21   : > { %v769_v8 = vmax.f32 %v641_v62, 0.0  ;;  %v770_v10 = vmax.f32 %v642_v63, 0.0  ;;  %v645_v11 = vadd.f32 %v2712_v9, %v510_v1  ;;  %v646_v12 = vadd.f32 %v2712_v9, %v511_v2  ;;  %v2490_v63 = vld [vmem:[%s2698_s20 + $0x78] sm:$0xff]  }
  0x22   : > { %v2179_v14 = vpack.c.bf16 %v768_v5, %v767_v4  ;;  %v771_v15 = vmax.f32 %v643_v6, 0.0  ;;  %v772_v16 = vmax.f32 %v644_v7, 0.0  ;;  %v1934_v17 = vunpack.c.l.bf16 %v2483_v3 }
  0x23   : > { %v2184_v19 = vpack.c.bf16 %v770_v10, %v769_v8  ;;  %v773_v20 = vmax.f32 %v645_v11, 0.0  ;;  %v774_v21 = vmax.f32 %v646_v12, 0.0  ;;  %v1935_v22 = vunpack.c.h.bf16 %v2483_v3 }
  0x24   : > { %2542 = vst [vmem:[%s2737_s27 + $0x20] sm:$0xff] %v2179_v14   ;;  %v2189_v24 = vpack.c.bf16 %v772_v16, %v771_v15  ;;  %v512_v25 = vmul.f32 %v1934_v17, %v2703_v0  ;;  %v1938_v26 = vunpack.c.l.bf16 %v2484_v13  ;;  %v1939_v27 = vunpack.c.h.bf16 %v2484_v13  ;;  %v2491_v14 = vld [vmem:[%s2698_s20 + $0x80] sm:$0xff]  }
  0x25   : > { %2543 = vst [vmem:[%s2737_s27 + $0x28] sm:$0xff] %v2184_v19   ;;  %v2194_v28 = vpack.c.bf16 %v774_v21, %v773_v20  ;;  %v513_v29 = vmul.f32 %v1935_v22, %v2703_v0  ;;  %v1942_v30 = vunpack.c.l.bf16 %v2485_v18  ;;  %v1943_v31 = vunpack.c.h.bf16 %v2485_v18 }
  0x26   : > { %2544 = vst [vmem:[%s2737_s27 + $0x30] sm:$0xff] %v2189_v24   ;;  %v647_v32 = vadd.f32 %v2712_v9, %v512_v25  ;;  %v514_v33 = vmul.f32 %v1938_v26, %v2703_v0  ;;  %v515_v34 = vmul.f32 %v1939_v27, %v2703_v0  ;;  %v1946_v35 = vunpack.c.l.bf16 %v2486_v23 }
  0x27   : > { %2545 = vst [vmem:[%s2737_s27 + $0x38] sm:$0xff] %v2194_v28   ;;  %v648_v36 = vadd.f32 %v2712_v9, %v513_v29  ;;  %v516_v37 = vmul.f32 %v1942_v30, %v2703_v0  ;;  %v517_v38 = vmul.f32 %v1943_v31, %v2703_v0  ;;  %v1947_v39 = vunpack.c.h.bf16 %v2486_v23  ;;  %v2492_v31 = vld [vmem:[%s2698_s20 + $0x88] sm:$0xff]  }
  0x28   : > { %v775_v41 = vmax.f32 %v647_v32, 0.0  ;;  %v649_v42 = vadd.f32 %v2712_v9, %v514_v33  ;;  %v650_v43 = vadd.f32 %v2712_v9, %v515_v34  ;;  %v518_v44 = vmul.f32 %v1946_v35, %v2703_v0 }
  0x29   : > { %v776_v45 = vmax.f32 %v648_v36, 0.0  ;;  %v651_v46 = vadd.f32 %v2712_v9, %v516_v37  ;;  %v652_v47 = vadd.f32 %v2712_v9, %v517_v38  ;;  %v519_v48 = vmul.f32 %v1947_v39, %v2703_v0  ;;  %v2493_v36 = vld [vmem:[%s2698_s20 + $0x90] sm:$0xff]  }
  0x2a   : > { %v777_v49 = vmax.f32 %v649_v42, 0.0  ;;  %v778_v50 = vmax.f32 %v650_v43, 0.0  ;;  %v653_v51 = vadd.f32 %v2712_v9, %v518_v44  ;;  %v1950_v52 = vunpack.c.l.bf16 %v2487_v40 }
  0x2b   : > { %v2199_v54 = vpack.c.bf16 %v776_v45, %v775_v41  ;;  %v779_v55 = vmax.f32 %v651_v46, 0.0  ;;  %v780_v56 = vmax.f32 %v652_v47, 0.0  ;;  %v654_v57 = vadd.f32 %v2712_v9, %v519_v48  ;;  %v2494_v41 = vld [vmem:[%s2698_s20 + $0x98] sm:$0xff]  }
  0x2c   : > { %v2204_v59 = vpack.c.bf16 %v778_v50, %v777_v49  ;;  %v781_v60 = vmax.f32 %v653_v51, 0.0  ;;  %v1951_v61 = vunpack.c.h.bf16 %v2487_v40  ;;  %v520_v62 = vmul.f32 %v1950_v52, %v2703_v0 }
  0x2d   : > { %2546 = vst [vmem:[%s2737_s27 + $0x40] sm:$0xff] %v2199_v54   ;;  %v2209_v1 = vpack.c.bf16 %v780_v56, %v779_v55  ;;  %v782_v2 = vmax.f32 %v654_v57, 0.0  ;;  %v1954_v3 = vunpack.c.l.bf16 %v2488_v53  ;;  %v1955_v4 = vunpack.c.h.bf16 %v2488_v53  ;;  %v2495_v54 = vld [vmem:[%s2698_s20 + $0xa0] sm:$0xff]  }
  0x2e   : > { %2547 = vst [vmem:[%s2737_s27 + $0x48] sm:$0xff] %v2204_v59   ;;  %v521_v5 = vmul.f32 %v1951_v61, %v2703_v0  ;;  %v655_v6 = vadd.f32 %v2712_v9, %v520_v62  ;;  %v1958_v7 = vunpack.c.l.bf16 %v2489_v58  ;;  %v1959_v8 = vunpack.c.h.bf16 %v2489_v58 }
  0x2f   : > { %2548 = vst [vmem:[%s2737_s27 + $0x50] sm:$0xff] %v2209_v1   ;;  %v2214_v10 = vpack.c.bf16 %v782_v2, %v781_v60  ;;  %v522_v11 = vmul.f32 %v1954_v3, %v2703_v0  ;;  %v523_v12 = vmul.f32 %v1955_v4, %v2703_v0  ;;  %v1962_v13 = vunpack.c.l.bf16 %v2490_v63  ;;  %v2496_v4 = vld [vmem:[%s2698_s20 + $0xa8] sm:$0xff]  }
  0x30   : > { %v656_v15 = vadd.f32 %v2712_v9, %v521_v5  ;;  %v783_v16 = vmax.f32 %v655_v6, 0.0  ;;  %v524_v17 = vmul.f32 %v1958_v7, %v2703_v0  ;;  %v525_v18 = vmul.f32 %v1959_v8, %v2703_v0 }
  0x31   : > { %2549 = vst [vmem:[%s2737_s27 + $0x58] sm:$0xff] %v2214_v10   ;;  %v657_v19 = vadd.f32 %v2712_v9, %v522_v11  ;;  %v658_v20 = vadd.f32 %v2712_v9, %v523_v12  ;;  %v1963_v21 = vunpack.c.h.bf16 %v2490_v63  ;;  %v526_v22 = vmul.f32 %v1962_v13, %v2703_v0 }
  0x32   : > { %v784_v23 = vmax.f32 %v656_v15, 0.0  ;;  %v659_v24 = vadd.f32 %v2712_v9, %v524_v17  ;;  %v660_v25 = vadd.f32 %v2712_v9, %v525_v18  ;;  %v1966_v26 = vunpack.c.l.bf16 %v2491_v14 }
  0x33   : > { %v785_v27 = vmax.f32 %v657_v19, 0.0  ;;  %v786_v28 = vmax.f32 %v658_v20, 0.0  ;;  %v527_v29 = vmul.f32 %v1963_v21, %v2703_v0  ;;  %v661_v30 = vadd.f32 %v2712_v9, %v526_v22  ;;  %v2498_v19 = vld [vmem:[%s2698_s20 + $0xb8] sm:$0xff]  }
  0x34   : > { %v2219_v32 = vpack.c.bf16 %v784_v23, %v783_v16  ;;  %v787_v33 = vmax.f32 %v659_v24, 0.0  ;;  %v788_v34 = vmax.f32 %v660_v25, 0.0  ;;  %v1967_v35 = vunpack.c.h.bf16 %v2491_v14  ;;  %v2497_v14 = vld [vmem:[%s2698_s20 + $0xb0] sm:$0xff]  }
  0x35   : > { %v2224_v37 = vpack.c.bf16 %v786_v28, %v785_v27  ;;  %v662_v38 = vadd.f32 %v2712_v9, %v527_v29  ;;  %v789_v39 = vmax.f32 %v661_v30, 0.0  ;;  %v528_v40 = vmul.f32 %v1966_v26, %v2703_v0 }
  0x36   : > { %2550 = vst [vmem:[%s2737_s27 + $0x60] sm:$0xff] %v2219_v32   ;;  %v2229_v42 = vpack.c.bf16 %v788_v34, %v787_v33  ;;  %v529_v43 = vmul.f32 %v1967_v35, %v2703_v0  ;;  %v1970_v44 = vunpack.c.l.bf16 %v2492_v31  ;;  %v1971_v45 = vunpack.c.h.bf16 %v2492_v31  ;;  %v2499_v32 = vld [vmem:[%s2698_s20 + $0xc0] sm:$0xff]  }
  0x37   : > { %2551 = vst [vmem:[%s2737_s27 + $0x68] sm:$0xff] %v2224_v37   ;;  %v790_v46 = vmax.f32 %v662_v38, 0.0  ;;  %v663_v47 = vadd.f32 %v2712_v9, %v528_v40  ;;  %v1974_v48 = vunpack.c.l.bf16 %v2493_v36  ;;  %v1975_v49 = vunpack.c.h.bf16 %v2493_v36 }
  0x38   : > { %2552 = vst [vmem:[%s2737_s27 + $0x70] sm:$0xff] %v2229_v42   ;;  %v664_v50 = vadd.f32 %v2712_v9, %v529_v43  ;;  %v530_v51 = vmul.f32 %v1970_v44, %v2703_v0  ;;  %v531_v52 = vmul.f32 %v1971_v45, %v2703_v0  ;;  %v1978_v53 = vunpack.c.l.bf16 %v2494_v41  ;;  %v2500_v45 = vld [vmem:[%s2698_s20 + $0xc8] sm:$0xff]  }
  0x39   : > { %v2234_v55 = vpack.c.bf16 %v790_v46, %v789_v39  ;;  %v791_v56 = vmax.f32 %v663_v47, 0.0  ;;  %v532_v57 = vmul.f32 %v1974_v48, %v2703_v0  ;;  %v533_v58 = vmul.f32 %v1975_v49, %v2703_v0 }
  0x3a   : > { %v792_v59 = vmax.f32 %v664_v50, 0.0  ;;  %v665_v60 = vadd.f32 %v2712_v9, %v530_v51  ;;  %v666_v61 = vadd.f32 %v2712_v9, %v531_v52  ;;  %v1979_v62 = vunpack.c.h.bf16 %v2494_v41 }
  0x3b   : > { %2553 = vst [vmem:[%s2737_s27 + $0x78] sm:$0xff] %v2234_v55   ;;  %v667_v63 = vadd.f32 %v2712_v9, %v532_v57  ;;  %v668_v1 = vadd.f32 %v2712_v9, %v533_v58  ;;  %v534_v2 = vmul.f32 %v1978_v53, %v2703_v0  ;;  %v1982_v3 = vunpack.c.l.bf16 %v2495_v54 }
  0x3c   : > { %v2239_v5 = vpack.c.bf16 %v792_v59, %v791_v56  ;;  %v793_v6 = vmax.f32 %v665_v60, 0.0  ;;  %v794_v7 = vmax.f32 %v666_v61, 0.0  ;;  %v535_v8 = vmul.f32 %v1979_v62, %v2703_v0 }
  0x3d   : > { %v795_v10 = vmax.f32 %v667_v63, 0.0  ;;  %v796_v11 = vmax.f32 %v668_v1, 0.0  ;;  %v669_v12 = vadd.f32 %v2712_v9, %v534_v2  ;;  %v1983_v13 = vunpack.c.h.bf16 %v2495_v54  ;;  %v2501_v54 = vld [vmem:[%s2698_s20 + $0xd0] sm:$0xff]   ;;  %v2502_v63 = vld [vmem:[%s2698_s20 + $0xd8] sm:$0xff]  }
  0x3e   : > { %2554 = vst [vmem:[%s2737_s27 + $0x80] sm:$0xff] %v2239_v5   ;;  %v2244_v15 = vpack.c.bf16 %v794_v7, %v793_v6  ;;  %v670_v16 = vadd.f32 %v2712_v9, %v535_v8  ;;  %v536_v17 = vmul.f32 %v1982_v3, %v2703_v0  ;;  %v1986_v18 = vunpack.c.l.bf16 %v2496_v4 }
  0x3f   : > { %v2249_v20 = vpack.c.bf16 %v796_v11, %v795_v10  ;;  %v797_v21 = vmax.f32 %v669_v12, 0.0  ;;  %v537_v22 = vmul.f32 %v1983_v13, %v2703_v0  ;;  %v1987_v23 = vunpack.c.h.bf16 %v2496_v4  ;;  %v2503_v10 = vld [vmem:[%s2698_s20 + $0xe0] sm:$0xff]  }
  0x40   : > { %2555 = vst [vmem:[%s2737_s27 + $0x88] sm:$0xff] %v2244_v15   ;;  %v798_v24 = vmax.f32 %v670_v16, 0.0  ;;  %v671_v25 = vadd.f32 %v2712_v9, %v536_v17  ;;  %v538_v26 = vmul.f32 %v1986_v18, %v2703_v0  ;;  %v1990_v27 = vunpack.c.l.bf16 %v2497_v14 }
  0x41   : > { %2556 = vst [vmem:[%s2737_s27 + $0x90] sm:$0xff] %v2249_v20   ;;  %v672_v28 = vadd.f32 %v2712_v9, %v537_v22  ;;  %v539_v29 = vmul.f32 %v1987_v23, %v2703_v0  ;;  %v1991_v30 = vunpack.c.h.bf16 %v2497_v14  ;;  %v1994_v31 = vunpack.c.l.bf16 %v2498_v19  ;;  %v2504_v23 = vld [vmem:[%s2698_s20 + $0xe8] sm:$0xff]  }
  0x42   : > { %v2254_v33 = vpack.c.bf16 %v798_v24, %v797_v21  ;;  %v799_v34 = vmax.f32 %v671_v25, 0.0  ;;  %v673_v35 = vadd.f32 %v2712_v9, %v538_v26  ;;  %v540_v36 = vmul.f32 %v1990_v27, %v2703_v0 }
  0x43   : > { %v800_v37 = vmax.f32 %v672_v28, 0.0  ;;  %v674_v38 = vadd.f32 %v2712_v9, %v539_v29  ;;  %v541_v39 = vmul.f32 %v1991_v30, %v2703_v0  ;;  %v1995_v40 = vunpack.c.h.bf16 %v2498_v19 }
  0x44   : > { %2557 = vst [vmem:[%s2737_s27 + $0x98] sm:$0xff] %v2254_v33   ;;  %v801_v41 = vmax.f32 %v673_v35, 0.0  ;;  %v675_v42 = vadd.f32 %v2712_v9, %v540_v36  ;;  %v542_v43 = vmul.f32 %v1994_v31, %v2703_v0  ;;  %v1998_v44 = vunpack.c.l.bf16 %v2499_v32 }
  0x45   : > { %v2259_v46 = vpack.c.bf16 %v800_v37, %v799_v34  ;;  %v802_v47 = vmax.f32 %v674_v38, 0.0  ;;  %v676_v48 = vadd.f32 %v2712_v9, %v541_v39  ;;  %v543_v49 = vmul.f32 %v1995_v40, %v2703_v0 }
  0x46   : > { %v803_v50 = vmax.f32 %v675_v42, 0.0  ;;  %v677_v51 = vadd.f32 %v2712_v9, %v542_v43  ;;  %v1999_v52 = vunpack.c.h.bf16 %v2499_v32  ;;  %v544_v53 = vmul.f32 %v1998_v44, %v2703_v0  ;;  %v2505_v32 = vld [vmem:[%s2698_s20 + $0xf0] sm:$0xff]  }
  0x47   : > { %2558 = vst [vmem:[%s2737_s27 + $0xa0] sm:$0xff] %v2259_v46   ;;  %v2264_v55 = vpack.c.bf16 %v802_v47, %v801_v41  ;;  %v804_v56 = vmax.f32 %v676_v48, 0.0  ;;  %v678_v57 = vadd.f32 %v2712_v9, %v543_v49  ;;  %v2002_v58 = vunpack.c.l.bf16 %v2500_v45  ;;  %v2506_v41 = vld [vmem:[%s2698_s20 + $0xf8] sm:$0xff]  }
  0x48   : > { %v805_v59 = vmax.f32 %v677_v51, 0.0  ;;  %v545_v60 = vmul.f32 %v1999_v52, %v2703_v0  ;;  %v679_v61 = vadd.f32 %v2712_v9, %v544_v53  ;;  %v2003_v62 = vunpack.c.h.bf16 %v2500_v45 }
  0x49   : > { %2559 = vst [vmem:[%s2737_s27 + $0xa8] sm:$0xff] %v2264_v55   ;;  %v2269_v1 = vpack.c.bf16 %v804_v56, %v803_v50  ;;  %v806_v2 = vmax.f32 %v678_v57, 0.0  ;;  %v546_v3 = vmul.f32 %v2002_v58, %v2703_v0  ;;  %v2006_v4 = vunpack.c.l.bf16 %v2501_v54  ;;  %v2507_v50 = vld [vmem:[%s2698_s20 + $0x100] sm:$0xff]  }
  0x4a   : > { %v680_v5 = vadd.f32 %v2712_v9, %v545_v60  ;;  %v807_v6 = vmax.f32 %v679_v61, 0.0  ;;  %v547_v7 = vmul.f32 %v2003_v62, %v2703_v0  ;;  %v2007_v8 = vunpack.c.h.bf16 %v2501_v54 }
  0x4b   : > { %2560 = vst [vmem:[%s2737_s27 + $0xb0] sm:$0xff] %v2269_v1   ;;  %v2274_v11 = vpack.c.bf16 %v806_v2, %v805_v59  ;;  %v681_v12 = vadd.f32 %v2712_v9, %v546_v3  ;;  %v548_v13 = vmul.f32 %v2006_v4, %v2703_v0  ;;  %v2010_v14 = vunpack.c.l.bf16 %v2502_v63 }
  0x4c   : > { %v808_v15 = vmax.f32 %v680_v5, 0.0  ;;  %v682_v16 = vadd.f32 %v2712_v9, %v547_v7  ;;  %v549_v17 = vmul.f32 %v2007_v8, %v2703_v0  ;;  %v2011_v18 = vunpack.c.h.bf16 %v2502_v63  ;;  %v2508_v63 = vld [vmem:[%s2698_s20 + $0x108] sm:$0xff]  }
  0x4d   : > { %2561 = vst [vmem:[%s2737_s27 + $0xb8] sm:$0xff] %v2274_v11   ;;  %v809_v19 = vmax.f32 %v681_v12, 0.0  ;;  %v683_v20 = vadd.f32 %v2712_v9, %v548_v13  ;;  %v550_v21 = vmul.f32 %v2010_v14, %v2703_v0  ;;  %v2014_v22 = vunpack.c.l.bf16 %v2503_v10 }
  0x4e   : > { %v2279_v24 = vpack.c.bf16 %v808_v15, %v807_v6  ;;  %v810_v25 = vmax.f32 %v682_v16, 0.0  ;;  %v684_v26 = vadd.f32 %v2712_v9, %v549_v17  ;;  %v551_v27 = vmul.f32 %v2011_v18, %v2703_v0 }
  0x4f   : > { %v811_v28 = vmax.f32 %v683_v20, 0.0  ;;  %v685_v29 = vadd.f32 %v2712_v9, %v550_v21  ;;  %v2015_v30 = vunpack.c.h.bf16 %v2503_v10  ;;  %v552_v31 = vmul.f32 %v2014_v22, %v2703_v0  ;;  %v2509_v10 = vld [vmem:[%s2698_s20 + $0x110] sm:$0xff]  }
  0x50   : > { %2562 = vst [vmem:[%s2737_s27 + $0xc0] sm:$0xff] %v2279_v24   ;;  %v2284_v33 = vpack.c.bf16 %v810_v25, %v809_v19  ;;  %v812_v34 = vmax.f32 %v684_v26, 0.0  ;;  %v686_v35 = vadd.f32 %v2712_v9, %v551_v27  ;;  %v2018_v36 = vunpack.c.l.bf16 %v2504_v23  ;;  %v2510_v19 = vld [vmem:[%s2698_s20 + $0x118] sm:$0xff]  }
  0x51   : > { %v813_v37 = vmax.f32 %v685_v29, 0.0  ;;  %v553_v38 = vmul.f32 %v2015_v30, %v2703_v0  ;;  %v687_v39 = vadd.f32 %v2712_v9, %v552_v31  ;;  %v2019_v40 = vunpack.c.h.bf16 %v2504_v23 }
  0x52   : > { %2563 = vst [vmem:[%s2737_s27 + $0xc8] sm:$0xff] %v2284_v33   ;;  %v2289_v42 = vpack.c.bf16 %v812_v34, %v811_v28  ;;  %v814_v43 = vmax.f32 %v686_v35, 0.0  ;;  %v554_v44 = vmul.f32 %v2018_v36, %v2703_v0  ;;  %v2022_v45 = vunpack.c.l.bf16 %v2505_v32  ;;  %v2511_v28 = vld [vmem:[%s2698_s20 + $0x120] sm:$0xff]  }
  0x53   : > { %v688_v46 = vadd.f32 %v2712_v9, %v553_v38  ;;  %v815_v47 = vmax.f32 %v687_v39, 0.0  ;;  %v555_v48 = vmul.f32 %v2019_v40, %v2703_v0  ;;  %v2023_v49 = vunpack.c.h.bf16 %v2505_v32 }
  0x54   : > { %2564 = vst [vmem:[%s2737_s27 + $0xd0] sm:$0xff] %v2289_v42   ;;  %v2294_v51 = vpack.c.bf16 %v814_v43, %v813_v37  ;;  %v689_v52 = vadd.f32 %v2712_v9, %v554_v44  ;;  %v556_v53 = vmul.f32 %v2022_v45, %v2703_v0  ;;  %v2026_v54 = vunpack.c.l.bf16 %v2506_v41 }
  0x55   : > { %v816_v55 = vmax.f32 %v688_v46, 0.0  ;;  %v690_v56 = vadd.f32 %v2712_v9, %v555_v48  ;;  %v557_v57 = vmul.f32 %v2023_v49, %v2703_v0  ;;  %v2027_v58 = vunpack.c.h.bf16 %v2506_v41  ;;  %v2512_v41 = vld [vmem:[%s2698_s20 + $0x128] sm:$0xff]  }
  0x56   : > { %2565 = vst [vmem:[%s2737_s27 + $0xd8] sm:$0xff] %v2294_v51   ;;  %v817_v59 = vmax.f32 %v689_v52, 0.0  ;;  %v691_v60 = vadd.f32 %v2712_v9, %v556_v53  ;;  %v558_v61 = vmul.f32 %v2026_v54, %v2703_v0  ;;  %v2030_v62 = vunpack.c.l.bf16 %v2507_v50 }
  0x57   : > { %v2299_v1 = vpack.c.bf16 %v816_v55, %v815_v47  ;;  %v818_v2 = vmax.f32 %v690_v56, 0.0  ;;  %v692_v3 = vadd.f32 %v2712_v9, %v557_v57  ;;  %v559_v4 = vmul.f32 %v2027_v58, %v2703_v0 }
  0x58   : > { %v819_v5 = vmax.f32 %v691_v60, 0.0  ;;  %v693_v6 = vadd.f32 %v2712_v9, %v558_v61  ;;  %v2031_v7 = vunpack.c.h.bf16 %v2507_v50  ;;  %v560_v8 = vmul.f32 %v2030_v62, %v2703_v0  ;;  %v2513_v50 = vld [vmem:[%s2698_s20 + $0x130] sm:$0xff]  }
  0x59   : > { %2566 = vst [vmem:[%s2737_s27 + $0xe0] sm:$0xff] %v2299_v1   ;;  %v2304_v11 = vpack.c.bf16 %v818_v2, %v817_v59  ;;  %v820_v12 = vmax.f32 %v692_v3, 0.0  ;;  %v694_v13 = vadd.f32 %v2712_v9, %v559_v4  ;;  %v2034_v14 = vunpack.c.l.bf16 %v2508_v63  ;;  %v2514_v59 = vld [vmem:[%s2698_s20 + $0x138] sm:$0xff]  }
  0x5a   : > { %v821_v15 = vmax.f32 %v693_v6, 0.0  ;;  %v561_v16 = vmul.f32 %v2031_v7, %v2703_v0  ;;  %v695_v17 = vadd.f32 %v2712_v9, %v560_v8  ;;  %v2035_v18 = vunpack.c.h.bf16 %v2508_v63 }
  0x5b   : > { %2567 = vst [vmem:[%s2737_s27 + $0xe8] sm:$0xff] %v2304_v11   ;;  %v2309_v20 = vpack.c.bf16 %v820_v12, %v819_v5  ;;  %v822_v21 = vmax.f32 %v694_v13, 0.0  ;;  %v562_v22 = vmul.f32 %v2034_v14, %v2703_v0  ;;  %v2038_v23 = vunpack.c.l.bf16 %v2509_v10  ;;  %v2515_v5 = vld [vmem:[%s2698_s20 + $0x140] sm:$0xff]  }
  0x5c   : > { %v696_v24 = vadd.f32 %v2712_v9, %v561_v16  ;;  %v823_v25 = vmax.f32 %v695_v17, 0.0  ;;  %v563_v26 = vmul.f32 %v2035_v18, %v2703_v0  ;;  %v2039_v27 = vunpack.c.h.bf16 %v2509_v10 }
  0x5d   : > { %2568 = vst [vmem:[%s2737_s27 + $0xf0] sm:$0xff] %v2309_v20   ;;  %v2314_v29 = vpack.c.bf16 %v822_v21, %v821_v15  ;;  %v697_v30 = vadd.f32 %v2712_v9, %v562_v22  ;;  %v564_v31 = vmul.f32 %v2038_v23, %v2703_v0  ;;  %v2042_v32 = vunpack.c.l.bf16 %v2510_v19 }
  0x5e   : > { %v824_v33 = vmax.f32 %v696_v24, 0.0  ;;  %v698_v34 = vadd.f32 %v2712_v9, %v563_v26  ;;  %v565_v35 = vmul.f32 %v2039_v27, %v2703_v0  ;;  %v2043_v36 = vunpack.c.h.bf16 %v2510_v19  ;;  %v2516_v19 = vld [vmem:[%s2698_s20 + $0x148] sm:$0xff]  }
  0x5f   : > { %2569 = vst [vmem:[%s2737_s27 + $0xf8] sm:$0xff] %v2314_v29   ;;  %v825_v37 = vmax.f32 %v697_v30, 0.0  ;;  %v699_v38 = vadd.f32 %v2712_v9, %v564_v31  ;;  %v566_v39 = vmul.f32 %v2042_v32, %v2703_v0  ;;  %v2046_v40 = vunpack.c.l.bf16 %v2511_v28 }
  0x60   : > { %v2319_v42 = vpack.c.bf16 %v824_v33, %v823_v25  ;;  %v826_v43 = vmax.f32 %v698_v34, 0.0  ;;  %v700_v44 = vadd.f32 %v2712_v9, %v565_v35  ;;  %v567_v45 = vmul.f32 %v2043_v36, %v2703_v0 }
  0x61   : > { %v827_v46 = vmax.f32 %v699_v38, 0.0  ;;  %v701_v47 = vadd.f32 %v2712_v9, %v566_v39  ;;  %v2047_v48 = vunpack.c.h.bf16 %v2511_v28  ;;  %v568_v49 = vmul.f32 %v2046_v40, %v2703_v0  ;;  %v2517_v28 = vld [vmem:[%s2698_s20 + $0x150] sm:$0xff]  }
  0x62   : > { %2570 = vst [vmem:[%s2737_s27 + $0x100] sm:$0xff] %v2319_v42   ;;  %v2324_v51 = vpack.c.bf16 %v826_v43, %v825_v37  ;;  %v828_v52 = vmax.f32 %v700_v44, 0.0  ;;  %v702_v53 = vadd.f32 %v2712_v9, %v567_v45  ;;  %v2050_v54 = vunpack.c.l.bf16 %v2512_v41  ;;  %v2518_v37 = vld [vmem:[%s2698_s20 + $0x158] sm:$0xff]  }
  0x63   : > { %v829_v55 = vmax.f32 %v701_v47, 0.0  ;;  %v569_v56 = vmul.f32 %v2047_v48, %v2703_v0  ;;  %v703_v57 = vadd.f32 %v2712_v9, %v568_v49  ;;  %v2051_v58 = vunpack.c.h.bf16 %v2512_v41 }
  0x64   : > { %2571 = vst [vmem:[%s2737_s27 + $0x108] sm:$0xff] %v2324_v51   ;;  %v2329_v60 = vpack.c.bf16 %v828_v52, %v827_v46  ;;  %v830_v61 = vmax.f32 %v702_v53, 0.0  ;;  %v570_v62 = vmul.f32 %v2050_v54, %v2703_v0  ;;  %v2054_v63 = vunpack.c.l.bf16 %v2513_v50  ;;  %v2519_v46 = vld [vmem:[%s2698_s20 + $0x160] sm:$0xff]  }
  0x65   : > { %v704_v1 = vadd.f32 %v2712_v9, %v569_v56  ;;  %v831_v2 = vmax.f32 %v703_v57, 0.0  ;;  %v571_v3 = vmul.f32 %v2051_v58, %v2703_v0  ;;  %v2055_v4 = vunpack.c.h.bf16 %v2513_v50 }
  0x66   : > { %2572 = vst [vmem:[%s2737_s27 + $0x110] sm:$0xff] %v2329_v60   ;;  %v2334_v6 = vpack.c.bf16 %v830_v61, %v829_v55  ;;  %v705_v7 = vadd.f32 %v2712_v9, %v570_v62  ;;  %v572_v8 = vmul.f32 %v2054_v63, %v2703_v0  ;;  %v2058_v10 = vunpack.c.l.bf16 %v2514_v59 }
  0x67   : > { %v832_v11 = vmax.f32 %v704_v1, 0.0  ;;  %v706_v12 = vadd.f32 %v2712_v9, %v571_v3  ;;  %v573_v13 = vmul.f32 %v2055_v4, %v2703_v0  ;;  %v2059_v14 = vunpack.c.h.bf16 %v2514_v59  ;;  %v2520_v59 = vld [vmem:[%s2698_s20 + $0x168] sm:$0xff]  }
  0x68   : > { %2573 = vst [vmem:[%s2737_s27 + $0x118] sm:$0xff] %v2334_v6   ;;  %v833_v15 = vmax.f32 %v705_v7, 0.0  ;;  %v707_v16 = vadd.f32 %v2712_v9, %v572_v8  ;;  %v574_v17 = vmul.f32 %v2058_v10, %v2703_v0  ;;  %v2062_v18 = vunpack.c.l.bf16 %v2515_v5 }
  0x69   : > { %v2339_v20 = vpack.c.bf16 %v832_v11, %v831_v2  ;;  %v834_v21 = vmax.f32 %v706_v12, 0.0  ;;  %v708_v22 = vadd.f32 %v2712_v9, %v573_v13  ;;  %v575_v23 = vmul.f32 %v2059_v14, %v2703_v0 }
  0x6a   : > { %v835_v24 = vmax.f32 %v707_v16, 0.0  ;;  %v709_v25 = vadd.f32 %v2712_v9, %v574_v17  ;;  %v2063_v26 = vunpack.c.h.bf16 %v2515_v5  ;;  %v576_v27 = vmul.f32 %v2062_v18, %v2703_v0  ;;  %v2521_v5 = vld [vmem:[%s2698_s20 + $0x170] sm:$0xff]  }
  0x6b   : > { %2574 = vst [vmem:[%s2737_s27 + $0x120] sm:$0xff] %v2339_v20   ;;  %v2344_v29 = vpack.c.bf16 %v834_v21, %v833_v15  ;;  %v836_v30 = vmax.f32 %v708_v22, 0.0  ;;  %v710_v31 = vadd.f32 %v2712_v9, %v575_v23  ;;  %v2066_v32 = vunpack.c.l.bf16 %v2516_v19  ;;  %v2522_v15 = vld [vmem:[%s2698_s20 + $0x178] sm:$0xff]  }
  0x6c   : > { %v837_v33 = vmax.f32 %v709_v25, 0.0  ;;  %v577_v34 = vmul.f32 %v2063_v26, %v2703_v0  ;;  %v711_v35 = vadd.f32 %v2712_v9, %v576_v27  ;;  %v2067_v36 = vunpack.c.h.bf16 %v2516_v19 }
  0x6d   : > { %2575 = vst [vmem:[%s2737_s27 + $0x128] sm:$0xff] %v2344_v29   ;;  %v2349_v38 = vpack.c.bf16 %v836_v30, %v835_v24  ;;  %v838_v39 = vmax.f32 %v710_v31, 0.0  ;;  %v578_v40 = vmul.f32 %v2066_v32, %v2703_v0  ;;  %v2070_v41 = vunpack.c.l.bf16 %v2517_v28  ;;  %v2523_v24 = vld [vmem:[%s2698_s20 + $0x180] sm:$0xff]  }
  0x6e   : > { %v712_v42 = vadd.f32 %v2712_v9, %v577_v34  ;;  %v839_v43 = vmax.f32 %v711_v35, 0.0  ;;  %v579_v44 = vmul.f32 %v2067_v36, %v2703_v0  ;;  %v2071_v45 = vunpack.c.h.bf16 %v2517_v28  ;;  %v3000_v35 = vld [vmem:[%s3121_s1] ss:$0 sm:$0xff] }
  0x6f   : > { %2576 = vst [vmem:[%s2737_s27 + $0x130] sm:$0xff] %v2349_v38   ;;  %v2354_v47 = vpack.c.bf16 %v838_v39, %v837_v33  ;;  %v713_v48 = vadd.f32 %v2712_v9, %v578_v40  ;;  %v580_v49 = vmul.f32 %v2070_v41, %v2703_v0  ;;  %v2074_v50 = vunpack.c.l.bf16 %v2518_v37  ;;  %v2524_v38 = vld [vmem:[%s2698_s20 + $0x188] sm:$0xff]  }
  0x70   : > { %v840_v51 = vmax.f32 %v712_v42, 0.0  ;;  %v714_v52 = vadd.f32 %v2712_v9, %v579_v44  ;;  %v581_v53 = vmul.f32 %v2071_v45, %v2703_v0  ;;  %v2075_v54 = vunpack.c.h.bf16 %v2518_v37 }
  0x71   : > { %2577 = vst [vmem:[%s2737_s27 + $0x138] sm:$0xff] %v2354_v47   ;;  %v841_v55 = vmax.f32 %v713_v48, 0.0  ;;  %v715_v56 = vadd.f32 %v2712_v9, %v580_v49  ;;  %v582_v57 = vmul.f32 %v2074_v50, %v2703_v0  ;;  %v2078_v58 = vunpack.c.l.bf16 %v2519_v46  ;;  %v2525_v47 = vld [vmem:[%s2698_s20 + $0x190] sm:$0xff]  }
  0x72   : > { %v2359_v60 = vpack.c.bf16 %v840_v51, %v839_v43  ;;  %v842_v61 = vmax.f32 %v714_v52, 0.0  ;;  %v716_v62 = vadd.f32 %v2712_v9, %v581_v53  ;;  %v583_v63 = vmul.f32 %v2075_v54, %v2703_v0  ;;  %v3009_v43 = vld [vmem:[%s3122_s2] ss:$0 sm:$0xff] }
  0x73   : > { %v843_v1 = vmax.f32 %v715_v56, 0.0  ;;  %v717_v2 = vadd.f32 %v2712_v9, %v582_v57  ;;  %v2079_v3 = vunpack.c.h.bf16 %v2519_v46  ;;  %v584_v4 = vmul.f32 %v2078_v58, %v2703_v0 }
  0x74   : > { %2578 = vst [vmem:[%s2737_s27 + $0x140] sm:$0xff] %v2359_v60   ;;  %v2364_v6 = vpack.c.bf16 %v842_v61, %v841_v55  ;;  %v844_v7 = vmax.f32 %v716_v62, 0.0  ;;  %v718_v8 = vadd.f32 %v2712_v9, %v583_v63  ;;  %v2082_v10 = vunpack.c.l.bf16 %v2520_v59  ;;  %v2526_v55 = vld [vmem:[%s2698_s20 + $0x198] sm:$0xff]  }
  0x75   : > { %v845_v11 = vmax.f32 %v717_v2, 0.0  ;;  %v585_v12 = vmul.f32 %v2079_v3, %v2703_v0  ;;  %v719_v13 = vadd.f32 %v2712_v9, %v584_v4  ;;  %v2083_v14 = vunpack.c.h.bf16 %v2520_v59 }
  0x76   : > { %2579 = vst [vmem:[%s2737_s27 + $0x148] sm:$0xff] %v2364_v6   ;;  %v2369_v16 = vpack.c.bf16 %v844_v7, %v843_v1  ;;  %v846_v17 = vmax.f32 %v718_v8, 0.0  ;;  %v586_v18 = vmul.f32 %v2082_v10, %v2703_v0  ;;  %v2086_v19 = vunpack.c.l.bf16 %v2521_v5  ;;  %v2527_v1 = vld [vmem:[%s2698_s20 + $0x1a0] sm:$0xff]  }
  0x77   : > { %v720_v20 = vadd.f32 %v2712_v9, %v585_v12  ;;  %v847_v21 = vmax.f32 %v719_v13, 0.0  ;;  %v587_v22 = vmul.f32 %v2083_v14, %v2703_v0  ;;  %v2087_v23 = vunpack.c.h.bf16 %v2521_v5 }
  0x78   : > { %2580 = vst [vmem:[%s2737_s27 + $0x150] sm:$0xff] %v2369_v16   ;;  %v2374_v25 = vpack.c.bf16 %v846_v17, %v845_v11  ;;  %v721_v26 = vadd.f32 %v2712_v9, %v586_v18  ;;  %v588_v27 = vmul.f32 %v2086_v19, %v2703_v0  ;;  %v2090_v28 = vunpack.c.l.bf16 %v2522_v15 }
  0x79   : > { %v848_v29 = vmax.f32 %v720_v20, 0.0  ;;  %v722_v30 = vadd.f32 %v2712_v9, %v587_v22  ;;  %v589_v31 = vmul.f32 %v2087_v23, %v2703_v0  ;;  %v2091_v32 = vunpack.c.h.bf16 %v2522_v15  ;;  %v2528_v15 = vld [vmem:[%s2698_s20 + $0x1a8] sm:$0xff]  }
  0x7a   : > { %2581 = vst [vmem:[%s2737_s27 + $0x158] sm:$0xff] %v2374_v25   ;;  %v849_v33 = vmax.f32 %v721_v26, 0.0  ;;  %v723_v34 = vadd.f32 %v2712_v9, %v588_v27  ;;  %v590_v36 = vmul.f32 %v3000_v35, %v2090_v28  ;;  %v2094_v37 = vunpack.c.l.bf16 %v2523_v24 }
  0x7b   : > { %v2379_v39 = vpack.c.bf16 %v848_v29, %v847_v21  ;;  %v850_v40 = vmax.f32 %v722_v30, 0.0  ;;  %v724_v0 = vadd.f32 %v2712_v9, %v589_v31  ;;  %v591_v41 = vmul.f32 %v3000_v35, %v2091_v32 }
  0x7c   : > { %v851_v42 = vmax.f32 %v723_v34, 0.0  ;;  %v725_v44 = vadd.f32 %v3009_v43, %v590_v36  ;;  %v2095_v45 = vunpack.c.h.bf16 %v2523_v24  ;;  %v592_v46 = vmul.f32 %v3000_v35, %v2094_v37  ;;  %v2529_v24 = vld [vmem:[%s2698_s20 + $0x1b0] sm:$0xff]  }
  0x7d   : > { %2582 = vst [vmem:[%s2737_s27 + $0x160] sm:$0xff] %v2379_v39   ;;  %v2384_v48 = vpack.c.bf16 %v850_v40, %v849_v33  ;;  %v852_v49 = vmax.f32 %v724_v0, 0.0  ;;  %v726_v9 = vadd.f32 %v3009_v43, %v591_v41  ;;  %v2098_v50 = vunpack.c.l.bf16 %v2524_v38  ;;  %v2530_v33 = vld [vmem:[%s2698_s20 + $0x1b8] sm:$0xff]  }
  0x7e   : > { %v853_v51 = vmax.f32 %v725_v44, 0.0  ;;  %v593_v52 = vmul.f32 %v3000_v35, %v2095_v45  ;;  %v727_v53 = vadd.f32 %v3009_v43, %v592_v46  ;;  %v2099_v54 = vunpack.c.h.bf16 %v2524_v38 }
  0x7f   : > { %2583 = vst [vmem:[%s2737_s27 + $0x168] sm:$0xff] %v2384_v48   ;;  %v2389_v56 = vpack.c.bf16 %v852_v49, %v851_v42  ;;  %v854_v57 = vmax.f32 %v726_v9, 0.0  ;;  %v594_v58 = vmul.f32 %v3000_v35, %v2098_v50  ;;  %v2102_v59 = vunpack.c.l.bf16 %v2525_v47  ;;  %v2531_v42 = vld [vmem:[%s2698_s20 + $0x1c0] sm:$0xff]  }
  0x80   : > { %v728_v60 = vadd.f32 %v3009_v43, %v593_v52  ;;  %v855_v61 = vmax.f32 %v727_v53, 0.0  ;;  %v595_v62 = vmul.f32 %v3000_v35, %v2099_v54  ;;  %v2103_v63 = vunpack.c.h.bf16 %v2525_v47 }
  0x81   : > { %2584 = vst [vmem:[%s2737_s27 + $0x170] sm:$0xff] %v2389_v56   ;;  %v2394_v2 = vpack.c.bf16 %v854_v57, %v853_v51  ;;  %v729_v3 = vadd.f32 %v3009_v43, %v594_v58  ;;  %v596_v4 = vmul.f32 %v3000_v35, %v2102_v59  ;;  %v2106_v5 = vunpack.c.l.bf16 %v2526_v55 }
  0x82   : > { %v856_v6 = vmax.f32 %v728_v60, 0.0  ;;  %v730_v7 = vadd.f32 %v3009_v43, %v595_v62  ;;  %v597_v8 = vmul.f32 %v3000_v35, %v2103_v63  ;;  %v2107_v10 = vunpack.c.h.bf16 %v2526_v55  ;;  %v2532_v55 = vld [vmem:[%s2698_s20 + $0x1c8] sm:$0xff]  }
  0x83   : > { %2585 = vst [vmem:[%s2737_s27 + $0x178] sm:$0xff] %v2394_v2   ;;  %v857_v11 = vmax.f32 %v729_v3, 0.0  ;;  %v731_v12 = vadd.f32 %v3009_v43, %v596_v4  ;;  %v598_v13 = vmul.f32 %v3000_v35, %v2106_v5  ;;  %v2110_v14 = vunpack.c.l.bf16 %v2527_v1 }
  0x84   : > { %v2399_v16 = vpack.c.bf16 %v856_v6, %v855_v61  ;;  %v858_v17 = vmax.f32 %v730_v7, 0.0  ;;  %v732_v18 = vadd.f32 %v3009_v43, %v597_v8  ;;  %v599_v19 = vmul.f32 %v3000_v35, %v2107_v10 }
  0x85   : > { %v859_v20 = vmax.f32 %v731_v12, 0.0  ;;  %v733_v21 = vadd.f32 %v3009_v43, %v598_v13  ;;  %v2111_v22 = vunpack.c.h.bf16 %v2527_v1  ;;  %v600_v23 = vmul.f32 %v3000_v35, %v2110_v14  ;;  %v2533_v1 = vld [vmem:[%s2698_s20 + $0x1d0] sm:$0xff]  }
  0x86   : > { %2586 = vst [vmem:[%s2737_s27 + $0x180] sm:$0xff] %v2399_v16   ;;  %v2404_v25 = vpack.c.bf16 %v858_v17, %v857_v11  ;;  %v860_v26 = vmax.f32 %v732_v18, 0.0  ;;  %v734_v27 = vadd.f32 %v3009_v43, %v599_v19  ;;  %v2114_v28 = vunpack.c.l.bf16 %v2528_v15  ;;  %v2534_v11 = vld [vmem:[%s2698_s20 + $0x1d8] sm:$0xff]  }
  0x87   : > { %v861_v29 = vmax.f32 %v733_v21, 0.0  ;;  %v601_v30 = vmul.f32 %v3000_v35, %v2111_v22  ;;  %v735_v31 = vadd.f32 %v3009_v43, %v600_v23  ;;  %v2115_v32 = vunpack.c.h.bf16 %v2528_v15 }
  0x88   : > { %2587 = vst [vmem:[%s2737_s27 + $0x188] sm:$0xff] %v2404_v25   ;;  %v2409_v34 = vpack.c.bf16 %v860_v26, %v859_v20  ;;  %v862_v36 = vmax.f32 %v734_v27, 0.0  ;;  %v602_v37 = vmul.f32 %v3000_v35, %v2114_v28  ;;  %v2118_v38 = vunpack.c.l.bf16 %v2529_v24  ;;  %v2535_v20 = vld [vmem:[%s2698_s20 + $0x1e0] sm:$0xff]  }
  0x89   : > { %v736_v39 = vadd.f32 %v3009_v43, %v601_v30  ;;  %v863_v40 = vmax.f32 %v735_v31, 0.0  ;;  %v603_v0 = vmul.f32 %v3000_v35, %v2115_v32  ;;  %v2119_v41 = vunpack.c.h.bf16 %v2529_v24 }
  0x8a   : > { %2588 = vst [vmem:[%s2737_s27 + $0x190] sm:$0xff] %v2409_v34   ;;  %v2414_v44 = vpack.c.bf16 %v862_v36, %v861_v29  ;;  %v737_v45 = vadd.f32 %v3009_v43, %v602_v37  ;;  %v604_v46 = vmul.f32 %v3000_v35, %v2118_v38  ;;  %v2122_v47 = vunpack.c.l.bf16 %v2530_v33 }
  0x8b   : > { %v864_v48 = vmax.f32 %v736_v39, 0.0  ;;  %v738_v49 = vadd.f32 %v3009_v43, %v603_v0  ;;  %v605_v9 = vmul.f32 %v3000_v35, %v2119_v41  ;;  %v2123_v50 = vunpack.c.h.bf16 %v2530_v33  ;;  %v2536_v33 = vld [vmem:[%s2698_s20 + $0x1e8] sm:$0xff]  }
  0x8c   : > { %2589 = vst [vmem:[%s2737_s27 + $0x198] sm:$0xff] %v2414_v44   ;;  %v865_v51 = vmax.f32 %v737_v45, 0.0  ;;  %v739_v52 = vadd.f32 %v3009_v43, %v604_v46  ;;  %v606_v53 = vmul.f32 %v3000_v35, %v2122_v47  ;;  %v2126_v54 = vunpack.c.l.bf16 %v2531_v42 }
  0x8d   : > { %v2419_v56 = vpack.c.bf16 %v864_v48, %v863_v40  ;;  %v866_v57 = vmax.f32 %v738_v49, 0.0  ;;  %v740_v58 = vadd.f32 %v3009_v43, %v605_v9  ;;  %v607_v59 = vmul.f32 %v3000_v35, %v2123_v50 }
  0x8e   : > { %v867_v60 = vmax.f32 %v739_v52, 0.0  ;;  %v741_v61 = vadd.f32 %v3009_v43, %v606_v53  ;;  %v2127_v62 = vunpack.c.h.bf16 %v2531_v42  ;;  %v608_v63 = vmul.f32 %v3000_v35, %v2126_v54  ;;  %v2537_v42 = vld [vmem:[%s2698_s20 + $0x1f0] sm:$0xff]  }
  0x8f   : > { %2590 = vst [vmem:[%s2737_s27 + $0x1a0] sm:$0xff] %v2419_v56   ;;  %v2424_v2 = vpack.c.bf16 %v866_v57, %v865_v51  ;;  %v868_v3 = vmax.f32 %v740_v58, 0.0  ;;  %v742_v4 = vadd.f32 %v3009_v43, %v607_v59  ;;  %v2130_v5 = vunpack.c.l.bf16 %v2532_v55  ;;  %v2538_v51 = vld [vmem:[%s2698_s20 + $0x1f8] sm:$0xff]  }
  0x90   : > { %v869_v6 = vmax.f32 %v741_v61, 0.0  ;;  %v609_v7 = vmul.f32 %v3000_v35, %v2127_v62  ;;  %v743_v8 = vadd.f32 %v3009_v43, %v608_v63  ;;  %v2131_v10 = vunpack.c.h.bf16 %v2532_v55 }
  0x91   : > { %2591 = vst [vmem:[%s2737_s27 + $0x1a8] sm:$0xff] %v2424_v2   ;;  %v2429_v12 = vpack.c.bf16 %v868_v3, %v867_v60  ;;  %v870_v13 = vmax.f32 %v742_v4, 0.0  ;;  %v610_v14 = vmul.f32 %v3000_v35, %v2130_v5  ;;  %v2134_v15 = vunpack.c.l.bf16 %v2533_v1 }
  0x92   : > { %v744_v16 = vadd.f32 %v3009_v43, %v609_v7  ;;  %v871_v17 = vmax.f32 %v743_v8, 0.0  ;;  %v611_v18 = vmul.f32 %v3000_v35, %v2131_v10  ;;  %v2135_v19 = vunpack.c.h.bf16 %v2533_v1 }
  0x93   : > { %2592 = vst [vmem:[%s2737_s27 + $0x1b0] sm:$0xff] %v2429_v12   ;;  %v2434_v21 = vpack.c.bf16 %v870_v13, %v869_v6  ;;  %v745_v22 = vadd.f32 %v3009_v43, %v610_v14  ;;  %v612_v23 = vmul.f32 %v3000_v35, %v2134_v15  ;;  %v2138_v24 = vunpack.c.l.bf16 %v2534_v11 }
  0x94   : > { %v872_v25 = vmax.f32 %v744_v16, 0.0  ;;  %v746_v26 = vadd.f32 %v3009_v43, %v611_v18  ;;  %v613_v27 = vmul.f32 %v3000_v35, %v2135_v19  ;;  %v2139_v28 = vunpack.c.h.bf16 %v2534_v11 }
  0x95   : > { %2593 = vst [vmem:[%s2737_s27 + $0x1b8] sm:$0xff] %v2434_v21   ;;  %v873_v29 = vmax.f32 %v745_v22, 0.0  ;;  %v747_v30 = vadd.f32 %v3009_v43, %v612_v23  ;;  %v614_v31 = vmul.f32 %v3000_v35, %v2138_v24  ;;  %v2142_v32 = vunpack.c.l.bf16 %v2535_v20 }
  0x96   : > { %v2439_v34 = vpack.c.bf16 %v872_v25, %v871_v17  ;;  %v874_v36 = vmax.f32 %v746_v26, 0.0  ;;  %v748_v37 = vadd.f32 %v3009_v43, %v613_v27  ;;  %v615_v38 = vmul.f32 %v3000_v35, %v2139_v28 }
  0x97   : > { %v875_v39 = vmax.f32 %v747_v30, 0.0  ;;  %v749_v40 = vadd.f32 %v3009_v43, %v614_v31  ;;  %v2143_v0 = vunpack.c.h.bf16 %v2535_v20  ;;  %v616_v41 = vmul.f32 %v3000_v35, %v2142_v32 }
  0x98   : > { %2594 = vst [vmem:[%s2737_s27 + $0x1c0] sm:$0xff] %v2439_v34   ;;  %v2444_v44 = vpack.c.bf16 %v874_v36, %v873_v29  ;;  %v876_v45 = vmax.f32 %v748_v37, 0.0  ;;  %v750_v46 = vadd.f32 %v3009_v43, %v615_v38  ;;  %v2146_v47 = vunpack.c.l.bf16 %v2536_v33 }
  0x99   : > { %v877_v48 = vmax.f32 %v749_v40, 0.0  ;;  %v617_v49 = vmul.f32 %v3000_v35, %v2143_v0  ;;  %v751_v9 = vadd.f32 %v3009_v43, %v616_v41  ;;  %v2147_v50 = vunpack.c.h.bf16 %v2536_v33 }
  0x9a   : > { %2595 = vst [vmem:[%s2737_s27 + $0x1c8] sm:$0xff] %v2444_v44   ;;  %v2449_v52 = vpack.c.bf16 %v876_v45, %v875_v39  ;;  %v878_v53 = vmax.f32 %v750_v46, 0.0  ;;  %v618_v54 = vmul.f32 %v3000_v35, %v2146_v47  ;;  %v2150_v55 = vunpack.c.l.bf16 %v2537_v42 }
  0x9b   : > { %v752_v56 = vadd.f32 %v3009_v43, %v617_v49  ;;  %v879_v57 = vmax.f32 %v751_v9, 0.0  ;;  %v619_v58 = vmul.f32 %v3000_v35, %v2147_v50  ;;  %v2151_v59 = vunpack.c.h.bf16 %v2537_v42 }
  0x9c   : > { %2596 = vst [vmem:[%s2737_s27 + $0x1d0] sm:$0xff] %v2449_v52   ;;  %v2454_v60 = vpack.c.bf16 %v878_v53, %v877_v48  ;;  %v753_v61 = vadd.f32 %v3009_v43, %v618_v54  ;;  %v620_v62 = vmul.f32 %v3000_v35, %v2150_v55  ;;  %v2154_v63 = vunpack.c.l.bf16 %v2538_v51 }
  0x9d   : > { %v880_v1 = vmax.f32 %v752_v56, 0.0  ;;  %v754_v2 = vadd.f32 %v3009_v43, %v619_v58  ;;  %v621_v3 = vmul.f32 %v3000_v35, %v2151_v59  ;;  %v2155_v4 = vunpack.c.h.bf16 %v2538_v51 }
  0x9e   : > { %2597 = vst [vmem:[%s2737_s27 + $0x1d8] sm:$0xff] %v2454_v60   ;;  %v881_v5 = vmax.f32 %v753_v61, 0.0  ;;  %v755_v6 = vadd.f32 %v3009_v43, %v620_v62  ;;  %v622_v7 = vmul.f32 %v3000_v35, %v2154_v63 }
  0x9f   : > { %v2459_v8 = vpack.c.bf16 %v880_v1, %v879_v57  ;;  %v882_v10 = vmax.f32 %v754_v2, 0.0  ;;  %v756_v11 = vadd.f32 %v3009_v43, %v621_v3  ;;  %v623_v12 = vmul.f32 %v3000_v35, %v2155_v4 }
  0xa0   : > { %v883_v13 = vmax.f32 %v755_v6, 0.0  ;;  %v757_v14 = vadd.f32 %v3009_v43, %v622_v7 }
  0xa1   : > { %2598 = vst [vmem:[%s2737_s27 + $0x1e0] sm:$0xff] %v2459_v8   ;;  %v2464_v15 = vpack.c.bf16 %v882_v10, %v881_v5  ;;  %v884_v16 = vmax.f32 %v756_v11, 0.0  ;;  %v758_v17 = vadd.f32 %v3009_v43, %v623_v12 }
  0xa2   : > { %v885_v18 = vmax.f32 %v757_v14, 0.0 }
  0xa3   : > { %2599 = vst [vmem:[%s2737_s27 + $0x1e8] sm:$0xff] %v2464_v15   ;;  %v2469_v19 = vpack.c.bf16 %v884_v16, %v883_v13  ;;  %v886_v20 = vmax.f32 %v758_v17, 0.0 }
  0xa5   : > { %2600 = vst [vmem:[%s2737_s27 + $0x1f0] sm:$0xff] %v2469_v19   ;;  %v2474_v21 = vpack.c.bf16 %v886_v20, %v885_v18 }
  0xa7   : > { %2601 = vst [vmem:[%s2737_s27 + $0x1f8] sm:$0xff] %v2474_v21  }
  0xa8 PF: > { %s13_s14 = sadd.s32 1, %s2650_s14   ;;  %s3124_s12 = smov %s2646_s13 }
  0xa9   : > { %p10_p5 = scmp.ge.s32.totalorder %s13_s14, 4   ;;  %s3125_s13 = smov %s3127_s15 }
  0xab   :  { %12 = sbr.rel (!%p10_p5) target bundleno = 2 (0x2), region = 68 }

// kernel: generator_forward.38
= control target key start
LH: loop header
LB: loop body
LE: loop exit
PB: predicated region body
PF: predicated region fallthrough
CT: control target
= control target key end

     0   :  { %s2450_s12 = smov 0   ;;  %s2452_s13 = smov 0   ;;  %s2665_s0 = inlined_call_operand.vmem [shape: bf16[2048,32], index: 0, kind: input, shape index: {}]   ;;  %s2666_s1 = inlined_call_operand.vmem [shape: bf16[32,128], index: 1, kind: input, shape index: {}]   ;;  %s2667_s2 = inlined_call_operand.vmem [shape: f32[1,128], index: 2, kind: input, shape index: {}]   ;;  %s2668_s3 = inlined_call_operand.vmem [shape: bf16[2048,128], index: 3, kind: output, shape index: {}]  }
   0x1   :  { %s2454_s14 = smov 0  }
   0x2 LB: > { %s32_s15 = sadd.s32 1, %s2424_s13  ;;  %p1721_p0 = scmp.ge.s32.totalorder %s2428_s14, 1  ;;  %s2428_s14 = sphi %s2454_s14, %s13_s14   ;;  %s2424_s13 = sphi %s2452_s13, %s2670_s13   ;;  %s2420_s12 = sphi %s2450_s12, %s2669_s12  }
   0x3   : > { %p34_p1 = scmp.ge.s32.totalorder %s32_s15, 4  ;;  %p188_p2 = scmp.lt.s32.totalorder %s2428_s14, 5 }
   0x5   : > { %s2672_s15 = smov (%p34_p1, %s32_s15), 0  ;;  %p189_p3 = pnand %p1721_p0, %p188_p2 }
   0x6   : > { %v2244_v0 = vld [vmem:[%s2666_s1] sm:$0xff] (!%p189_p3)   ;;  %s1722_s18 = sshll.u32 (!%p189_p3), %s2420_s12, 6  ;;  %v2245_v1 = vld [vmem:[%s2666_s1 + $0x8] sm:$0xff] (!%p189_p3)   ;;  %vm639_vm0 = vcmask (!%p189_p3), 261120  }
   0x7   : > { %192 = sbr.rel (%p189_p3) target bundleno = 312 (0x138), region = 32  ;;  %p230_p4 = scmp.lt.s32.totalorder (!%p189_p3), %s1722_s18, 255  ;;  %2148 = vmatprep.subr.bf16.mxu0 (!%p189_p3), %v2244_v0  ;;  %2216 = vmatprep.subr.bf16.mxu1 (!%p189_p3), %v2244_v0  ;;  %v2551_v34 = vld [vmem:[%s2667_s2] ss:$0 sm:$0xff] (!%p189_p3) }
   0x8   : > { %2149 = vmatpush3.bf16.msra.mxu0 (!%p189_p3), %v2244_v0  ;;  %2218 = vmatpush3.bf16.msra.mxu1 (!%p189_p3), %v2244_v0 }
   0x9   : > { %2150 = vmatprep.subr.bf16.mxu0 (!%p189_p3), %v2245_v1  ;;  %2217 = vmatprep.subr.bf16.mxu1 (!%p189_p3), %v2245_v1 }
   0xc   : > { %2151 = vmatpush3.bf16.msra.mxu0 (!%p189_p3), %v2245_v1  ;;  %2219 = vmatpush3.bf16.msra.mxu1 (!%p189_p3), %v2245_v1 }
   0xe   : > { %s2674_s18 = smov (!%p230_p4, %s1722_s18), 255 }
   0xf   : > { %s1723_s21 = sshll.u32 %s2674_s18, 2 }
  0x10   : > { %s2482_s24 = scalar_lea.vmem %s2665_s0, %s1723_s21  ;;  %s2574_s29 = scalar_lea.vmem %s2668_s3, %s1723_s21 }
  0x11   : > { %v2246_v2 = vld [vmem:[%s2482_s24] sm:$0xff]   ;;  %v2248_v4 = vld [vmem:[%s2482_s24 + $0x8] sm:$0xff]   ;;  %v2250_v6 = vld [vmem:[%s2482_s24 + $0x10] sm:$0xff]  }
  0x12   : > { %v2247_v3 = vld [vmem:[%s2482_s24 + $0x80] sm:$0xff]   ;;  %2152 = vmatprep.mubr.msk.bf16.mxu0 %vm639_vm0, %v2246_v2  ;;  %v2249_v5 = vld [vmem:[%s2482_s24 + $0x88] sm:$0xff]   ;;  %v2251_v7 = vld [vmem:[%s2482_s24 + $0x90] sm:$0xff]  }
  0x13   : > { %2184 = vmatprep.mubr.msk.bf16.mxu1 %vm639_vm0, %v2247_v3  ;;  %2153 = vmatmul.mubr.msk.bf16.vlgmr.msra.gmra.mrb[0].mxu0 %vm639_vm0, %v2248_v4  ;;  %v2252_v8 = vld [vmem:[%s2482_s24 + $0x18] sm:$0xff]   ;;  %v2254_v10 = vld [vmem:[%s2482_s24 + $0x20] sm:$0xff]   ;;  %v2256_v12 = vld [vmem:[%s2482_s24 + $0x28] sm:$0xff]  }
  0x14   : > { %2185 = vmatmul.mubr.msk.bf16.vlgmr.msra.gmra.mrb[0].mxu1 %vm639_vm0, %v2249_v5  ;;  %2156 = vmatprep.mubr.msk.bf16.mxu0 %vm639_vm0, %v2250_v6  ;;  %v2253_v9 = vld [vmem:[%s2482_s24 + $0x98] sm:$0xff]   ;;  %v2255_v11 = vld [vmem:[%s2482_s24 + $0xa0] sm:$0xff]   ;;  %v2257_v13 = vld [vmem:[%s2482_s24 + $0xa8] sm:$0xff]  }
  0x15   : > { %2188 = vmatprep.mubr.msk.bf16.mxu1 %vm639_vm0, %v2251_v7  ;;  %v2258_v14 = vld [vmem:[%s2482_s24 + $0x30] sm:$0xff]   ;;  %v2260_v16 = vld [vmem:[%s2482_s24 + $0x38] sm:$0xff]   ;;  %v2262_v18 = vld [vmem:[%s2482_s24 + $0x40] sm:$0xff]  }
  0x16   : > { %v2259_v15 = vld [vmem:[%s2482_s24 + $0xb0] sm:$0xff]   ;;  %v2261_v17 = vld [vmem:[%s2482_s24 + $0xb8] sm:$0xff]   ;;  %v2263_v19 = vld [vmem:[%s2482_s24 + $0xc0] sm:$0xff]  }
  0x17   : > { %v2264_v20 = vld [vmem:[%s2482_s24 + $0x48] sm:$0xff]   ;;  %v2266_v22 = vld [vmem:[%s2482_s24 + $0x50] sm:$0xff]   ;;  %v2268_v24 = vld [vmem:[%s2482_s24 + $0x58] sm:$0xff]  }
  0x18   : > { %v2265_v21 = vld [vmem:[%s2482_s24 + $0xc8] sm:$0xff]   ;;  %v2267_v23 = vld [vmem:[%s2482_s24 + $0xd0] sm:$0xff]   ;;  %v2269_v25 = vld [vmem:[%s2482_s24 + $0xd8] sm:$0xff]  }
  0x19   : > { %v2270_v26 = vld [vmem:[%s2482_s24 + $0x60] sm:$0xff]   ;;  %v2272_v28 = vld [vmem:[%s2482_s24 + $0x68] sm:$0xff]   ;;  %v2274_v30 = vld [vmem:[%s2482_s24 + $0x70] sm:$0xff]  }
  0x1a   : > { %v2271_v27 = vld [vmem:[%s2482_s24 + $0xe0] sm:$0xff]   ;;  %v2273_v29 = vld [vmem:[%s2482_s24 + $0xe8] sm:$0xff]   ;;  %v2275_v31 = vld [vmem:[%s2482_s24 + $0xf0] sm:$0xff]  }
  0x1b   : > { %2157 = vmatmul.mubr.msk.bf16.gmra.mrb[4].mxu0 %vm639_vm0, %v2252_v8  ;;  %v2276_v32 = vld [vmem:[%s2482_s24 + $0x78] sm:$0xff]  }
  0x1c   : > { %2189 = vmatmul.mubr.msk.bf16.gmra.mrb[4].mxu1 %vm639_vm0, %v2253_v9  ;;  %2160 = vmatprep.mubr.msk.bf16.mxu0 %vm639_vm0, %v2254_v10  ;;  %v2277_v33 = vld [vmem:[%s2482_s24 + $0xf8] sm:$0xff]  }
  0x1d   : > { %2192 = vmatprep.mubr.msk.bf16.mxu1 %vm639_vm0, %v2255_v11 }
  0x23   : > { %2161 = vmatmul.mubr.msk.bf16.gmra.mrb[8].mxu0 %vm639_vm0, %v2256_v12 }
  0x24   : > { %2193 = vmatmul.mubr.msk.bf16.gmra.mrb[8].mxu1 %vm639_vm0, %v2257_v13  ;;  %2164 = vmatprep.mubr.msk.bf16.mxu0 %vm639_vm0, %v2258_v14 }
  0x25   : > { %2196 = vmatprep.mubr.msk.bf16.mxu1 %vm639_vm0, %v2259_v15 }
  0x2b   : > { %2165 = vmatmul.mubr.msk.bf16.gmra.mrb[12].mxu0 %vm639_vm0, %v2260_v16 }
  0x2c   : > { %2197 = vmatmul.mubr.msk.bf16.gmra.mrb[12].mxu1 %vm639_vm0, %v2261_v17  ;;  %2168 = vmatprep.mubr.msk.bf16.mxu0 %vm639_vm0, %v2262_v18 }
  0x2d   : > { %2200 = vmatprep.mubr.msk.bf16.mxu1 %vm639_vm0, %v2263_v19 }
  0x33   : > { %2169 = vmatmul.mubr.msk.bf16.gmra.mrb[16].mxu0 %vm639_vm0, %v2264_v20 }
  0x34   : > { %2201 = vmatmul.mubr.msk.bf16.gmra.mrb[16].mxu1 %vm639_vm0, %v2265_v21  ;;  %2172 = vmatprep.mubr.msk.bf16.mxu0 %vm639_vm0, %v2266_v22 }
  0x35   : > { %2204 = vmatprep.mubr.msk.bf16.mxu1 %vm639_vm0, %v2267_v23 }
  0x3b   : > { %2173 = vmatmul.mubr.msk.bf16.gmra.mrb[20].mxu0 %vm639_vm0, %v2268_v24 }
  0x3c   : > { %2205 = vmatmul.mubr.msk.bf16.gmra.mrb[20].mxu1 %vm639_vm0, %v2269_v25  ;;  %2176 = vmatprep.mubr.msk.bf16.mxu0 %vm639_vm0, %v2270_v26 }
  0x3d   : > { %2208 = vmatprep.mubr.msk.bf16.mxu1 %vm639_vm0, %v2271_v27 }
  0x43   : > { %2177 = vmatmul.mubr.msk.bf16.gmra.mrb[24].mxu0 %vm639_vm0, %v2272_v28 }
  0x44   : > { %2209 = vmatmul.mubr.msk.bf16.gmra.mrb[24].mxu1 %vm639_vm0, %v2273_v29  ;;  %2180 = vmatprep.mubr.msk.bf16.mxu0 %vm639_vm0, %v2274_v30 }
  0x45   : > { %2212 = vmatprep.mubr.msk.bf16.mxu1 %vm639_vm0, %v2275_v31 }
  0x4b   : > { %2181 = vmatmul.mubr.msk.bf16.gmra.mrb[28].mxu0 %vm639_vm0, %v2276_v32 }
  0x4c   : > { %2213 = vmatmul.mubr.msk.bf16.gmra.mrb[28].mxu1 %vm639_vm0, %v2277_v33 }
  0xe6   : > { %v2154_v35 = vpop.f32.mrb[0].mxu0 }
  0xe7   : > { %v1027_v36 = vadd.f32 %v2154_v35, %v2551_v34  ;;  %v2186_v37 = vpop.f32.mrb[0].mxu1  ;;  %v770_v38 = vpop.f32.mrb[1].mxu0 }
  0xe8   : > { %v1059_v39 = vadd.f32 %v2186_v37, %v2551_v34  ;;  %v1025_v40 = vadd.f32 %v2551_v34, %v770_v38  ;;  %v898_v41 = vpop.f32.mrb[1].mxu1  ;;  %v2155_v42 = vpop.f32.mrb[2].mxu0 }
  0xe9   : > { %2278 = vtanh.f32 %v1027_v36  ;;  %v1057_v43 = vadd.f32 %v2551_v34, %v898_v41  ;;  %v1028_v44 = vadd.f32 %v2155_v42, %v2551_v34  ;;  %v2187_v45 = vpop.f32.mrb[2].mxu1  ;;  %v773_v46 = vpop.f32.mrb[3].mxu0 }
  0xea   : > { %2280 = vtanh.f32 %v1059_v39  ;;  %v1060_v47 = vadd.f32 %v2187_v45, %v2551_v34  ;;  %v901_v48 = vpop.f32.mrb[3].mxu1  ;;  %v1026_v49 = vadd.f32 %v2551_v34, %v773_v46 }
  0xeb   : > { %2282 = vtanh.f32 %v1025_v40  ;;  %v1058_v50 = vadd.f32 %v2551_v34, %v901_v48 }
  0xec   : > { %2284 = vtanh.f32 %v1057_v43 }
  0xed   : > { %2286 = vtanh.f32 %v1028_v44 }
  0xee   : > { %2288 = vtanh.f32 %v1060_v47  ;;  %v2158_v51 = vpop.f32.mrb[4].mxu0 }
  0xef   : > { %2290 = vtanh.f32 %v1026_v49  ;;  %v1031_v52 = vadd.f32 %v2158_v51, %v2551_v34  ;;  %v2190_v53 = vpop.f32.mrb[4].mxu1  ;;  %v786_v54 = vpop.f32.mrb[5].mxu0 }
  0xf0   : > { %2292 = vtanh.f32 %v1058_v50  ;;  %v1063_v55 = vadd.f32 %v2190_v53, %v2551_v34  ;;  %v1029_v56 = vadd.f32 %v2551_v34, %v786_v54  ;;  %v914_v57 = vpop.f32.mrb[5].mxu1  ;;  %v2159_v58 = vpop.f32.mrb[6].mxu0 }
  0xf1   : > { %2294 = vtanh.f32 %v1031_v52  ;;  %v1061_v59 = vadd.f32 %v2551_v34, %v914_v57  ;;  %v1032_v60 = vadd.f32 %v2159_v58, %v2551_v34  ;;  %v2191_v61 = vpop.f32.mrb[6].mxu1  ;;  %v789_v62 = vpop.f32.mrb[7].mxu0 }
  0xf2   : > { %2296 = vtanh.f32 %v1063_v55  ;;  %v1064_v63 = vadd.f32 %v2191_v61, %v2551_v34  ;;  %v917_v0 = vpop.f32.mrb[7].mxu1  ;;  %v1030_v2 = vadd.f32 %v2551_v34, %v789_v62 }
  0xf3   : > { %v2279_v1 = vpop.eup %2278  ;;  %2298 = vtanh.f32 %v1029_v56  ;;  %v1062_v4 = vadd.f32 %v2551_v34, %v917_v0 }
  0xf4   : > { %v2281_v3 = vpop.eup %2280  ;;  %2300 = vtanh.f32 %v1061_v59 }
  0xf5   : > { %v2283_v5 = vpop.eup %2282  ;;  %2302 = vtanh.f32 %v1032_v60 }
  0xf6   : > { %v2285_v6 = vpop.eup %2284  ;;  %2304 = vtanh.f32 %v1064_v63  ;;  %v2162_v7 = vpop.f32.mrb[8].mxu0 }
  0xf7   : > { %v2287_v8 = vpop.eup %2286  ;;  %2306 = vtanh.f32 %v1030_v2  ;;  %v1035_v9 = vadd.f32 %v2162_v7, %v2551_v34  ;;  %v2194_v10 = vpop.f32.mrb[8].mxu1 }
  0xf8   : > { %v802_v11 = vpop.f32.mrb[9].mxu0  ;;  %v2289_v12 = vpop.eup %2288  ;;  %v1931_v13 = vpack.c.bf16 %v2287_v8, %v2279_v1  ;;  %2308 = vtanh.f32 %v1062_v4  ;;  %v1067_v14 = vadd.f32 %v2194_v10, %v2551_v34 }
  0xf9   : > { %v1033_v15 = vadd.f32 %v2551_v34, %v802_v11  ;;  %v930_v16 = vpop.f32.mrb[9].mxu1  ;;  %v2163_v17 = vpop.f32.mrb[10].mxu0  ;;  %v2011_v19 = vpack.c.bf16 %v2289_v12, %v2281_v3  ;;  %2310 = vtanh.f32 %v1035_v9 }
  0xfa   : > { %v2291_v18 = vpop.eup %2290  ;;  %v1065_v20 = vadd.f32 %v2551_v34, %v930_v16  ;;  %v1036_v21 = vadd.f32 %v2163_v17, %v2551_v34  ;;  %v2195_v22 = vpop.f32.mrb[10].mxu1  ;;  %2083 = vst [vmem:[%s2574_s29 + $0x8] sm:$0xff] %v1931_v13   ;;  %2312 = vtanh.f32 %v1067_v14 }
  0xfb   : > { %v805_v23 = vpop.f32.mrb[11].mxu0  ;;  %v2293_v24 = vpop.eup %2292  ;;  %v1926_v25 = vpack.c.bf16 %v2291_v18, %v2283_v5  ;;  %v1068_v26 = vadd.f32 %v2195_v22, %v2551_v34  ;;  %2099 = vst [vmem:[%s2574_s29 + $0x88] sm:$0xff] %v2011_v19   ;;  %2314 = vtanh.f32 %v1033_v15 }
  0xfc   : > { %v933_v27 = vpop.f32.mrb[11].mxu1  ;;  %v2295_v28 = vpop.eup %2294  ;;  %v2006_v29 = vpack.c.bf16 %v2293_v24, %v2285_v6  ;;  %v1034_v30 = vadd.f32 %v2551_v34, %v805_v23  ;;  %2316 = vtanh.f32 %v1065_v20 }
  0xfd   : > { %v2297_v31 = vpop.eup %2296  ;;  %1927 = vst [vmem:[%s2574_s29] sm:$0xff] %v1926_v25   ;;  %v1066_v32 = vadd.f32 %v2551_v34, %v933_v27  ;;  %2318 = vtanh.f32 %v1036_v21 }
  0xfe   : > { %v2299_v33 = vpop.eup %2298  ;;  %2098 = vst [vmem:[%s2574_s29 + $0x80] sm:$0xff] %v2006_v29   ;;  %2320 = vtanh.f32 %v1068_v26  ;;  %v2166_v36 = vpop.f32.mrb[12].mxu0 }
  0xff   : > { %v2301_v35 = vpop.eup %2300  ;;  %2322 = vtanh.f32 %v1034_v30  ;;  %v1039_v38 = vadd.f32 %v2166_v36, %v2551_v34  ;;  %v2198_v39 = vpop.f32.mrb[12].mxu1 }
 0x100   : > { %v2303_v37 = vpop.eup %2302  ;;  %v818_v40 = vpop.f32.mrb[13].mxu0  ;;  %2324 = vtanh.f32 %v1066_v32  ;;  %v1071_v43 = vadd.f32 %v2198_v39, %v2551_v34 }
 0x101   : > { %v2305_v41 = vpop.eup %2304  ;;  %v1941_v42 = vpack.c.bf16 %v2303_v37, %v2295_v28  ;;  %v1037_v44 = vadd.f32 %v2551_v34, %v818_v40  ;;  %v946_v45 = vpop.f32.mrb[13].mxu1  ;;  %2326 = vtanh.f32 %v1039_v38 }
 0x102   : > { %v2167_v46 = vpop.f32.mrb[14].mxu0  ;;  %v2307_v47 = vpop.eup %2306  ;;  %v2021_v48 = vpack.c.bf16 %v2305_v41, %v2297_v31  ;;  %v1069_v49 = vadd.f32 %v2551_v34, %v946_v45  ;;  %2328 = vtanh.f32 %v1071_v43 }
 0x103   : > { %v1040_v50 = vadd.f32 %v2167_v46, %v2551_v34  ;;  %v2199_v51 = vpop.f32.mrb[14].mxu1  ;;  %v821_v52 = vpop.f32.mrb[15].mxu0  ;;  %2085 = vst [vmem:[%s2574_s29 + $0x18] sm:$0xff] %v1941_v42   ;;  %v1936_v54 = vpack.c.bf16 %v2307_v47, %v2299_v33  ;;  %2330 = vtanh.f32 %v1037_v44 }
 0x104   : > { %v2309_v53 = vpop.eup %2308  ;;  %v1072_v55 = vadd.f32 %v2199_v51, %v2551_v34  ;;  %v949_v56 = vpop.f32.mrb[15].mxu1  ;;  %2101 = vst [vmem:[%s2574_s29 + $0x98] sm:$0xff] %v2021_v48   ;;  %v1038_v59 = vadd.f32 %v2551_v34, %v821_v52  ;;  %2332 = vtanh.f32 %v1069_v49 }
 0x105   : > { %v2311_v57 = vpop.eup %2310  ;;  %v2016_v58 = vpack.c.bf16 %v2309_v53, %v2301_v35  ;;  %2084 = vst [vmem:[%s2574_s29 + $0x10] sm:$0xff] %v1936_v54   ;;  %v1070_v61 = vadd.f32 %v2551_v34, %v949_v56  ;;  %2334 = vtanh.f32 %v1040_v50 }
 0x106   : > { %v2313_v60 = vpop.eup %2312  ;;  %2336 = vtanh.f32 %v1072_v55  ;;  %v2170_v0 = vpop.f32.mrb[16].mxu0 }
 0x107   : > { %v2315_v62 = vpop.eup %2314  ;;  %2100 = vst [vmem:[%s2574_s29 + $0x90] sm:$0xff] %v2016_v58   ;;  %2338 = vtanh.f32 %v1038_v59  ;;  %v1043_v2 = vadd.f32 %v2170_v0, %v2551_v34  ;;  %v2202_v3 = vpop.f32.mrb[16].mxu1 }
 0x108   : > { %v2317_v63 = vpop.eup %2316  ;;  %v834_v4 = vpop.f32.mrb[17].mxu0  ;;  %2340 = vtanh.f32 %v1070_v61  ;;  %v1075_v7 = vadd.f32 %v2202_v3, %v2551_v34 }
 0x109   : > { %v2319_v1 = vpop.eup %2318  ;;  %v1041_v8 = vadd.f32 %v2551_v34, %v834_v4  ;;  %v962_v9 = vpop.f32.mrb[17].mxu1  ;;  %2342 = vtanh.f32 %v1043_v2 }
 0x10a   : > { %v2321_v5 = vpop.eup %2320  ;;  %v1951_v6 = vpack.c.bf16 %v2319_v1, %v2311_v57  ;;  %v2171_v10 = vpop.f32.mrb[18].mxu0  ;;  %v1073_v13 = vadd.f32 %v2551_v34, %v962_v9  ;;  %2344 = vtanh.f32 %v1075_v7 }
 0x10b   : > { %v2323_v11 = vpop.eup %2322  ;;  %v2031_v12 = vpack.c.bf16 %v2321_v5, %v2313_v60  ;;  %v1044_v14 = vadd.f32 %v2171_v10, %v2551_v34  ;;  %v2203_v15 = vpop.f32.mrb[18].mxu1  ;;  %2346 = vtanh.f32 %v1041_v8 }
 0x10c   : > { %v837_v16 = vpop.f32.mrb[19].mxu0  ;;  %v2325_v17 = vpop.eup %2324  ;;  %2087 = vst [vmem:[%s2574_s29 + $0x28] sm:$0xff] %v1951_v6   ;;  %v1946_v18 = vpack.c.bf16 %v2323_v11, %v2315_v62  ;;  %v1076_v19 = vadd.f32 %v2203_v15, %v2551_v34  ;;  %2348 = vtanh.f32 %v1073_v13 }
 0x10d   : > { %v965_v20 = vpop.f32.mrb[19].mxu1  ;;  %v2327_v21 = vpop.eup %2326  ;;  %2103 = vst [vmem:[%s2574_s29 + $0xa8] sm:$0xff] %v2031_v12   ;;  %v2026_v22 = vpack.c.bf16 %v2325_v17, %v2317_v63  ;;  %v1042_v23 = vadd.f32 %v2551_v34, %v837_v16  ;;  %2350 = vtanh.f32 %v1044_v14 }
 0x10e   : > { %v2329_v24 = vpop.eup %2328  ;;  %2086 = vst [vmem:[%s2574_s29 + $0x20] sm:$0xff] %v1946_v18   ;;  %v1074_v25 = vadd.f32 %v2551_v34, %v965_v20  ;;  %2352 = vtanh.f32 %v1076_v19  ;;  %v2174_v28 = vpop.f32.mrb[20].mxu0 }
 0x10f   : > { %v2331_v26 = vpop.eup %2330  ;;  %2102 = vst [vmem:[%s2574_s29 + $0xa0] sm:$0xff] %v2026_v22   ;;  %2354 = vtanh.f32 %v1042_v23  ;;  %v1047_v30 = vadd.f32 %v2174_v28, %v2551_v34  ;;  %v2206_v31 = vpop.f32.mrb[20].mxu1 }
 0x110   : > { %v2333_v27 = vpop.eup %2332  ;;  %v850_v32 = vpop.f32.mrb[21].mxu0  ;;  %2356 = vtanh.f32 %v1074_v25  ;;  %v1079_v36 = vadd.f32 %v2206_v31, %v2551_v34 }
 0x111   : > { %v2335_v29 = vpop.eup %2334  ;;  %v1045_v37 = vadd.f32 %v2551_v34, %v850_v32  ;;  %v978_v38 = vpop.f32.mrb[21].mxu1  ;;  %2358 = vtanh.f32 %v1047_v30 }
 0x112   : > { %v2337_v33 = vpop.eup %2336  ;;  %v1961_v35 = vpack.c.bf16 %v2335_v29, %v2327_v21  ;;  %v2175_v39 = vpop.f32.mrb[22].mxu0  ;;  %v1077_v42 = vadd.f32 %v2551_v34, %v978_v38  ;;  %2360 = vtanh.f32 %v1079_v36 }
 0x113   : > { %v2339_v40 = vpop.eup %2338  ;;  %v2041_v41 = vpack.c.bf16 %v2337_v33, %v2329_v24  ;;  %v1048_v43 = vadd.f32 %v2175_v39, %v2551_v34  ;;  %v2207_v44 = vpop.f32.mrb[22].mxu1  ;;  %2362 = vtanh.f32 %v1045_v37 }
 0x114   : > { %v853_v45 = vpop.f32.mrb[23].mxu0  ;;  %v2341_v46 = vpop.eup %2340  ;;  %2089 = vst [vmem:[%s2574_s29 + $0x38] sm:$0xff] %v1961_v35   ;;  %v1956_v47 = vpack.c.bf16 %v2339_v40, %v2331_v26  ;;  %v1080_v48 = vadd.f32 %v2207_v44, %v2551_v34  ;;  %2364 = vtanh.f32 %v1077_v42 }
 0x115   : > { %v981_v49 = vpop.f32.mrb[23].mxu1  ;;  %v2343_v50 = vpop.eup %2342  ;;  %2105 = vst [vmem:[%s2574_s29 + $0xb8] sm:$0xff] %v2041_v41   ;;  %v2036_v51 = vpack.c.bf16 %v2341_v46, %v2333_v27  ;;  %v1046_v52 = vadd.f32 %v2551_v34, %v853_v45  ;;  %2366 = vtanh.f32 %v1048_v43 }
 0x116   : > { %v2345_v53 = vpop.eup %2344  ;;  %2088 = vst [vmem:[%s2574_s29 + $0x30] sm:$0xff] %v1956_v47   ;;  %v1078_v54 = vadd.f32 %v2551_v34, %v981_v49  ;;  %2368 = vtanh.f32 %v1080_v48  ;;  %v2178_v57 = vpop.f32.mrb[24].mxu0 }
 0x117   : > { %v2347_v55 = vpop.eup %2346  ;;  %2104 = vst [vmem:[%s2574_s29 + $0xb0] sm:$0xff] %v2036_v51   ;;  %2370 = vtanh.f32 %v1046_v52  ;;  %v1051_v59 = vadd.f32 %v2178_v57, %v2551_v34  ;;  %v2210_v60 = vpop.f32.mrb[24].mxu1 }
 0x118   : > { %v2349_v56 = vpop.eup %2348  ;;  %v866_v61 = vpop.f32.mrb[25].mxu0  ;;  %2372 = vtanh.f32 %v1078_v54  ;;  %v1083_v0 = vadd.f32 %v2210_v60, %v2551_v34 }
 0x119   : > { %v2351_v58 = vpop.eup %2350  ;;  %v1049_v1 = vadd.f32 %v2551_v34, %v866_v61  ;;  %v994_v2 = vpop.f32.mrb[25].mxu1  ;;  %2374 = vtanh.f32 %v1051_v59 }
 0x11a   : > { %v2353_v62 = vpop.eup %2352  ;;  %v1971_v63 = vpack.c.bf16 %v2351_v58, %v2343_v50  ;;  %v2179_v3 = vpop.f32.mrb[26].mxu0  ;;  %v1081_v6 = vadd.f32 %v2551_v34, %v994_v2  ;;  %2376 = vtanh.f32 %v1083_v0 }
 0x11b   : > { %v2355_v4 = vpop.eup %2354  ;;  %v2051_v5 = vpack.c.bf16 %v2353_v62, %v2345_v53  ;;  %v1052_v7 = vadd.f32 %v2179_v3, %v2551_v34  ;;  %v2211_v8 = vpop.f32.mrb[26].mxu1  ;;  %2378 = vtanh.f32 %v1049_v1 }
 0x11c   : > { %v869_v9 = vpop.f32.mrb[27].mxu0  ;;  %v2357_v10 = vpop.eup %2356  ;;  %2091 = vst [vmem:[%s2574_s29 + $0x48] sm:$0xff] %v1971_v63   ;;  %v1966_v11 = vpack.c.bf16 %v2355_v4, %v2347_v55  ;;  %v1084_v12 = vadd.f32 %v2211_v8, %v2551_v34  ;;  %2380 = vtanh.f32 %v1081_v6 }
 0x11d   : > { %v997_v13 = vpop.f32.mrb[27].mxu1  ;;  %v2359_v14 = vpop.eup %2358  ;;  %2107 = vst [vmem:[%s2574_s29 + $0xc8] sm:$0xff] %v2051_v5   ;;  %v2046_v15 = vpack.c.bf16 %v2357_v10, %v2349_v56  ;;  %v1050_v16 = vadd.f32 %v2551_v34, %v869_v9  ;;  %2382 = vtanh.f32 %v1052_v7 }
 0x11e   : > { %v2361_v17 = vpop.eup %2360  ;;  %2090 = vst [vmem:[%s2574_s29 + $0x40] sm:$0xff] %v1966_v11   ;;  %v1082_v18 = vadd.f32 %v2551_v34, %v997_v13  ;;  %2384 = vtanh.f32 %v1084_v12  ;;  %v2182_v21 = vpop.f32.mrb[28].mxu0 }
 0x11f   : > { %v2363_v19 = vpop.eup %2362  ;;  %2106 = vst [vmem:[%s2574_s29 + $0xc0] sm:$0xff] %v2046_v15   ;;  %2386 = vtanh.f32 %v1050_v16  ;;  %v1055_v23 = vadd.f32 %v2182_v21, %v2551_v34  ;;  %v2214_v24 = vpop.f32.mrb[28].mxu1 }
 0x120   : > { %v2365_v20 = vpop.eup %2364  ;;  %v882_v25 = vpop.f32.mrb[29].mxu0  ;;  %2388 = vtanh.f32 %v1082_v18  ;;  %v1087_v28 = vadd.f32 %v2214_v24, %v2551_v34 }
 0x121   : > { %v2367_v22 = vpop.eup %2366  ;;  %v1053_v29 = vadd.f32 %v2551_v34, %v882_v25  ;;  %v1010_v30 = vpop.f32.mrb[29].mxu1  ;;  %2390 = vtanh.f32 %v1055_v23 }
 0x122   : > { %v2369_v26 = vpop.eup %2368  ;;  %v1981_v27 = vpack.c.bf16 %v2367_v22, %v2359_v14  ;;  %v2183_v31 = vpop.f32.mrb[30].mxu0  ;;  %v1085_v35 = vadd.f32 %v2551_v34, %v1010_v30  ;;  %2392 = vtanh.f32 %v1087_v28 }
 0x123   : > { %v2371_v32 = vpop.eup %2370  ;;  %v2061_v33 = vpack.c.bf16 %v2369_v26, %v2361_v17  ;;  %v1056_v36 = vadd.f32 %v2183_v31, %v2551_v34  ;;  %v2215_v37 = vpop.f32.mrb[30].mxu1  ;;  %2394 = vtanh.f32 %v1053_v29 }
 0x124   : > { %v885_v38 = vpop.f32.mrb[31].mxu0  ;;  %v2373_v39 = vpop.eup %2372  ;;  %2093 = vst [vmem:[%s2574_s29 + $0x58] sm:$0xff] %v1981_v27   ;;  %v1976_v40 = vpack.c.bf16 %v2371_v32, %v2363_v19  ;;  %v1088_v41 = vadd.f32 %v2215_v37, %v2551_v34  ;;  %2396 = vtanh.f32 %v1085_v35 }
 0x125   : > { %v1013_v42 = vpop.f32.mrb[31].mxu1  ;;  %v2375_v43 = vpop.eup %2374  ;;  %2109 = vst [vmem:[%s2574_s29 + $0xd8] sm:$0xff] %v2061_v33   ;;  %v2056_v44 = vpack.c.bf16 %v2373_v39, %v2365_v20  ;;  %v1054_v45 = vadd.f32 %v2551_v34, %v885_v38  ;;  %2398 = vtanh.f32 %v1056_v36 }
 0x126   : > { %v2377_v46 = vpop.eup %2376  ;;  %2092 = vst [vmem:[%s2574_s29 + $0x50] sm:$0xff] %v1976_v40   ;;  %v1086_v47 = vadd.f32 %v2551_v34, %v1013_v42  ;;  %2400 = vtanh.f32 %v1088_v41 }
 0x127   : > { %v2379_v48 = vpop.eup %2378  ;;  %2108 = vst [vmem:[%s2574_s29 + $0xd0] sm:$0xff] %v2056_v44   ;;  %2402 = vtanh.f32 %v1054_v45 }
 0x128   : > { %v2381_v49 = vpop.eup %2380  ;;  %2404 = vtanh.f32 %v1086_v47 }
 0x129   : > { %v2383_v50 = vpop.eup %2382 }
 0x12a   : > { %v2385_v51 = vpop.eup %2384  ;;  %v1991_v52 = vpack.c.bf16 %v2383_v50, %v2375_v43 }
 0x12b   : > { %v2387_v53 = vpop.eup %2386  ;;  %v2071_v54 = vpack.c.bf16 %v2385_v51, %v2377_v46 }
 0x12c   : > { %v2389_v55 = vpop.eup %2388  ;;  %2095 = vst [vmem:[%s2574_s29 + $0x68] sm:$0xff] %v1991_v52   ;;  %v1986_v56 = vpack.c.bf16 %v2387_v53, %v2379_v48 }
 0x12d   : > { %v2391_v34 = vpop.eup %2390  ;;  %2111 = vst [vmem:[%s2574_s29 + $0xe8] sm:$0xff] %v2071_v54   ;;  %v2066_v57 = vpack.c.bf16 %v2389_v55, %v2381_v49 }
 0x12e   : > { %v2393_v58 = vpop.eup %2392  ;;  %2094 = vst [vmem:[%s2574_s29 + $0x60] sm:$0xff] %v1986_v56  }
 0x12f   : > { %v2395_v59 = vpop.eup %2394  ;;  %2110 = vst [vmem:[%s2574_s29 + $0xe0] sm:$0xff] %v2066_v57  }
 0x130   : > { %v2397_v60 = vpop.eup %2396 }
 0x131   : > { %v2399_v61 = vpop.eup %2398 }
 0x132   : > { %v2401_v62 = vpop.eup %2400  ;;  %v2001_v63 = vpack.c.bf16 %v2399_v61, %v2391_v34 }
 0x133   : > { %v2403_v0 = vpop.eup %2402  ;;  %v2081_v1 = vpack.c.bf16 %v2401_v62, %v2393_v58 }
 0x134   : > { %v2405_v2 = vpop.eup %2404  ;;  %2097 = vst [vmem:[%s2574_s29 + $0x78] sm:$0xff] %v2001_v63   ;;  %v1996_v3 = vpack.c.bf16 %v2403_v0, %v2395_v59 }
 0x135   : > { %2113 = vst [vmem:[%s2574_s29 + $0xf8] sm:$0xff] %v2081_v1   ;;  %v2076_v4 = vpack.c.bf16 %v2405_v2, %v2397_v60 }
 0x136   : > { %2096 = vst [vmem:[%s2574_s29 + $0x70] sm:$0xff] %v1996_v3  }
 0x137   : > { %2112 = vst [vmem:[%s2574_s29 + $0xf0] sm:$0xff] %v2076_v4  }
 0x138 PF: > { %s13_s14 = sadd.s32 1, %s2428_s14   ;;  %s2669_s12 = smov %s2424_s13 }
 0x139   : > { %p10_p5 = scmp.ge.s32.totalorder %s13_s14, 6   ;;  %s2670_s13 = smov %s2672_s15 }
 0x13b   :  { %12 = sbr.rel (!%p10_p5) target bundleno = 2 (0x2), region = 76 }

</bundles_post_ra>
